<compile_context>
chip_gen: v7x
topology: tpu7x:2x2x1
jax: 0.10.0
libtpu: 0.0.40
codegen_flags: <defaults>
</compile_context>

<pallas_src>
import jax
import jax.numpy as jnp
from jax.experimental import pallas as pl
from jax.experimental.pallas import tpu as pltpu


def _attention_kernel(a1_ref, v_ref, we_ref, wf_ref, o_ref, m_sc, l_sc, acc_sc):
    # a1_ref : (bb, attn)     precomputed h @ Wd (f32)
    # v_ref  : (bb, Lt, enc)  encoder feature tile (input dtype)
    # we_ref : (enc, attn)    encoder projection weight (bf16 by default)
    # wf_ref : (1, attn)      final projection as a lane-dense row (f32)
    # o_ref  : (bb, enc)      context (written on the last L step)
    # m_sc   : (bb, 1)  f32   running max
    # l_sc   : (bb, 1)  f32   running softmax denominator
    # acc_sc : (bb, enc) f32  running un-normalized context
    li = pl.program_id(1)

    @pl.when(li == 0)
    def _():
        m_sc[...] = jnp.full_like(m_sc, -jnp.inf)
        l_sc[...] = jnp.zeros_like(l_sc)
        acc_sc[...] = jnp.zeros_like(acc_sc)

    V = v_ref[...]                                    # (bb, Lt, enc)
    bb, Lt, enc = V.shape
    attn = we_ref.shape[1]

    # attn_2 = V @ We as one dense MXU matmul, bf16 inputs, f32 accumulation.
    a2 = jnp.dot(V.reshape(bb * Lt, enc).astype(we_ref.dtype),
                 we_ref[...],
                 preferred_element_type=jnp.float32)
    a2 = a2.reshape(bb, Lt, attn)                     # (bb, Lt, attn) f32

    # scores = tanh(a1 + a2) @ wf  -- wf projection via VPU multiply + lane
    # reduction (keeps the MXU free for the a2 matmul).
    t = jnp.tanh(a1_ref[...][:, None, :] + a2)        # (bb, Lt, attn)
    s = jnp.sum(t * wf_ref[...][None, :, :], axis=-1)  # (bb, Lt)

    # Online (flash-style) softmax update over the L axis.
    m_prev = m_sc[...]
    m_new = jnp.maximum(m_prev, jnp.max(s, axis=-1, keepdims=True))   # (bb, 1)
    corr = jnp.exp(m_prev - m_new)                                    # (bb, 1)
    p = jnp.exp(s - m_new)                                            # (bb, Lt)
    l_sc[...] = corr * l_sc[...] + jnp.sum(p, axis=-1, keepdims=True)
    m_sc[...] = m_new

    # Context contribution for this L chunk: multiply in V's dtype, accumulate
    # into the f32 scratch.
    pv = p.astype(V.dtype)[:, :, None] * V                            # (bb, Lt, enc)
    acc_sc[...] = corr * acc_sc[...] + jnp.sum(pv, axis=1, dtype=jnp.float32)

    @pl.when(li == pl.num_programs(1) - 1)
    def _():
        inv_l = pl.reciprocal(l_sc[...], approx=True)                 # EUP divide
        o_ref[...] = (acc_sc[...] * inv_l).astype(o_ref.dtype)


def _divisor_tile(total, cap, align):
    """Largest divisor of `total` that is <= cap and a multiple of `align`."""
    cap = min(cap, total)
    for d in range(cap, 0, -1):
        if total % d == 0 and d % align == 0:
            return d
    return None


def attention(h, V, wd_t, we_t, wf_t, *, block_b=8, block_l=256,
              mxu_dtype=jnp.bfloat16):
    """Additive attention.

    h:  (B, dec_dim), V: (B, L, enc_dim).
    Weights are pre-transposed to (in, out): wd_t (dec, attn), we_t (enc, attn),
    wf_t (attn, 1).  `mxu_dtype` controls the matmul input precision (bf16 by
    default; pass jnp.float32 for exact parity with the reference).
    """
    B, dec_dim = h.shape
    _, L, enc_dim = V.shape
    attn_dim = wd_t.shape[1]

    # Hoist the tiny decoder projection out of the kernel (single fused XLA
    # matmul instead of an underfilled per-step MXU pass).
    a1 = jnp.dot(h.astype(jnp.float32), wd_t.astype(jnp.float32))   # (B, attn)

    we_kernel = we_t.astype(mxu_dtype)                               # (enc, attn)
    wf_row = wf_t.reshape(1, attn_dim).astype(jnp.float32)           # (1, attn)

    # Batch tile: a multiple of 8 sublanes unless the whole batch fits one
    # block.  No padding of V: a ragged last block is masked by Pallas.
    if B <= block_b:
        bb = B
    else:
        bb = max(8, (min(block_b, B) // 8) * 8)
    grid_b = pl.cdiv(B, bb)

    # L tile: must divide L (softmax tiles cannot contain padded columns) and
    # be a multiple of 8; prefer lane-dense multiples of 128.  Falls back to
    # the full L (still correct, just larger VMEM) if no divisor exists.
    lt = (_divisor_tile(L, block_l, 128) or _divisor_tile(L, block_l, 8) or L)
    grid_l = L // lt

    # Explicit VMEM budget derived from the chosen tiles (double-buffered
    # inputs/outputs + in-kernel temporaries), clamped to sane bounds.
    isz = jnp.dtype(V.dtype).itemsize
    wsz = jnp.dtype(mxu_dtype).itemsize
    vmem_est = (
        2 * bb * lt * enc_dim * isz                    # V tile (double-buffered)
        + 2 * bb * attn_dim * 4                        # a1 tile
        + 2 * enc_dim * attn_dim * wsz                 # We
        + 2 * max(attn_dim, 128) * 4                   # wf row
        + 2 * bb * enc_dim * isz                       # output tile
        + bb * (enc_dim + 16) * 4                      # scratch
        + bb * lt * (2 * attn_dim + enc_dim) * 4       # a2 / tanh / pv temps
        + bb * lt * enc_dim * wsz                      # bf16 cast of V tile
    )
    vmem_limit = int(min(max(vmem_est * 1.25, 32 * 1024 * 1024),
                         96 * 1024 * 1024))

    cost = pl.CostEstimate(
        flops=int(2 * B * L * enc_dim * attn_dim          # a2 matmul
                  + 4 * B * L * attn_dim                  # add + wf reduce
                  + 4 * B * L * enc_dim                   # alpha*V + accumulate
                  + 2 * B * dec_dim * attn_dim),          # hoisted a1
        transcendentals=int(B * L * (attn_dim + 1)),
        bytes_accessed=int(isz * (B * L * enc_dim + B * enc_dim)
                           + 4 * B * attn_dim
                           + wsz * enc_dim * attn_dim + 4 * attn_dim),
    )

    out = pl.pallas_call(
        _attention_kernel,
        out_shape=jax.ShapeDtypeStruct((B, enc_dim), V.dtype),
        grid_spec=pltpu.PrefetchScalarGridSpec(
            num_scalar_prefetch=0,
            grid=(grid_b, grid_l),
            in_specs=[
                pl.BlockSpec((bb, attn_dim), lambda b, l: (b, 0)),
                pl.BlockSpec((bb, lt, enc_dim), lambda b, l: (b, l, 0)),
                pl.BlockSpec((enc_dim, attn_dim), lambda b, l: (0, 0)),
                pl.BlockSpec((1, attn_dim), lambda b, l: (0, 0)),
            ],
            out_specs=pl.BlockSpec((bb, enc_dim), lambda b, l: (b, 0)),
            scratch_shapes=[
                pltpu.VMEM((bb, 1), jnp.float32),        # running max
                pltpu.VMEM((bb, 1), jnp.float32),        # running denom
                pltpu.VMEM((bb, enc_dim), jnp.float32),  # running context
            ],
        ),
        compiler_params=pltpu.CompilerParams(
            dimension_semantics=("parallel", "arbitrary"),
            vmem_limit_bytes=vmem_limit,
        ),
        cost_estimate=cost,
    )(a1, V, we_kernel, wf_row)
    return out


def attention_ref(h, V, wd_t, we_t, wf_t):
    """Pure-JAX f32 reference mirroring the PyTorch forward."""
    a1 = h @ wd_t                                            # (B, A)
    a2 = jnp.einsum("ble,ea->bla", V, we_t)                  # (B, L, A)
    scores = jnp.einsum("bla,ao->blo",
                        jnp.tanh(a1[:, None, :] + a2), wf_t)[..., 0]
    alpha = jax.nn.softmax(scores, axis=-1)                  # (B, L)
    return jnp.einsum("bl,ble->be", alpha, V)                # (B, E)


if __name__ == "__main__":
    # Small shapes consistent with the module; chosen so the kernel exercises
    # both grid axes (2 batch blocks x 2 L blocks).
    B, L = 16, 128
    enc_dim, dec_dim, attn_dim = 64, 64, 64

    key = jax.random.PRNGKey(0)
    k_h, k_v, k_wd, k_we, k_wf = jax.random.split(key, 5)

    h = jax.random.normal(k_h, (B, dec_dim), dtype=jnp.float32)
    V = jax.random.normal(k_v, (B, L, enc_dim), dtype=jnp.float32)

    # Deterministic "Linear" weights (PyTorch stores (out, in); kept here
    # pre-transposed to (in, out) so the kernel does plain x @ W).
    wd_t = (jax.random.normal(k_wd, (dec_dim, attn_dim), dtype=jnp.float32)
            * (1.0 / jnp.sqrt(dec_dim)))
    we_t = (jax.random.normal(k_we, (enc_dim, attn_dim), dtype=jnp.float32)
            * (1.0 / jnp.sqrt(enc_dim)))
    wf_t = (jax.random.normal(k_wf, (attn_dim, 1), dtype=jnp.float32)
            * (1.0 / jnp.sqrt(attn_dim)))

    ctx = jax.block_until_ready(
        attention(h, V, wd_t, we_t, wf_t, block_b=8, block_l=64))
    ref = attention_ref(h, V, wd_t, we_t, wf_t)

    assert ctx.shape == (B, enc_dim)
    assert not bool(jnp.any(jnp.isnan(ctx)))
    # Tolerance accounts for the bf16 MXU projection (f32 accumulation) and the
    # EUP approximate reciprocal in the softmax normalization.
    max_err = float(jnp.max(jnp.abs(ctx - ref)))
    assert jnp.allclose(ctx, ref, atol=2e-2, rtol=2e-2), f"max err {max_err}"
    print("KERNEL_OK")
</pallas_src>

<mosaic_0001>
module attributes {stable_mosaic.version = 11 : i64} {
  func.func @_attention_kernel(%arg0: i32, %arg1: i32, %arg2: memref<8x64xf32, #tpu.memory_space<vmem>>, %arg3: memref<8x64x64xf32, #tpu.memory_space<vmem>>, %arg4: memref<64x64xbf16, #tpu.memory_space<vmem>>, %arg5: memref<1x64xf32, #tpu.memory_space<vmem>>, %arg6: memref<8x64xf32, #tpu.memory_space<vmem>>, %arg7: memref<8x1xf32, #tpu.memory_space<vmem>>, %arg8: memref<8x1xf32, #tpu.memory_space<vmem>>, %arg9: memref<8x64xf32, #tpu.memory_space<vmem>>) attributes {dimension_semantics = [#tpu.dimension_semantics<parallel>, #tpu.dimension_semantics<arbitrary>], iteration_bounds = array<i64: 2, 2>, scalar_prefetch = 0 : i64, scratch_operands = 3 : i64, tpu.core_type = #tpu.core_type<tc>, window_params = [{transform_indices = @transform_0, window_bounds = array<i64: 8, 64>}, {transform_indices = @transform_1, window_bounds = array<i64: 8, 64, 64>}, {pipeline_mode = #tpu.pipeline_mode<synchronous>, transform_indices = @transform_2, window_bounds = array<i64: 64, 64>}, {pipeline_mode = #tpu.pipeline_mode<synchronous>, transform_indices = @transform_3, window_bounds = array<i64: 1, 64>}, {transform_indices = @transform_4, window_bounds = array<i64: 8, 64>}]} {
    %c0_i32 = arith.constant 0 : i32
    %0 = arith.cmpi eq, %arg1, %c0_i32 : i32
    %1 = arith.extui %0 : i1 to i32
    %c0_i32_0 = arith.constant 0 : i32
    %2 = arith.cmpi ne, %1, %c0_i32_0 : i32
    scf.if %2 {
      %cst_26 = arith.constant 0xFF800000 : f32
      %47 = vector.broadcast %cst_26 : f32 to vector<8x1xf32>
      %c0_27 = arith.constant 0 : index
      %c0_28 = arith.constant 0 : index
      %48 = vector.load %arg7[%c0_27, %c0_28] : memref<8x1xf32, #tpu.memory_space<vmem>>, vector<8x1xf32>
      tpu.vector_store %arg7[%c0_27, %c0_28], %47 {strides = array<i32>} : memref<8x1xf32, #tpu.memory_space<vmem>>, vector<8x1xf32>,
      %cst_29 = arith.constant 0.000000e+00 : f32
      %49 = vector.broadcast %cst_29 : f32 to vector<8x1xf32>
      %c0_30 = arith.constant 0 : index
      %c0_31 = arith.constant 0 : index
      %50 = vector.load %arg8[%c0_30, %c0_31] : memref<8x1xf32, #tpu.memory_space<vmem>>, vector<8x1xf32>
      tpu.vector_store %arg8[%c0_30, %c0_31], %49 {strides = array<i32>} : memref<8x1xf32, #tpu.memory_space<vmem>>, vector<8x1xf32>,
      %cst_32 = arith.constant 0.000000e+00 : f32
      %51 = vector.broadcast %cst_32 : f32 to vector<8x64xf32>
      %c0_33 = arith.constant 0 : index
      %c0_34 = arith.constant 0 : index
      %52 = vector.load %arg9[%c0_33, %c0_34] : memref<8x64xf32, #tpu.memory_space<vmem>>, vector<8x64xf32>
      tpu.vector_store %arg9[%c0_33, %c0_34], %51 {strides = array<i32>} : memref<8x64xf32, #tpu.memory_space<vmem>>, vector<8x64xf32>,
    } else {
    }
    %c0 = arith.constant 0 : index
    %c0_1 = arith.constant 0 : index
    %c0_2 = arith.constant 0 : index
    %3 = vector.load %arg3[%c0, %c0_1, %c0_2] : memref<8x64x64xf32, #tpu.memory_space<vmem>>, vector<8x64x64xf32>
    %4 = vector.shape_cast %3 : vector<8x64x64xf32> to vector<512x64xf32>
    %5 = arith.truncf %4 : vector<512x64xf32> to vector<512x64xbf16>
    %c0_3 = arith.constant 0 : index
    %c0_4 = arith.constant 0 : index
    %6 = vector.load %arg4[%c0_3, %c0_4] : memref<64x64xbf16, #tpu.memory_space<vmem>>, vector<64x64xbf16>
    %cst = arith.constant dense<0.000000e+00> : vector<512x64xf32>
    %7 = tpu.matmul %5, %6, %cst {dimension_numbers = #tpu.dot_dimension_numbers<[1], [0], [0], [1], [0, 0, 1, 1], [], []>} : vector<512x64xbf16>, vector<64x64xbf16>, vector<512x64xf32> -> vector<512x64xf32>
    %8 = vector.shape_cast %7 : vector<512x64xf32> to vector<8x64x64xf32>
    %c0_5 = arith.constant 0 : index
    %c0_6 = arith.constant 0 : index
    %9 = vector.load %arg2[%c0_5, %c0_6] : memref<8x64xf32, #tpu.memory_space<vmem>>, vector<8x64xf32>
    %10 = vector.shape_cast %9 : vector<8x64xf32> to vector<8x1x64xf32>
    %11 = vector.broadcast %10 : vector<8x1x64xf32> to vector<8x64x64xf32>
    %12 = arith.addf %11, %8 : vector<8x64x64xf32>
    %13 = math.tanh %12 : vector<8x64x64xf32>
    %c0_7 = arith.constant 0 : index
    %c0_8 = arith.constant 0 : index
    %14 = vector.load %arg5[%c0_7, %c0_8] : memref<1x64xf32, #tpu.memory_space<vmem>>, vector<1x64xf32>
    %15 = vector.shape_cast %14 : vector<1x64xf32> to vector<1x1x64xf32>
    %16 = vector.broadcast %15 : vector<1x1x64xf32> to vector<8x64x64xf32>
    %17 = arith.mulf %13, %16 : vector<8x64x64xf32>
    %cst_9 = arith.constant dense<0.000000e+00> : vector<8x64xf32>
    %18 = vector.multi_reduction <add>, %17, %cst_9 [2] : vector<8x64x64xf32> to vector<8x64xf32>
    %c0_10 = arith.constant 0 : index
    %c0_11 = arith.constant 0 : index
    %19 = vector.load %arg7[%c0_10, %c0_11] : memref<8x1xf32, #tpu.memory_space<vmem>>, vector<8x1xf32>
    %cst_12 = arith.constant dense<0xFF800000> : vector<8xf32>
    %20 = vector.multi_reduction <maximumf>, %18, %cst_12 [1] : vector<8x64xf32> to vector<8xf32>
    %21 = vector.shape_cast %20 : vector<8xf32> to vector<8x1xf32>
    %22 = arith.maximumf %19, %21 : vector<8x1xf32>
    %23 = arith.subf %19, %22 : vector<8x1xf32>
    %24 = math.exp %23 : vector<8x1xf32>
    %25 = vector.broadcast %22 : vector<8x1xf32> to vector<8x64xf32>
    %26 = arith.subf %18, %25 : vector<8x64xf32>
    %27 = math.exp %26 : vector<8x64xf32>
    %c0_13 = arith.constant 0 : index
    %c0_14 = arith.constant 0 : index
    %28 = vector.load %arg8[%c0_13, %c0_14] : memref<8x1xf32, #tpu.memory_space<vmem>>, vector<8x1xf32>
    %29 = arith.mulf %24, %28 : vector<8x1xf32>
    %cst_15 = arith.constant dense<0.000000e+00> : vector<8xf32>
    %30 = vector.multi_reduction <add>, %27, %cst_15 [1] : vector<8x64xf32> to vector<8xf32>
    %31 = vector.shape_cast %30 : vector<8xf32> to vector<8x1xf32>
    %32 = arith.addf %29, %31 : vector<8x1xf32>
    %c0_16 = arith.constant 0 : index
    %c0_17 = arith.constant 0 : index
    %33 = vector.load %arg8[%c0_16, %c0_17] : memref<8x1xf32, #tpu.memory_space<vmem>>, vector<8x1xf32>
    tpu.vector_store %arg8[%c0_16, %c0_17], %32 {strides = array<i32>} : memref<8x1xf32, #tpu.memory_space<vmem>>, vector<8x1xf32>,
    %c0_18 = arith.constant 0 : index
    %c0_19 = arith.constant 0 : index
    %34 = vector.load %arg7[%c0_18, %c0_19] : memref<8x1xf32, #tpu.memory_space<vmem>>, vector<8x1xf32>
    tpu.vector_store %arg7[%c0_18, %c0_19], %22 {strides = array<i32>} : memref<8x1xf32, #tpu.memory_space<vmem>>, vector<8x1xf32>,
    %35 = vector.shape_cast %27 : vector<8x64xf32> to vector<8x64x1xf32>
    %36 = vector.broadcast %35 : vector<8x64x1xf32> to vector<8x64x64xf32>
    %37 = arith.mulf %36, %3 : vector<8x64x64xf32>
    %c0_20 = arith.constant 0 : index
    %c0_21 = arith.constant 0 : index
    %38 = vector.load %arg9[%c0_20, %c0_21] : memref<8x64xf32, #tpu.memory_space<vmem>>, vector<8x64xf32>
    %39 = vector.broadcast %24 : vector<8x1xf32> to vector<8x64xf32>
    %40 = arith.mulf %39, %38 : vector<8x64xf32>
    %cst_22 = arith.constant dense<0.000000e+00> : vector<8x64xf32>
    %41 = vector.multi_reduction <add>, %37, %cst_22 [1] : vector<8x64x64xf32> to vector<8x64xf32>
    %42 = arith.addf %40, %41 : vector<8x64xf32>
    %c0_23 = arith.constant 0 : index
    %c0_24 = arith.constant 0 : index
    %43 = vector.load %arg9[%c0_23, %c0_24] : memref<8x64xf32, #tpu.memory_space<vmem>>, vector<8x64xf32>
    tpu.vector_store %arg9[%c0_23, %c0_24], %42 {strides = array<i32>} : memref<8x64xf32, #tpu.memory_space<vmem>>, vector<8x64xf32>,
    %c1_i32 = arith.constant 1 : i32
    %44 = arith.cmpi eq, %arg1, %c1_i32 : i32
    %45 = arith.extui %44 : i1 to i32
    %c0_i32_25 = arith.constant 0 : i32
    %46 = arith.cmpi ne, %45, %c0_i32_25 : i32
    scf.if %46 {
      %c0_26 = arith.constant 0 : index
      %c0_27 = arith.constant 0 : index
      %47 = vector.load %arg8[%c0_26, %c0_27] : memref<8x1xf32, #tpu.memory_space<vmem>>, vector<8x1xf32>
      %48 = tpu.reciprocal %47 {approx = true} : vector<8x1xf32> -> vector<8x1xf32>
      %c0_28 = arith.constant 0 : index
      %c0_29 = arith.constant 0 : index
      %49 = vector.load %arg9[%c0_28, %c0_29] : memref<8x64xf32, #tpu.memory_space<vmem>>, vector<8x64xf32>
      %50 = vector.broadcast %48 : vector<8x1xf32> to vector<8x64xf32>
      %51 = arith.mulf %49, %50 : vector<8x64xf32>
      %c0_30 = arith.constant 0 : index
      %c0_31 = arith.constant 0 : index
      %52 = vector.load %arg6[%c0_30, %c0_31] : memref<8x64xf32, #tpu.memory_space<vmem>>, vector<8x64xf32>
      tpu.vector_store %arg6[%c0_30, %c0_31], %51 {strides = array<i32>} : memref<8x64xf32, #tpu.memory_space<vmem>>, vector<8x64xf32>,
    } else {
    }
    return
  }
  func.func @transform_0(%arg0: i32, %arg1: i32) -> (i32, i32) {
    %c0_i32 = arith.constant 0 : i32
    %c0_i32_0 = arith.constant 0 : i32
    return %arg0, %c0_i32 : i32, i32
  }
  func.func @transform_1(%arg0: i32, %arg1: i32) -> (i32, i32, i32) {
    %c0_i32 = arith.constant 0 : i32
    %c0_i32_0 = arith.constant 0 : i32
    return %arg0, %arg1, %c0_i32 : i32, i32, i32
  }
  func.func @transform_2(%arg0: i32, %arg1: i32) -> (i32, i32) {
    %c0_i32 = arith.constant 0 : i32
    %c0_i32_0 = arith.constant 0 : i32
    %c0_i32_1 = arith.constant 0 : i32
    return %c0_i32, %c0_i32_0 : i32, i32
  }
  func.func @transform_3(%arg0: i32, %arg1: i32) -> (i32, i32) {
    %c0_i32 = arith.constant 0 : i32
    %c0_i32_0 = arith.constant 0 : i32
    %c0_i32_1 = arith.constant 0 : i32
    return %c0_i32, %c0_i32_0 : i32, i32
  }
  func.func @transform_4(%arg0: i32, %arg1: i32) -> (i32, i32) {
    %c0_i32 = arith.constant 0 : i32
    %c0_i32_0 = arith.constant 0 : i32
    return %arg0, %c0_i32 : i32, i32
  }
}

</mosaic_0001>

<bundles_post_ra>
// kernel: tpu_custom_call.1
= control target key start
LH: loop header
LB: loop body
LE: loop exit
PB: predicated region body
PF: predicated region fallthrough
CT: control target
= control target key end

     0   :  { %s5697_s0 = inlined_call_operand.vmem [shape: f32[16,64], index: 0, kind: input, shape index: {}]   ;;  %s5698_s1 = inlined_call_operand.vmem [shape: f32[16,128,64], index: 1, kind: input, shape index: {}]   ;;  %s5699_s2 = inlined_call_operand.vmem [shape: bf16[64,64], index: 2, kind: input, shape index: {}]   ;;  %s5700_s3 = inlined_call_operand.vmem [shape: f32[1,64], index: 3, kind: input, shape index: {}]   ;;  %s5701_s4 = inlined_call_operand.hbm [shape: f32[16,64], index: 4, kind: output, shape index: {}]  }
   0x1   :  { %5737 = sst [smem:[#allocation42_spill]] %s5698_s1 }
   0x2   :  { %9 = vsyncpa [#allocation7], 0 }
   0x3   :  { %11 = vsyncpa [#allocation7 + $0x1], 0  ;;  %s3941_s15 = smov 0   ;;  %s3943_s16 = smov 0  }
   0x4   :  { %s3945_s17 = smov 0   ;;  %s3947_s18 = smov 0  }
   0x5   :  { %s3949_s19 = smov 0   ;;  %s3951_s20 = smov 0  }
   0x6   :  { %s3953_s21 = smov 0   ;;  %s3955_s22 = smov 0  }
   0x7   :  { %s3957_s23 = smov 0   ;;  %s3959_s24 = smov 0  }
   0x8 LB: > { %s3201_s25 = sadd.s32 4294967295, %s3908_s24   ;;  %s3202_s26 = sadd.s32 4294967294, %s3908_s24   ;;  %s3908_s24 = sphi %s3959_s24, %s17_s24   ;;  %s3904_s23 = sphi %s3957_s23, %s5816_s23   ;;  %s3900_s22 = sphi %s3955_s22, %s5815_s22   ;;  %s3896_s21 = sphi %s3953_s21, %s5814_s21   ;;  %s3892_s20 = sphi %s3951_s20, %s5813_s20   ;;  %s3888_s19 = sphi %s3949_s19, %s5812_s19   ;;  %s3884_s18 = sphi %s3947_s18, %s5811_s18   ;;  %s3880_s17 = sphi %s3945_s17, %s5810_s17   ;;  %s3876_s16 = sphi %s3943_s16, %s5809_s16   ;;  %s3872_s15 = sphi %s3941_s15, %s5808_s15  }
   0x9   : > { %s26_s27 = sadd.s32 1, %s3900_s22  ;;  %s29_s28 = sadd.s32 1, %s3904_s23 }
   0xa   : > { %p27_p0 = scmp.ge.s32.totalorder %s26_s27, 2  ;;  %s64_s29 = sadd.s32 1, %s3888_s19 }
   0xb   : > { %p71_p1 = scmp.ne.s32.totalorder %s3888_s19, %s3884_s18  ;;  %p72_p2 = scmp.eq.s32.totalorder %s3908_s24, 0 }
   0xc   : > { %s5818_s27 = smov (%p27_p0, %s26_s27), 0  ;;  %s5820_s28 = smov (!%p27_p0, %s29_s28), %s3904_s23 }
   0xd   : > { %s60_s30 = ssub.s32 %s3900_s22, %s5818_s27  ;;  %p4004_p3 = por %p72_p2, %p71_p1 }
   0xe   : > { %p31_p4 = scmp.ge.s32.totalorder %s5820_s28, 2  ;;  %s132_s6 = sadd.s32 1, %s3880_s17 }
   0xf   : > { %p142_p5 = scmp.ne.s32.totalorder %s3880_s17, %s3876_s16  ;;  %p143_p6 = scmp.eq.s32.totalorder %s3201_s25, 3 }
  0x10   : > { %s5822_s28 = smov (%p31_p4, %s5820_s28), 0  ;;  %p148_p8 = scmp.ne.s32.totalorder %s3876_s16, %s3872_s15 }
  0x11   : > { %p4013_p7 = por %p143_p6, %p142_p5  ;;  %s59_s8 = ssub.s32 %s3904_s23, %s5822_s28 }
  0x12   : > { %p149_p9 = scmp.eq.s32.totalorder %s3202_s26, 3  ;;  %s61_s9 = sor.u32 %s60_s30, %s59_s8 }
  0x13   : > { %p130_p10 = scmp.eq.s32.totalorder %s59_s8, 0  ;;  %p62_p11 = scmp.eq.s32.totalorder %s61_s9, 0 }
  0x14   : > { %p4021_p12 = por %p149_p9, %p148_p8  ;;  %p3204_p13 = scmp.ge.s32.totalorder %s3908_s24, 4 }
  0x15   : > { %s4026_s11 = scalar_select %p130_p10, %s3880_s17, %s132_s6  }
  0x16   : > { %s4029_s12 = scalar_select %p62_p11, %s3888_s19, %s64_s29  }
  0x17   : > { %171 = sbr.rel (%p3204_p13) target bundleno = 72 (0x48), region = 24 }
  0x1e   : > { %181 = sbr.rel (!%p4004_p3) target bundleno = 72 (0x48), region = 32  ;;  %s183_s13 = sand.u32 (%p4004_p3), 1, %s3888_s19  }
  0x1f   : > { %s3207_s14 = sshll.u32 (%p4004_p3), %s3900_s22, 3  ;;  %s3205_s25 = sshll.u32 (%p4004_p3), %s183_s13, 9 }
  0x20   : > { %s3257_s26 = sshll.u32 (%p4004_p3), %s3904_s23, 7  ;;  %s5741_s1 = sld [smem:[#allocation42_spill]] (%p4004_p3) }
  0x21   : > { %s189_s30 = sadd.s32 (%p4004_p3), %s3257_s26, %s3207_s14  ;;  %s4045_s5 = scalar_lea.vmem (%p4004_p3), [#allocation5], %s3205_s25 }
  0x22   : > { %s3209_s8 = sshll.u32 (%p4004_p3), %s189_s30, 3 }
  0x26   : > { %s4040_s29 = scalar_lea.vmem %s5741_s1, %s3209_s8 }
  0x27   : > { %v345_v0 = vld [vmem:[%s4040_s29] sm:$0xff]  ;;  %v347_v1 = vld [vmem:[%s4040_s29 + $0x8] sm:$0xff]  ;;  %v349_v2 = vld [vmem:[%s4040_s29 + $0x10] sm:$0xff] }
  0x28   : > { %346 = vst [vmem:[%s4045_s5] sm:$0xff] %v345_v0  ;;  %348 = vst [vmem:[%s4045_s5 + $0x8] sm:$0xff] %v347_v1  ;;  %v351_v3 = vld [vmem:[%s4040_s29 + $0x18] sm:$0xff]  ;;  %v353_v4 = vld [vmem:[%s4040_s29 + $0x20] sm:$0xff] }
  0x29   : > { %350 = vst [vmem:[%s4045_s5 + $0x10] sm:$0xff] %v349_v2  ;;  %v355_v5 = vld [vmem:[%s4040_s29 + $0x28] sm:$0xff]  ;;  %352 = vst [vmem:[%s4045_s5 + $0x18] sm:$0xff] %v351_v3  ;;  %v357_v6 = vld [vmem:[%s4040_s29 + $0x30] sm:$0xff] }
  0x2a   : > { %354 = vst [vmem:[%s4045_s5 + $0x20] sm:$0xff] %v353_v4  ;;  %356 = vst [vmem:[%s4045_s5 + $0x28] sm:$0xff] %v355_v5  ;;  %v359_v7 = vld [vmem:[%s4040_s29 + $0x38] sm:$0xff]  ;;  %v361_v8 = vld [vmem:[%s4040_s29 + $0x80] sm:$0xff] }
  0x2b   : > { %358 = vst [vmem:[%s4045_s5 + $0x30] sm:$0xff] %v357_v6  ;;  %360 = vst [vmem:[%s4045_s5 + $0x38] sm:$0xff] %v359_v7  ;;  %v363_v9 = vld [vmem:[%s4040_s29 + $0x88] sm:$0xff]  ;;  %v365_v10 = vld [vmem:[%s4040_s29 + $0x90] sm:$0xff] }
  0x2c   : > { %362 = vst [vmem:[%s4045_s5 + $0x40] sm:$0xff] %v361_v8  ;;  %v367_v11 = vld [vmem:[%s4040_s29 + $0x98] sm:$0xff]  ;;  %364 = vst [vmem:[%s4045_s5 + $0x48] sm:$0xff] %v363_v9  ;;  %v369_v12 = vld [vmem:[%s4040_s29 + $0xa0] sm:$0xff] }
  0x2d   : > { %366 = vst [vmem:[%s4045_s5 + $0x50] sm:$0xff] %v365_v10  ;;  %368 = vst [vmem:[%s4045_s5 + $0x58] sm:$0xff] %v367_v11  ;;  %v371_v13 = vld [vmem:[%s4040_s29 + $0xa8] sm:$0xff]  ;;  %v373_v14 = vld [vmem:[%s4040_s29 + $0xb0] sm:$0xff] }
  0x2e   : > { %370 = vst [vmem:[%s4045_s5 + $0x60] sm:$0xff] %v369_v12  ;;  %372 = vst [vmem:[%s4045_s5 + $0x68] sm:$0xff] %v371_v13  ;;  %v375_v15 = vld [vmem:[%s4040_s29 + $0xb8] sm:$0xff]  ;;  %v377_v16 = vld [vmem:[%s4040_s29 + $0x100] sm:$0xff] }
  0x2f   : > { %374 = vst [vmem:[%s4045_s5 + $0x70] sm:$0xff] %v373_v14  ;;  %v379_v17 = vld [vmem:[%s4040_s29 + $0x108] sm:$0xff]  ;;  %376 = vst [vmem:[%s4045_s5 + $0x78] sm:$0xff] %v375_v15  ;;  %v381_v18 = vld [vmem:[%s4040_s29 + $0x110] sm:$0xff] }
  0x30   : > { %378 = vst [vmem:[%s4045_s5 + $0x80] sm:$0xff] %v377_v16  ;;  %380 = vst [vmem:[%s4045_s5 + $0x88] sm:$0xff] %v379_v17  ;;  %v383_v19 = vld [vmem:[%s4040_s29 + $0x118] sm:$0xff]  ;;  %v385_v20 = vld [vmem:[%s4040_s29 + $0x120] sm:$0xff] }
  0x31   : > { %382 = vst [vmem:[%s4045_s5 + $0x90] sm:$0xff] %v381_v18  ;;  %384 = vst [vmem:[%s4045_s5 + $0x98] sm:$0xff] %v383_v19  ;;  %v387_v21 = vld [vmem:[%s4040_s29 + $0x128] sm:$0xff]  ;;  %v389_v22 = vld [vmem:[%s4040_s29 + $0x130] sm:$0xff] }
  0x32   : > { %386 = vst [vmem:[%s4045_s5 + $0xa0] sm:$0xff] %v385_v20  ;;  %v391_v23 = vld [vmem:[%s4040_s29 + $0x138] sm:$0xff]  ;;  %388 = vst [vmem:[%s4045_s5 + $0xa8] sm:$0xff] %v387_v21  ;;  %v393_v24 = vld [vmem:[%s4040_s29 + $0x180] sm:$0xff] }
  0x33   : > { %390 = vst [vmem:[%s4045_s5 + $0xb0] sm:$0xff] %v389_v22  ;;  %392 = vst [vmem:[%s4045_s5 + $0xb8] sm:$0xff] %v391_v23  ;;  %v395_v25 = vld [vmem:[%s4040_s29 + $0x188] sm:$0xff]  ;;  %v397_v26 = vld [vmem:[%s4040_s29 + $0x190] sm:$0xff] }
  0x34   : > { %394 = vst [vmem:[%s4045_s5 + $0xc0] sm:$0xff] %v393_v24  ;;  %396 = vst [vmem:[%s4045_s5 + $0xc8] sm:$0xff] %v395_v25  ;;  %v399_v27 = vld [vmem:[%s4040_s29 + $0x198] sm:$0xff]  ;;  %v401_v28 = vld [vmem:[%s4040_s29 + $0x1a0] sm:$0xff] }
  0x35   : > { %398 = vst [vmem:[%s4045_s5 + $0xd0] sm:$0xff] %v397_v26  ;;  %v403_v29 = vld [vmem:[%s4040_s29 + $0x1a8] sm:$0xff]  ;;  %400 = vst [vmem:[%s4045_s5 + $0xd8] sm:$0xff] %v399_v27  ;;  %v405_v30 = vld [vmem:[%s4040_s29 + $0x1b0] sm:$0xff] }
  0x36   : > { %402 = vst [vmem:[%s4045_s5 + $0xe0] sm:$0xff] %v401_v28  ;;  %404 = vst [vmem:[%s4045_s5 + $0xe8] sm:$0xff] %v403_v29  ;;  %v407_v31 = vld [vmem:[%s4040_s29 + $0x1b8] sm:$0xff]  ;;  %v409_v32 = vld [vmem:[%s4040_s29 + $0x200] sm:$0xff] }
  0x37   : > { %406 = vst [vmem:[%s4045_s5 + $0xf0] sm:$0xff] %v405_v30  ;;  %408 = vst [vmem:[%s4045_s5 + $0xf8] sm:$0xff] %v407_v31  ;;  %v411_v33 = vld [vmem:[%s4040_s29 + $0x208] sm:$0xff]  ;;  %v413_v34 = vld [vmem:[%s4040_s29 + $0x210] sm:$0xff] }
  0x38   : > { %410 = vst [vmem:[%s4045_s5 + $0x100] sm:$0xff] %v409_v32  ;;  %v415_v35 = vld [vmem:[%s4040_s29 + $0x218] sm:$0xff]  ;;  %412 = vst [vmem:[%s4045_s5 + $0x108] sm:$0xff] %v411_v33  ;;  %v417_v36 = vld [vmem:[%s4040_s29 + $0x220] sm:$0xff] }
  0x39   : > { %414 = vst [vmem:[%s4045_s5 + $0x110] sm:$0xff] %v413_v34  ;;  %416 = vst [vmem:[%s4045_s5 + $0x118] sm:$0xff] %v415_v35  ;;  %v419_v37 = vld [vmem:[%s4040_s29 + $0x228] sm:$0xff]  ;;  %v421_v38 = vld [vmem:[%s4040_s29 + $0x230] sm:$0xff] }
  0x3a   : > { %418 = vst [vmem:[%s4045_s5 + $0x120] sm:$0xff] %v417_v36  ;;  %420 = vst [vmem:[%s4045_s5 + $0x128] sm:$0xff] %v419_v37  ;;  %v423_v39 = vld [vmem:[%s4040_s29 + $0x238] sm:$0xff]  ;;  %v425_v40 = vld [vmem:[%s4040_s29 + $0x280] sm:$0xff] }
  0x3b   : > { %422 = vst [vmem:[%s4045_s5 + $0x130] sm:$0xff] %v421_v38  ;;  %v427_v41 = vld [vmem:[%s4040_s29 + $0x288] sm:$0xff]  ;;  %424 = vst [vmem:[%s4045_s5 + $0x138] sm:$0xff] %v423_v39  ;;  %v429_v42 = vld [vmem:[%s4040_s29 + $0x290] sm:$0xff] }
  0x3c   : > { %426 = vst [vmem:[%s4045_s5 + $0x140] sm:$0xff] %v425_v40  ;;  %428 = vst [vmem:[%s4045_s5 + $0x148] sm:$0xff] %v427_v41  ;;  %v431_v43 = vld [vmem:[%s4040_s29 + $0x298] sm:$0xff]  ;;  %v433_v44 = vld [vmem:[%s4040_s29 + $0x2a0] sm:$0xff] }
  0x3d   : > { %430 = vst [vmem:[%s4045_s5 + $0x150] sm:$0xff] %v429_v42  ;;  %432 = vst [vmem:[%s4045_s5 + $0x158] sm:$0xff] %v431_v43  ;;  %v435_v45 = vld [vmem:[%s4040_s29 + $0x2a8] sm:$0xff]  ;;  %v437_v46 = vld [vmem:[%s4040_s29 + $0x2b0] sm:$0xff] }
  0x3e   : > { %434 = vst [vmem:[%s4045_s5 + $0x160] sm:$0xff] %v433_v44  ;;  %v439_v47 = vld [vmem:[%s4040_s29 + $0x2b8] sm:$0xff]  ;;  %436 = vst [vmem:[%s4045_s5 + $0x168] sm:$0xff] %v435_v45  ;;  %v441_v48 = vld [vmem:[%s4040_s29 + $0x300] sm:$0xff] }
  0x3f   : > { %438 = vst [vmem:[%s4045_s5 + $0x170] sm:$0xff] %v437_v46  ;;  %440 = vst [vmem:[%s4045_s5 + $0x178] sm:$0xff] %v439_v47  ;;  %v443_v49 = vld [vmem:[%s4040_s29 + $0x308] sm:$0xff]  ;;  %v445_v50 = vld [vmem:[%s4040_s29 + $0x310] sm:$0xff] }
  0x40   : > { %442 = vst [vmem:[%s4045_s5 + $0x180] sm:$0xff] %v441_v48  ;;  %444 = vst [vmem:[%s4045_s5 + $0x188] sm:$0xff] %v443_v49  ;;  %v447_v51 = vld [vmem:[%s4040_s29 + $0x318] sm:$0xff]  ;;  %v449_v52 = vld [vmem:[%s4040_s29 + $0x320] sm:$0xff] }
  0x41   : > { %446 = vst [vmem:[%s4045_s5 + $0x190] sm:$0xff] %v445_v50  ;;  %v451_v53 = vld [vmem:[%s4040_s29 + $0x328] sm:$0xff]  ;;  %448 = vst [vmem:[%s4045_s5 + $0x198] sm:$0xff] %v447_v51  ;;  %v453_v54 = vld [vmem:[%s4040_s29 + $0x330] sm:$0xff] }
  0x42   : > { %450 = vst [vmem:[%s4045_s5 + $0x1a0] sm:$0xff] %v449_v52  ;;  %452 = vst [vmem:[%s4045_s5 + $0x1a8] sm:$0xff] %v451_v53  ;;  %v455_v55 = vld [vmem:[%s4040_s29 + $0x338] sm:$0xff]  ;;  %v457_v56 = vld [vmem:[%s4040_s29 + $0x380] sm:$0xff] }
  0x43   : > { %454 = vst [vmem:[%s4045_s5 + $0x1b0] sm:$0xff] %v453_v54  ;;  %456 = vst [vmem:[%s4045_s5 + $0x1b8] sm:$0xff] %v455_v55  ;;  %v459_v57 = vld [vmem:[%s4040_s29 + $0x388] sm:$0xff]  ;;  %v461_v58 = vld [vmem:[%s4040_s29 + $0x390] sm:$0xff] }
  0x44   : > { %458 = vst [vmem:[%s4045_s5 + $0x1c0] sm:$0xff] %v457_v56  ;;  %v463_v59 = vld [vmem:[%s4040_s29 + $0x398] sm:$0xff]  ;;  %460 = vst [vmem:[%s4045_s5 + $0x1c8] sm:$0xff] %v459_v57  ;;  %v465_v60 = vld [vmem:[%s4040_s29 + $0x3a0] sm:$0xff] }
  0x45   : > { %462 = vst [vmem:[%s4045_s5 + $0x1d0] sm:$0xff] %v461_v58  ;;  %464 = vst [vmem:[%s4045_s5 + $0x1d8] sm:$0xff] %v463_v59  ;;  %v467_v61 = vld [vmem:[%s4040_s29 + $0x3a8] sm:$0xff]  ;;  %v469_v62 = vld [vmem:[%s4040_s29 + $0x3b0] sm:$0xff] }
  0x46   : > { %466 = vst [vmem:[%s4045_s5 + $0x1e0] sm:$0xff] %v465_v60  ;;  %468 = vst [vmem:[%s4045_s5 + $0x1e8] sm:$0xff] %v467_v61  ;;  %v471_v63 = vld [vmem:[%s4040_s29 + $0x3b8] sm:$0xff] }
  0x47   : > { %470 = vst [vmem:[%s4045_s5 + $0x1f0] sm:$0xff] %v469_v62  ;;  %472 = vst [vmem:[%s4045_s5 + $0x1f8] sm:$0xff] %v471_v63 }
  0x48 PF: > { %p3210_p0 = scmp.ge.s32.totalorder %s3908_s24, 1  ;;  %p477_p1 = scmp.lt.s32.totalorder %s3908_s24, 5 }
  0x4a   : > { %p478_p2 = pnand %p3210_p0, %p477_p1 }
  0x4c   : > { %481 = sbr.rel (%p478_p2) target bundleno = 1490 (0x5d2), region = 70 }
  0x53   : > { %s484_s13 = sand.u32 1, %s3884_s18   ;;  %s510_s14 = sand.u32 1, %s3876_s16  }
  0x54   : > { %s3211_s25 = sshll.u32 %s484_s13, 9  ;;  %s4178_s26 = sshll.u32 %s510_s14, 3 }
  0x55   : > { %p513_p3 = scmp.lt.s32.totalorder %s3896_s21, 1  ;;  %s4187_s5 = scalar_lea.vmem [#allocation5], %s3211_s25 }
  0x56   : > { %s512_s1 = scalar_lea.vmem [#allocation6], %s4178_s26  ;;  %p3214_p4 = scmp.ne.s32.totalorder %s3892_s20, 0 }
  0x57   : > { %s514_s30 = scalar_select %p513_p3, %s3896_s21, 1 }
  0x58   : > { %523 = sbr.rel (%p3214_p4) target bundleno = 95 (0x5f), region = 78  ;;  %vm524_vm0 = vcmask (!%p3214_p4), 7168   ;;  %vm527_vm1 = vcmask (!%p3214_p4), 523264   ;;  %v3910_v0 = vmov (!%p3214_p4), -inf   ;;  %v3911_v1 = vmov (!%p3214_p4), 0.0  }
  0x59   : > { %s3213_s8 = sshll.u32 %s514_s30, 3  ;;  %525 = vst.msk [vmem:[#allocation2] sm:$0xff] (!%p3214_p4), %vm524_vm0, %v3910_v0  ;;  %526 = vst.msk [vmem:[#allocation3] sm:$0xff] (!%p3214_p4), %vm524_vm0, %v3911_v1 }
  0x5a   : > { %s4185_s29 = scalar_lea.vmem %s5697_s0, %s3213_s8  ;;  %528 = vst.msk [vmem:[#allocation4] sm:$0xff] (!%p3214_p4), %vm527_vm1, %v3911_v1 }
  0x5f PF: > { %v3468_v2 = vld [vmem:[%s5699_s2] sm:$0xff]   ;;  %v3469_v3 = vld [vmem:[%s5699_s2 + $0x8] sm:$0xff]   ;;  %v3470_v4 = vld [vmem:[%s5699_s2 + $0x10] sm:$0xff]   ;;  %vm657_vm2 = vcmask 523264   ;;  %vm1601_vm3 = vcmask 130112   ;;  %vm1608_vm4 = vcmask 195712  }
  0x60   : > { %3294 = vmatprep.subr.bf16.mxu0 %v3468_v2  ;;  %3366 = vmatprep.subr.bf16.mxu1 %v3468_v2  ;;  %v529_v5 = vld [vmem:[%s4187_s5] sm:$0xff]  ;;  %v530_v6 = vld [vmem:[%s4187_s5 + $0x8] sm:$0xff]  ;;  %v531_v12 = vld [vmem:[%s4187_s5 + $0x10] sm:$0xff]  ;;  %vm1615_vm5 = vcmask 261312   ;;  %vm1622_vm6 = vcmask 326912   ;;  %vm1629_vm7 = vcmask 392512  }
  0x61   : > { %3295 = vmatpush3.bf16.msra.mxu0 %v3468_v2  ;;  %3370 = vmatpush3.bf16.msra.mxu1 %v3468_v2  ;;  %v561_v7 = vld [vmem:[%s4187_s5 + $0x100] sm:$0xff]  ;;  %v593_v8 = vpack.c.bf16 %v530_v6, %v529_v5  ;;  %v562_v9 = vld [vmem:[%s4187_s5 + $0x108] sm:$0xff]  ;;  %v532_v13 = vld [vmem:[%s4187_s5 + $0x18] sm:$0xff]  ;;  %vm1636_vm8 = vcmask 458112   ;;  %vm1643_vm9 = vcmask 523712   ;;  %vm1918_vm10 = vcmask 1041409  }
  0x62   : > { %3296 = vmatprep.subr.bf16.mxu0 %v3469_v3  ;;  %3367 = vmatprep.subr.bf16.mxu1 %v3469_v3  ;;  %v609_v10 = vpack.c.bf16 %v562_v9, %v561_v7  ;;  %v3471_v11 = vld [vmem:[%s5699_s2 + $0x18] sm:$0xff]   ;;  %v563_v14 = vld [vmem:[%s4187_s5 + $0x110] sm:$0xff]  ;;  %v564_v15 = vld [vmem:[%s4187_s5 + $0x118] sm:$0xff]  ;;  %v594_v20 = vpack.c.bf16 %v532_v13, %v531_v12  ;;  %vm1920_vm11 = vcmask 1042434   ;;  %vm1922_vm12 = vcmask 1043459   ;;  %p3252_p5 = scmp.ne.s32.totalorder %s3892_s20, 1 }
  0x63   : > { %3302 = vmatprep.mubr.msk.bf16.mxu0 %vm657_vm2, %v593_v8  ;;  %v565_v16 = vld [vmem:[%s4187_s5 + $0x120] sm:$0xff]  ;;  %v566_v17 = vld [vmem:[%s4187_s5 + $0x128] sm:$0xff]  ;;  %v610_v21 = vpack.c.bf16 %v564_v15, %v563_v14  ;;  %v567_v24 = vld [vmem:[%s4187_s5 + $0x130] sm:$0xff]  ;;  %vm1924_vm13 = vcmask 1044484   ;;  %vm1926_vm14 = vcmask 1045509   ;;  %vm1928_vm15 = vcmask 1046534  }
  0x64   : > { %3334 = vmatprep.mubr.msk.bf16.mxu1 %vm657_vm2, %v609_v10  ;;  %v533_v18 = vld [vmem:[%s4187_s5 + $0x20] sm:$0xff]  ;;  %v534_v19 = vld [vmem:[%s4187_s5 + $0x28] sm:$0xff]  ;;  %v611_v22 = vpack.c.bf16 %v566_v17, %v565_v16  ;;  %v568_v25 = vld [vmem:[%s4187_s5 + $0x138] sm:$0xff]  ;;  %vm1930_vm0 = vcmask 1047559   ;;  %vm2758_vm1 = vcmask 7168  }
  0x65   : > { %3297 = vmatpush3.bf16.msra.mxu0 %v3469_v3  ;;  %3371 = vmatpush3.bf16.msra.mxu1 %v3469_v3  ;;  %v595_v23 = vpack.c.bf16 %v534_v19, %v533_v18  ;;  %v535_v26 = vld [vmem:[%s4187_s5 + $0x30] sm:$0xff]  ;;  %v536_v27 = vld [vmem:[%s4187_s5 + $0x38] sm:$0xff]  ;;  %v569_v28 = vld [vmem:[%s4187_s5 + $0x140] sm:$0xff]  ;;  %v612_v32 = vpack.c.bf16 %v568_v25, %v567_v24 }
  0x66   : > { %3298 = vmatprep.subr.bf16.mxu0 %v3470_v4  ;;  %3368 = vmatprep.subr.bf16.mxu1 %v3470_v4  ;;  %v570_v29 = vld [vmem:[%s4187_s5 + $0x148] sm:$0xff]  ;;  %v537_v30 = vld [vmem:[%s4187_s5 + $0x40] sm:$0xff]  ;;  %v596_v33 = vpack.c.bf16 %v536_v27, %v535_v26  ;;  %v571_v36 = vld [vmem:[%s4187_s5 + $0x150] sm:$0xff] }
  0x67   : > { %v538_v31 = vld [vmem:[%s4187_s5 + $0x48] sm:$0xff]  ;;  %v613_v34 = vpack.c.bf16 %v570_v29, %v569_v28  ;;  %v572_v37 = vld [vmem:[%s4187_s5 + $0x158] sm:$0xff]  ;;  %v539_v38 = vld [vmem:[%s4187_s5 + $0x50] sm:$0xff] }
  0x68   : > { %v597_v35 = vpack.c.bf16 %v538_v31, %v537_v30  ;;  %v540_v39 = vld [vmem:[%s4187_s5 + $0x58] sm:$0xff]  ;;  %v573_v40 = vld [vmem:[%s4187_s5 + $0x160] sm:$0xff]  ;;  %v574_v41 = vld [vmem:[%s4187_s5 + $0x168] sm:$0xff]  ;;  %v614_v44 = vpack.c.bf16 %v572_v37, %v571_v36 }
  0x69   : > { %3299 = vmatpush3.bf16.msra.mxu0 %v3470_v4  ;;  %3372 = vmatpush3.bf16.msra.mxu1 %v3470_v4  ;;  %v541_v42 = vld [vmem:[%s4187_s5 + $0x60] sm:$0xff]  ;;  %v542_v43 = vld [vmem:[%s4187_s5 + $0x68] sm:$0xff]  ;;  %v598_v45 = vpack.c.bf16 %v540_v39, %v539_v38  ;;  %v615_v46 = vpack.c.bf16 %v574_v41, %v573_v40  ;;  %v575_v48 = vld [vmem:[%s4187_s5 + $0x170] sm:$0xff]  ;;  %v3912_v38 = vmov 1966171168   ;;  %v1049_v40 = vlaneseq }
  0x6a   : > { %3300 = vmatprep.subr.bf16.mxu0 %v3471_v11  ;;  %3369 = vmatprep.subr.bf16.mxu1 %v3471_v11  ;;  %v599_v47 = vpack.c.bf16 %v542_v43, %v541_v42  ;;  %v576_v49 = vld [vmem:[%s4187_s5 + $0x178] sm:$0xff]  ;;  %v543_v50 = vld [vmem:[%s4187_s5 + $0x70] sm:$0xff]  ;;  %v577_v52 = vld [vmem:[%s4187_s5 + $0x180] sm:$0xff]  ;;  %v1047_v39 = vunpack.c.l.s4 %v3912_v38 }
  0x6b   : > { %v544_v51 = vld [vmem:[%s4187_s5 + $0x78] sm:$0xff]  ;;  %v578_v53 = vld [vmem:[%s4187_s5 + $0x188] sm:$0xff]  ;;  %v545_v54 = vld [vmem:[%s4187_s5 + $0x80] sm:$0xff]  ;;  %v616_v56 = vpack.c.bf16 %v576_v49, %v575_v48  ;;  %v4300_v42 = vshrl.u32 %v1049_v40, 7 }
  0x6c   : > { %v546_v55 = vld [vmem:[%s4187_s5 + $0x88] sm:$0xff]  ;;  %v600_v57 = vpack.c.bf16 %v544_v51, %v543_v50  ;;  %v617_v58 = vpack.c.bf16 %v578_v53, %v577_v52  ;;  %v579_v60 = vld [vmem:[%s4187_s5 + $0x190] sm:$0xff]  ;;  %v580_v61 = vld [vmem:[%s4187_s5 + $0x198] sm:$0xff]  ;;  %v1048_v41 = vunpack.c.0.s8 %v1047_v39 }
  0x6d   : > { %3301 = vmatpush3.bf16.msra.mxu0 %v3471_v11  ;;  %3373 = vmatpush3.bf16.msra.mxu1 %v3471_v11  ;;  %v601_v59 = vpack.c.bf16 %v546_v55, %v545_v54  ;;  %v547_v62 = vld [vmem:[%s4187_s5 + $0x90] sm:$0xff]  ;;  %v548_v63 = vld [vmem:[%s4187_s5 + $0x98] sm:$0xff]  ;;  %v549_v0 = vld [vmem:[%s4187_s5 + $0xa0] sm:$0xff]  ;;  %v618_v4 = vpack.c.bf16 %v580_v61, %v579_v60  ;;  %v4307_v49 = vsub.s32 0, %v4300_v42 }
  0x6e   : > { %v550_v1 = vld [vmem:[%s4187_s5 + $0xa8] sm:$0xff]  ;;  %v581_v2 = vld [vmem:[%s4187_s5 + $0x1a0] sm:$0xff]  ;;  %v602_v5 = vpack.c.bf16 %v548_v63, %v547_v62  ;;  %v551_v8 = vld [vmem:[%s4187_s5 + $0xb0] sm:$0xff] }
  0x6f   : > { %v582_v3 = vld [vmem:[%s4187_s5 + $0x1a8] sm:$0xff]  ;;  %v603_v6 = vpack.c.bf16 %v550_v1, %v549_v0  ;;  %v552_v9 = vld [vmem:[%s4187_s5 + $0xb8] sm:$0xff]  ;;  %v583_v10 = vld [vmem:[%s4187_s5 + $0x1b0] sm:$0xff]  ;;  %5742 = vst [vmem:[#allocation9_spill] sm:$0xff] %v4307_v49 }
  0x70   : > { %3303 = vmatmul.mubr.msk.bf16.vlgmr.msra.gmra.mrb[0].mxu0 %vm657_vm2, %v594_v20  ;;  %3335 = vmatmul.mubr.msk.bf16.vlgmr.msra.gmra.mrb[0].mxu1 %vm657_vm2, %v610_v21  ;;  %v619_v7 = vpack.c.bf16 %v582_v3, %v581_v2  ;;  %v584_v11 = vld [vmem:[%s4187_s5 + $0x1b8] sm:$0xff]  ;;  %v553_v12 = vld [vmem:[%s4187_s5 + $0xc0] sm:$0xff]  ;;  %v554_v13 = vld [vmem:[%s4187_s5 + $0xc8] sm:$0xff]  ;;  %v604_v16 = vpack.c.bf16 %v552_v9, %v551_v8 }
  0x71   : > { %3338 = vmatprep.mubr.msk.bf16.mxu1 %vm657_vm2, %v611_v22  ;;  %3306 = vmatprep.mubr.msk.bf16.mxu0 %vm657_vm2, %v595_v23  ;;  %v585_v14 = vld [vmem:[%s4187_s5 + $0x1c0] sm:$0xff]  ;;  %v586_v15 = vld [vmem:[%s4187_s5 + $0x1c8] sm:$0xff]  ;;  %v620_v17 = vpack.c.bf16 %v584_v11, %v583_v10  ;;  %v605_v18 = vpack.c.bf16 %v554_v13, %v553_v12  ;;  %v555_v20 = vld [vmem:[%s4187_s5 + $0xd0] sm:$0xff] }
  0x72   : > { %v621_v19 = vpack.c.bf16 %v586_v15, %v585_v14  ;;  %v556_v21 = vld [vmem:[%s4187_s5 + $0xd8] sm:$0xff]  ;;  %v587_v22 = vld [vmem:[%s4187_s5 + $0x1d0] sm:$0xff]  ;;  %v557_v24 = vld [vmem:[%s4187_s5 + $0xe0] sm:$0xff] }
  0x73   : > { %v588_v23 = vld [vmem:[%s4187_s5 + $0x1d8] sm:$0xff]  ;;  %v558_v25 = vld [vmem:[%s4187_s5 + $0xe8] sm:$0xff]  ;;  %v589_v26 = vld [vmem:[%s4187_s5 + $0x1e0] sm:$0xff]  ;;  %v606_v28 = vpack.c.bf16 %v556_v21, %v555_v20 }
  0x74   : > { %v590_v27 = vld [vmem:[%s4187_s5 + $0x1e8] sm:$0xff]  ;;  %v622_v29 = vpack.c.bf16 %v588_v23, %v587_v22  ;;  %v607_v30 = vpack.c.bf16 %v558_v25, %v557_v24 }
  0x75   : > { %v623_v31 = vpack.c.bf16 %v590_v27, %v589_v26  ;;  %v1043_v43 = vld [vmem:[%s4185_s29] sm:$0xff] }
  0x76   : > { %v4320_v20 = vld [vmem:[%s5700_s3] ss:$0 sm:$0xff] }
  0x78   : > { %3339 = vmatmul.mubr.msk.bf16.gmra.mrb[4].mxu1 %vm657_vm2, %v612_v32  ;;  %3307 = vmatmul.mubr.msk.bf16.gmra.mrb[4].mxu0 %vm657_vm2, %v596_v33  ;;  %v559_v32 = vld [vmem:[%s4187_s5 + $0xf0] sm:$0xff]  ;;  %v560_v33 = vld [vmem:[%s4187_s5 + $0xf8] sm:$0xff] }
  0x79   : > { %3342 = vmatprep.mubr.msk.bf16.mxu1 %vm657_vm2, %v613_v34  ;;  %3310 = vmatprep.mubr.msk.bf16.mxu0 %vm657_vm2, %v597_v35  ;;  %v591_v34 = vld [vmem:[%s4187_s5 + $0x1f0] sm:$0xff]  ;;  %v592_v35 = vld [vmem:[%s4187_s5 + $0x1f8] sm:$0xff]  ;;  %v608_v36 = vpack.c.bf16 %v560_v33, %v559_v32 }
  0x7a   : > { %v624_v37 = vpack.c.bf16 %v592_v35, %v591_v34 }
  0x80   : > { %3343 = vmatmul.mubr.msk.bf16.gmra.mrb[8].mxu1 %vm657_vm2, %v614_v44  ;;  %3311 = vmatmul.mubr.msk.bf16.gmra.mrb[8].mxu0 %vm657_vm2, %v598_v45  ;;  %v1051_v44 = vsub.s32 %v1048_v41, %v4300_v42  ;;  %v1045_v45 = vcombine.high %v1043_v43, %v1043_v43 }
  0x81   : > { %3346 = vmatprep.mubr.msk.bf16.mxu1 %vm657_vm2, %v615_v46  ;;  %3314 = vmatprep.mubr.msk.bf16.mxu0 %vm657_vm2, %v599_v47 }
  0x82   : > { %v1052_v46 = vrot.slane %v1043_v43, %v1051_v44  ;;  %v1059_v47 = vrot.slane %v1045_v45, %v1051_v44 }
  0x84   : > { %v4304_v48 = vrot.slane %v1052_v46, %v1051_v44  ;;  %v4309_v50 = vrot.slane %v1059_v47, %v1051_v44  ;;  %v1060_v8 = vcombine.high %v1052_v46, %v1052_v46 }
  0x86   : > { %v1097_v51 = vrot.slane %v4304_v48, %v4307_v49  ;;  %v1113_v52 = vrot.slane %v4309_v50, %v4307_v49  ;;  %v4322_v23 = vrot.slane %v1060_v8, %v1051_v44 }
  0x88   : > { %3347 = vmatmul.mubr.msk.bf16.gmra.mrb[12].mxu1 %vm657_vm2, %v616_v56  ;;  %3315 = vmatmul.mubr.msk.bf16.gmra.mrb[12].mxu0 %vm657_vm2, %v600_v57 }
  0x89   : > { %3350 = vmatprep.mubr.msk.bf16.mxu1 %vm657_vm2, %v617_v58  ;;  %3318 = vmatprep.mubr.msk.bf16.mxu0 %vm657_vm2, %v601_v59 }
  0x90   : > { %3351 = vmatmul.mubr.msk.bf16.gmra.mrb[16].mxu1 %vm657_vm2, %v618_v4  ;;  %3319 = vmatmul.mubr.msk.bf16.gmra.mrb[16].mxu0 %vm657_vm2, %v602_v5  ;;  %v1061_v4 = vcombine.high %v1059_v47, %v1059_v47 }
  0x91   : > { %3322 = vmatprep.mubr.msk.bf16.mxu0 %vm657_vm2, %v603_v6  ;;  %3354 = vmatprep.mubr.msk.bf16.mxu1 %vm657_vm2, %v619_v7 }
  0x92   : > { %v4315_v12 = vrot.slane %v1061_v4, %v1051_v44 }
  0x94   : > { %v4326_v26 = vrot.slane %v4315_v12, %v4307_v49 }
  0x98   : > { %3323 = vmatmul.mubr.msk.bf16.gmra.mrb[20].mxu0 %vm657_vm2, %v604_v16  ;;  %3355 = vmatmul.mubr.msk.bf16.gmra.mrb[20].mxu1 %vm657_vm2, %v620_v17 }
  0x99   : > { %3326 = vmatprep.mubr.msk.bf16.mxu0 %vm657_vm2, %v605_v18  ;;  %3358 = vmatprep.mubr.msk.bf16.mxu1 %vm657_vm2, %v621_v19 }
  0xa0   : > { %3327 = vmatmul.mubr.msk.bf16.gmra.mrb[24].mxu0 %vm657_vm2, %v606_v28  ;;  %3359 = vmatmul.mubr.msk.bf16.gmra.mrb[24].mxu1 %vm657_vm2, %v622_v29 }
  0xa1   : > { %3330 = vmatprep.mubr.msk.bf16.mxu0 %vm657_vm2, %v607_v30  ;;  %3362 = vmatprep.mubr.msk.bf16.mxu1 %vm657_vm2, %v623_v31 }
  0xa8   : > { %3331 = vmatmul.mubr.msk.bf16.gmra.mrb[28].mxu0 %vm657_vm2, %v608_v36  ;;  %3363 = vmatmul.mubr.msk.bf16.gmra.mrb[28].mxu1 %vm657_vm2, %v624_v37  ;;  %v4334_v37 = vrot.slane %v4322_v23, %v4307_v49 }
 0x143   : > { %v3304_v53 = vpop.f32.mrb[0].mxu0  ;;  %v3336_v54 = vpop.f32.mrb[0].mxu1 }
 0x144   : > { %v1136_v55 = vadd.f32 %v3304_v53, %v1097_v51  ;;  %v1168_v56 = vadd.f32 %v3336_v54, %v1113_v52  ;;  %v788_v57 = vpop.f32.mrb[1].mxu0  ;;  %v916_v58 = vpop.f32.mrb[1].mxu1 }
 0x145   : > { %v1134_v59 = vadd.f32 %v1097_v51, %v788_v57  ;;  %v1166_v60 = vadd.f32 %v1113_v52, %v916_v58  ;;  %v3305_v61 = vpop.f32.mrb[2].mxu0  ;;  %v3337_v62 = vpop.f32.mrb[2].mxu1 }
 0x146   : > { %3473 = vtanh.f32 %v1136_v55  ;;  %v1137_v63 = vadd.f32 %v3305_v61, %v1097_v51  ;;  %v791_v0 = vpop.f32.mrb[3].mxu0  ;;  %v919_v1 = vpop.f32.mrb[3].mxu1  ;;  %v1169_v2 = vadd.f32 %v3337_v62, %v1113_v52 }
 0x147   : > { %3475 = vtanh.f32 %v1168_v56  ;;  %v1135_v3 = vadd.f32 %v1097_v51, %v791_v0  ;;  %v1167_v5 = vadd.f32 %v1113_v52, %v919_v1 }
 0x148   : > { %3477 = vtanh.f32 %v1134_v59 }
 0x149   : > { %3479 = vtanh.f32 %v1166_v60 }
 0x14a   : > { %3481 = vtanh.f32 %v1137_v63 }
 0x14b   : > { %3483 = vtanh.f32 %v1169_v2  ;;  %v3340_v6 = vpop.f32.mrb[4].mxu1  ;;  %v3308_v7 = vpop.f32.mrb[4].mxu0 }
 0x14c   : > { %3485 = vtanh.f32 %v1135_v3  ;;  %v1172_v9 = vadd.f32 %v3340_v6, %v1113_v52  ;;  %v932_v10 = vpop.f32.mrb[5].mxu1  ;;  %v804_v11 = vpop.f32.mrb[5].mxu0  ;;  %v1140_v15 = vadd.f32 %v3308_v7, %v1097_v51  ;;  %v1091_v7 = vcombine.high %v4309_v50, %v4309_v50 }
 0x14d   : > { %3487 = vtanh.f32 %v1167_v5  ;;  %v1170_v13 = vadd.f32 %v1113_v52, %v932_v10  ;;  %v3341_v14 = vpop.f32.mrb[6].mxu1  ;;  %v3309_v16 = vpop.f32.mrb[6].mxu0  ;;  %v1138_v22 = vadd.f32 %v1097_v51, %v804_v11 }
 0x14e   : > { %3489 = vtanh.f32 %v1172_v9  ;;  %v1173_v17 = vadd.f32 %v3341_v14, %v1113_v52  ;;  %v935_v18 = vpop.f32.mrb[7].mxu1  ;;  %v807_v19 = vpop.f32.mrb[7].mxu0  ;;  %v1141_v25 = vadd.f32 %v3309_v16, %v1097_v51 }
 0x14f   : > { %3491 = vtanh.f32 %v1170_v13  ;;  %v1171_v21 = vadd.f32 %v1113_v52, %v935_v18  ;;  %v1139_v28 = vadd.f32 %v1097_v51, %v807_v19  ;;  %v1090_v13 = vcombine.high %v4304_v48, %v4304_v48 }
 0x150   : > { %v3474_v24 = vpop.eup %3473  ;;  %3493 = vtanh.f32 %v1173_v17 }
 0x151   : > { %v3476_v27 = vpop.eup %3475  ;;  %3495 = vtanh.f32 %v1140_v15  ;;  %v1271_v29 = vmul.f32 %v3474_v24, %v4320_v20 }
 0x152   : > { %v3478_v30 = vpop.eup %3477  ;;  %3497 = vtanh.f32 %v1171_v21  ;;  %v1303_v31 = vmul.f32 %v3476_v27, %v4320_v20 }
 0x153   : > { %v3480_v32 = vpop.eup %3479  ;;  %3499 = vtanh.f32 %v1138_v22  ;;  %v1339_v33 = vsel %vm657_vm2, %v1271_v29, 0.0  ;;  %v1269_v34 = vmul.f32 %v3478_v30, %v4320_v20  ;;  %v3344_v35 = vpop.f32.mrb[8].mxu1 }
 0x154   : > { %v3312_v36 = vpop.f32.mrb[8].mxu0  ;;  %v3482_v38 = vpop.eup %3481  ;;  %3501 = vtanh.f32 %v1141_v25  ;;  %v1435_v39 = vsel %vm657_vm2, %v1303_v31, 0.0  ;;  %1340 = vadd.xlane.f32.xlu1 %v1339_v33  ;;  %v1301_v41 = vmul.f32 %v3480_v32, %v4320_v20  ;;  %v1176_v43 = vadd.f32 %v3344_v35, %v4326_v26 }
 0x155   : > { %v948_v44 = vpop.f32.mrb[9].mxu1  ;;  %v820_v45 = vpop.f32.mrb[9].mxu0  ;;  %3503 = vtanh.f32 %v1139_v28  ;;  %1436 = vadd.xlane.f32.xlu0 %v1435_v39  ;;  %v1272_v59 = vmul.f32 %v3482_v38, %v4320_v20  ;;  %v1333_v62 = vsel %vm657_vm2, %v1269_v34, 0.0  ;;  %v1144_v0 = vadd.f32 %v3312_v36, %v4334_v37 }
 0x156   : > { %v3484_v46 = vpop.eup %3483  ;;  %v1174_v47 = vadd.f32 %v4326_v26, %v948_v44  ;;  %v3345_v51 = vpop.f32.mrb[10].mxu1  ;;  %3505 = vtanh.f32 %v1176_v43  ;;  %v1429_v58 = vsel %vm657_vm2, %v1301_v41, 0.0  ;;  %v1142_v2 = vadd.f32 %v4334_v37, %v820_v45 }
 0x157   : > { %v3313_v52 = vpop.f32.mrb[10].mxu0  ;;  %v3486_v53 = vpop.eup %3485  ;;  %v1177_v54 = vadd.f32 %v3345_v51, %v4326_v26  ;;  %v1304_v63 = vmul.f32 %v3484_v46, %v4320_v20  ;;  %v1342_v9 = vsel %vm657_vm2, %v1272_v59, 0.0  ;;  %v4372_v31 = vrot.slane %v1091_v7, %v4307_v49 }
 0x158   : > { %v951_v55 = vpop.f32.mrb[11].mxu1  ;;  %v823_v56 = vpop.f32.mrb[11].mxu0  ;;  %3507 = vtanh.f32 %v1174_v47  ;;  %1430 = vadd.xlane.f32.xlu1 %v1429_v58  ;;  %v1145_v3 = vadd.f32 %v3313_v52, %v4334_v37  ;;  %v1270_v16 = vmul.f32 %v3486_v53, %v4320_v20  ;;  %v4380_v41 = vrot.slane %v1090_v13, %v4307_v49 }
 0x159   : > { %v3488_v57 = vpop.eup %3487  ;;  %v1175_v60 = vadd.f32 %v4326_v26, %v951_v55  ;;  %3509 = vtanh.f32 %v1177_v54  ;;  %1334 = vadd.xlane.f32.xlu0 %v1333_v62  ;;  %v1143_v6 = vadd.f32 %v4334_v37, %v823_v56  ;;  %v1438_v15 = vsel %vm657_vm2, %v1304_v63, 0.0 }
 0x15a   : > { %v4344_v61 = vpop.eup %3489  ;;  %v1302_v33 = vmul.f32 %v3488_v57, %v4320_v20  ;;  %v1336_v38 = vsel %vm657_vm2, %v1270_v16, 0.0 }
 0x15b   : > { %v3492_v1 = vpop.eup %3491  ;;  %3511 = vtanh.f32 %v1175_v60  ;;  %v3348_v10 = vpop.f32.mrb[12].mxu1 }
 0x15c   : > { %v4351_v4 = vpop.eup %3493  ;;  %v1305_v5 = vmul.f32 %v3492_v1, %v4320_v20  ;;  %3513 = vtanh.f32 %v1144_v0  ;;  %v3316_v11 = vpop.f32.mrb[12].mxu0  ;;  %1343 = vadd.xlane.f32.xlu1 %v1342_v9  ;;  %v1180_v17 = vadd.f32 %v3348_v10, %v4326_v26  ;;  %v1432_v51 = vsel %vm657_vm2, %v1302_v33, 0.0 }
 0x15d   : > { %v3496_v8 = vpop.eup %3495  ;;  %3515 = vtanh.f32 %v1142_v2  ;;  %v964_v50 = vpop.f32.mrb[13].mxu1  ;;  %1439 = vadd.xlane.f32.xlu0 %v1438_v15  ;;  %v1148_v27 = vadd.f32 %v3316_v11, %v4334_v37  ;;  %v1307_v2 = vmul.f32 %v4344_v61, %v4320_v20 }
 0x15e   : > { %v4360_v14 = vpop.eup %3497  ;;  %3517 = vtanh.f32 %v1145_v3  ;;  %v836_v18 = vpop.f32.mrb[13].mxu0  ;;  %v1441_v21 = vsel %vm657_vm2, %v1305_v5, 0.0  ;;  %v1178_v48 = vadd.f32 %v4326_v26, %v964_v50  ;;  %v1275_v56 = vmul.f32 %v3496_v8, %v4320_v20 }
 0x15f   : > { %v4365_v19 = vpop.eup %3499  ;;  %3519 = vtanh.f32 %v1143_v6  ;;  %v3349_v22 = vpop.f32.mrb[14].mxu1  ;;  %v1146_v39 = vadd.f32 %v4334_v37, %v836_v18  ;;  %v1306_v9 = vmul.f32 %v4360_v14, %v4320_v20 }
 0x160   : > { %v3317_v24 = vpop.f32.mrb[14].mxu0  ;;  %v3502_v25 = vpop.eup %3501  ;;  %3521 = vtanh.f32 %v1180_v17  ;;  %v1181_v28 = vadd.f32 %v3349_v22, %v4326_v26  ;;  %1442 = vadd.xlane.f32.xlu1 %v1441_v21  ;;  %v1351_v13 = vsel %vm657_vm2, %v1275_v56, 0.0  ;;  %v1447_v21 = vsel %vm657_vm2, %v1307_v2, 0.0 }
 0x161   : > { %v967_v29 = vpop.f32.mrb[15].mxu1  ;;  %v839_v30 = vpop.f32.mrb[15].mxu0  ;;  %v1276_v34 = vmul.f32 %v3502_v25, %v4320_v20  ;;  %3523 = vtanh.f32 %v1178_v48  ;;  %1337 = vadd.xlane.f32.xlu0 %v1336_v38  ;;  %v1149_v45 = vadd.f32 %v3317_v24, %v4334_v37  ;;  %v1444_v48 = vsel %vm657_vm2, %v1306_v9, 0.0 }
 0x162   : > { %v3504_v32 = vpop.eup %3503  ;;  %v1179_v35 = vadd.f32 %v4326_v26, %v967_v29  ;;  %3525 = vtanh.f32 %v1148_v27  ;;  %v1147_v26 = vadd.f32 %v4334_v37, %v839_v30  ;;  %v1092_v25 = vcombine.high %v4322_v23, %v4322_v23 }
 0x163   : > { %v3506_v36 = vpop.eup %3505  ;;  %v1354_v44 = vsel %vm657_vm2, %v1276_v34, 0.0  ;;  %3527 = vtanh.f32 %v1181_v28  ;;  %v1274_v52 = vmul.f32 %v3504_v32, %v4320_v20  ;;  %v3352_v53 = vpop.f32.mrb[16].mxu1  ;;  %v1273_v28 = vmul.f32 %v4365_v19, %v4320_v20 }
 0x164   : > { %v4382_v43 = vpop.eup %3507  ;;  %3529 = vtanh.f32 %v1179_v35  ;;  %v3320_v54 = vpop.f32.mrb[16].mxu0  ;;  %1355 = vadd.xlane.f32.xlu1 %v1354_v44  ;;  %v1184_v57 = vadd.f32 %v3352_v53, %v4372_v31  ;;  %v1311_v16 = vmul.f32 %v3506_v36, %v4320_v20  ;;  %v1093_v38 = vcombine.high %v4315_v12, %v4315_v12 }
 0x165   : > { %v4386_v46 = vpop.eup %3509  ;;  %3531 = vtanh.f32 %v1146_v39  ;;  %v980_v58 = vpop.f32.mrb[17].mxu1  ;;  %v1152_v37 = vadd.f32 %v3320_v54, %v4380_v41  ;;  %1433 = vadd.xlane.f32.xlu0 %v1432_v51  ;;  %v1348_v8 = vsel %vm657_vm2, %v1274_v52, 0.0  ;;  %v1309_v52 = vmul.f32 %v4382_v43, %v4320_v20 }
 0x166   : > { %v4389_v47 = vpop.eup %3511  ;;  %3533 = vtanh.f32 %v1149_v45  ;;  %v852_v59 = vpop.f32.mrb[17].mxu0  ;;  %v1182_v62 = vadd.f32 %v4372_v31, %v980_v58  ;;  %v1459_v35 = vsel %vm657_vm2, %v1311_v16, 0.0  ;;  %v4448_v54 = vrot.slane %v1092_v25, %v4307_v49 }
 0x167   : > { %v4393_v55 = vpop.eup %3513  ;;  %3535 = vtanh.f32 %v1147_v26  ;;  %v3353_v63 = vpop.f32.mrb[18].mxu1  ;;  %v1150_v61 = vadd.f32 %v4380_v41, %v852_v59  ;;  %v1345_v56 = vsel %vm657_vm2, %v1273_v28, 0.0 }
 0x168   : > { %v4398_v60 = vpop.eup %3515  ;;  %v3321_v0 = vpop.f32.mrb[18].mxu0  ;;  %3537 = vtanh.f32 %v1184_v57  ;;  %v1185_v3 = vadd.f32 %v3353_v63, %v4372_v31  ;;  %1349 = vadd.xlane.f32.xlu1 %v1348_v8  ;;  %v1308_v57 = vmul.f32 %v4351_v4, %v4320_v20 }
 0x169   : > { %v4401_v1 = vpop.eup %3517  ;;  %v983_v5 = vpop.f32.mrb[19].mxu1  ;;  %3539 = vtanh.f32 %v1182_v62  ;;  %1352 = vadd.xlane.f32.xlu0 %v1351_v13  ;;  %v1153_v17 = vadd.f32 %v3321_v0, %v4380_v41  ;;  %v4460_v62 = vrot.slane %v1093_v38, %v4307_v49  ;;  %v1279_v0 = vmul.f32 %v4393_v55, %v4320_v20 }
 0x16a   : > { %v855_v6 = vpop.f32.mrb[19].mxu0  ;;  %v4406_v7 = vpop.eup %3519  ;;  %v1183_v10 = vadd.f32 %v4372_v31, %v983_v5  ;;  %3541 = vtanh.f32 %v1152_v37  ;;  %v1280_v43 = vmul.f32 %v4401_v1, %v4320_v20  ;;  %v1450_v55 = vsel %vm657_vm2, %v1308_v57, 0.0 }
 0x16b   : > { %v4412_v11 = vpop.eup %3521  ;;  %3543 = vtanh.f32 %v1185_v3  ;;  %v1151_v50 = vadd.f32 %v4380_v41, %v855_v6  ;;  %v3324_v22 = vpop.f32.mrb[20].mxu0  ;;  %v1453_v3 = vsel %vm657_vm2, %v1309_v52, 0.0 }
 0x16c   : > { %v4416_v15 = vpop.eup %3523  ;;  %3545 = vtanh.f32 %v1183_v10  ;;  %v3356_v24 = vpop.f32.mrb[20].mxu1  ;;  %1445 = vadd.xlane.f32.xlu1 %v1444_v48  ;;  %v1156_v29 = vadd.f32 %v3324_v22, %v4380_v41  ;;  %v1315_v38 = vmul.f32 %v4412_v11, %v4320_v20 }
 0x16d   : > { %v4420_v14 = vpop.eup %3525  ;;  %3547 = vtanh.f32 %v1150_v61  ;;  %v868_v30 = vpop.f32.mrb[21].mxu0  ;;  %v1188_v32 = vadd.f32 %v3356_v24, %v4372_v31  ;;  %1448 = vadd.xlane.f32.xlu0 %v1447_v21  ;;  %v1363_v24 = vsel %vm657_vm2, %v1279_v0, 0.0 }
 0x16e   : > { %v3528_v18 = vpop.eup %3527  ;;  %3549 = vtanh.f32 %v1153_v17  ;;  %v996_v33 = vpop.f32.mrb[21].mxu1  ;;  %v1154_v19 = vadd.f32 %v4380_v41, %v868_v30  ;;  %v1366_v17 = vsel %vm657_vm2, %v1280_v43, 0.0 }
 0x16f   : > { %v4427_v27 = vpop.eup %3529  ;;  %3551 = vtanh.f32 %v1151_v50  ;;  %v3325_v23 = vpop.f32.mrb[22].mxu0  ;;  %v1186_v53 = vadd.f32 %v4372_v31, %v996_v33  ;;  %v1277_v50 = vmul.f32 %v4398_v60, %v4320_v20  ;;  %v1278_v60 = vmul.f32 %v4406_v7, %v4320_v20 }
 0x170   : > { %v4433_v34 = vpop.eup %3531  ;;  %v3357_v36 = vpop.f32.mrb[22].mxu1  ;;  %3553 = vtanh.f32 %v1156_v29  ;;  %v1157_v44 = vadd.f32 %v3325_v23, %v4380_v41  ;;  %1460 = vadd.xlane.f32.xlu1 %v1459_v35  ;;  %v1312_v7 = vmul.f32 %v4386_v46, %v4320_v20 }
 0x171   : > { %v4438_v39 = vpop.eup %3533  ;;  %v871_v45 = vpop.f32.mrb[23].mxu0  ;;  %3555 = vtanh.f32 %v1188_v32  ;;  %1346 = vadd.xlane.f32.xlu0 %v1345_v56  ;;  %v1189_v59 = vadd.f32 %v3357_v36, %v4372_v31  ;;  %v1357_v11 = vsel %vm657_vm2, %v1277_v50, 0.0 }
 0x172   : > { %v999_v26 = vpop.f32.mrb[23].mxu1  ;;  %v4442_v51 = vpop.eup %3535  ;;  %3557 = vtanh.f32 %v1154_v19  ;;  %v1155_v58 = vadd.f32 %v4380_v41, %v871_v45  ;;  %v4466_v41 = vmul.f32 %v3528_v18, %v4320_v20 }
 0x173   : > { %v4450_v12 = vpop.eup %3537  ;;  %3559 = vtanh.f32 %v1157_v44  ;;  %v1187_v4 = vadd.f32 %v4372_v31, %v999_v26  ;;  %v3328_v5 = vpop.f32.mrb[24].mxu0 }
 0x174   : > { %v3540_v37 = vpop.eup %3539  ;;  %3561 = vtanh.f32 %v1186_v53  ;;  %v3360_v8 = vpop.f32.mrb[24].mxu1  ;;  %1454 = vadd.xlane.f32.xlu1 %v1453_v3  ;;  %v1160_v10 = vadd.f32 %v3328_v5, %v4448_v54 }
 0x175   : > { %v3542_v63 = vpop.eup %3541  ;;  %3563 = vtanh.f32 %v1155_v58  ;;  %v4473_v6 = vmul.f32 %v3540_v37, %v4320_v20  ;;  %v884_v13 = vpop.f32.mrb[25].mxu0  ;;  %1451 = vadd.xlane.f32.xlu0 %v1450_v55  ;;  %v1192_v44 = vadd.f32 %v3360_v8, %v4460_v62  ;;  %v1360_v37 = vsel %vm657_vm2, %v1278_v60, 0.0 }
 0x176   : > { %v3544_v2 = vpop.eup %3543  ;;  %v4470_v1 = vmul.f32 %v3542_v63, %v4320_v20  ;;  %3565 = vtanh.f32 %v1189_v59  ;;  %v1012_v61 = vpop.f32.mrb[25].mxu1  ;;  %v1158_v28 = vadd.f32 %v4448_v54, %v884_v13  ;;  %v1284_v55 = vmul.f32 %v4438_v39, %v4320_v20 }
 0x177   : > { %v3546_v9 = vpop.eup %3545  ;;  %v4477_v31 = vmul.f32 %v3544_v2, %v4320_v20  ;;  %3567 = vtanh.f32 %v1187_v4  ;;  %v3329_v21 = vpop.f32.mrb[26].mxu0  ;;  %v1190_v26 = vadd.f32 %v4460_v62, %v1012_v61  ;;  %v1471_v4 = vsel %vm657_vm2, %v1315_v38, 0.0 }
 0x178   : > { %v3548_v16 = vpop.eup %3547  ;;  %v4484_v18 = vmul.f32 %v3546_v9, %v4320_v20  ;;  %v3361_v48 = vpop.f32.mrb[26].mxu1  ;;  %3569 = vtanh.f32 %v1160_v10  ;;  %v1161_v35 = vadd.f32 %v3329_v21, %v4448_v54  ;;  %1367 = vadd.xlane.f32.xlu1 %v1366_v17  ;;  %v1462_v39 = vsel %vm657_vm2, %v1312_v7, 0.0 }
 0x179   : > { %v3550_v22 = vpop.eup %3549  ;;  %v4488_v25 = vmul.f32 %v3548_v16, %v4320_v20  ;;  %v887_v29 = vpop.f32.mrb[27].mxu0  ;;  %3571 = vtanh.f32 %v1158_v28  ;;  %1364 = vadd.xlane.f32.xlu0 %v1363_v24  ;;  %v1193_v57 = vadd.f32 %v3361_v48, %v4460_v62  ;;  %v1282_v7 = vmul.f32 %v4442_v51, %v4320_v20 }
 0x17a   : > { %v1015_v30 = vpop.f32.mrb[27].mxu1  ;;  %v3552_v32 = vpop.eup %3551  ;;  %v4494_v33 = vmul.f32 %v3550_v22, %v4320_v20  ;;  %v1159_v23 = vadd.f32 %v4448_v54, %v887_v29  ;;  %3573 = vtanh.f32 %v1161_v35 }
 0x17b   : > { %v3554_v36 = vpop.eup %3553  ;;  %v4501_v19 = vmul.f32 %v3552_v32, %v4320_v20  ;;  %v1191_v46 = vadd.f32 %v4460_v62, %v1015_v30  ;;  %v3332_v59 = vpop.f32.mrb[28].mxu0  ;;  %v1310_v32 = vmul.f32 %v4389_v47, %v4320_v20 }
 0x17c   : > { %v3556_v45 = vpop.eup %3555  ;;  %v4508_v52 = vmul.f32 %v3554_v36, %v4320_v20  ;;  %3575 = vtanh.f32 %v1159_v23  ;;  %v3364_v63 = vpop.f32.mrb[28].mxu1  ;;  %1361 = vadd.xlane.f32.xlu1 %v1360_v37  ;;  %v1164_v3 = vadd.f32 %v3332_v59, %v4448_v54  ;;  %v1378_v23 = vsel %vm657_vm2, %v1284_v55, 0.0 }
 0x17d   : > { %v3558_v53 = vpop.eup %3557  ;;  %v4512_v56 = vmul.f32 %v3556_v45, %v4320_v20  ;;  %3577 = vtanh.f32 %v1192_v44  ;;  %v900_v5 = vpop.f32.mrb[29].mxu0  ;;  %1358 = vadd.xlane.f32.xlu0 %v1357_v11  ;;  %v1196_v35 = vadd.f32 %v3364_v63, %v4460_v62  ;;  %v1456_v11 = vsel %vm657_vm2, %v1310_v32, 0.0 }
 0x17e   : > { %v3560_v58 = vpop.eup %3559  ;;  %v4518_v43 = vmul.f32 %v3558_v53, %v4320_v20  ;;  %3579 = vtanh.f32 %v1190_v26  ;;  %v1028_v8 = vpop.f32.mrb[29].mxu1  ;;  %v1162_v13 = vadd.f32 %v4448_v54, %v900_v5  ;;  %v1372_v63 = vsel %vm657_vm2, %v1282_v7, 0.0 }
 0x17f   : > { %v3562_v0 = vpop.eup %3561  ;;  %v4522_v2 = vmul.f32 %v3560_v58, %v4320_v20  ;;  %3581 = vtanh.f32 %v1193_v57  ;;  %v3333_v61 = vpop.f32.mrb[30].mxu0  ;;  %v1283_v57 = vmul.f32 %v4420_v14, %v4320_v20  ;;  %v1314_v14 = vmul.f32 %v4427_v27, %v4320_v20 }
 0x180   : > { %v3564_v9 = vpop.eup %3563  ;;  %v4528_v10 = vmul.f32 %v3562_v0, %v4320_v20  ;;  %v3365_v16 = vpop.f32.mrb[30].mxu1  ;;  %3583 = vtanh.f32 %v1191_v46  ;;  %v1165_v21 = vadd.f32 %v3333_v61, %v4448_v54  ;;  %1472 = vadd.xlane.f32.xlu1 %v1471_v4  ;;  %v1281_v5 = vmul.f32 %v4433_v34, %v4320_v20 }
 0x181   : > { %v3566_v17 = vpop.eup %3565  ;;  %v4532_v50 = vmul.f32 %v3564_v9, %v4320_v20  ;;  %v903_v48 = vpop.f32.mrb[31].mxu0  ;;  %3585 = vtanh.f32 %v1164_v3  ;;  %1463 = vadd.xlane.f32.xlu0 %v1462_v39  ;;  %v1197_v44 = vadd.f32 %v3365_v16, %v4460_v62  ;;  %v1375_v3 = vsel %vm657_vm2, %v1283_v57, 0.0 }
 0x182   : > { %v1031_v22 = vpop.f32.mrb[31].mxu1  ;;  %v3568_v24 = vpop.eup %3567  ;;  %v4537_v28 = vmul.f32 %v3566_v17, %v4320_v20  ;;  %v1163_v29 = vadd.f32 %v4448_v54, %v903_v48  ;;  %3587 = vtanh.f32 %v1162_v13  ;;  %v1194_v54 = vadd.f32 %v4460_v62, %v1028_v8 }
 0x183   : > { %v3570_v30 = vpop.eup %3569  ;;  %v4543_v60 = vmul.f32 %v3568_v24, %v4320_v20  ;;  %3589 = vtanh.f32 %v1165_v21  ;;  %v1195_v47 = vadd.f32 %v4460_v62, %v1031_v22  ;;  %v1319_v55 = vmul.f32 %v4450_v12, %v4320_v20 }
 0x184   : > { %v4548_v36 = vmul.f32 %v3570_v30, %v4320_v20  ;;  %v3572_v38 = vpop.eup %3571  ;;  %3591 = vtanh.f32 %v1163_v29  ;;  %1379 = vadd.xlane.f32.xlu1 %v1378_v23  ;;  %v1468_v17 = vsel %vm657_vm2, %v1314_v14, 0.0  ;;  %v1369_v48 = vsel %vm657_vm2, %v1281_v5, 0.0 }
 0x185   : > { %v3574_v45 = vpop.eup %3573  ;;  %3593 = vtanh.f32 %v1196_v35  ;;  %v4556_v26 = vmul.f32 %v3572_v38, %v4320_v20  ;;  %1457 = vadd.xlane.f32.xlu0 %v1456_v11  ;;  %v1313_v12 = vmul.f32 %v4416_v15, %v4320_v20  ;;  %v1483_v39 = vsel %vm657_vm2, %v1319_v55, 0.0 }
 0x186   : > { %v3576_v53 = vpop.eup %3575  ;;  %v4562_v58 = vmul.f32 %v3574_v45, %v4320_v20  ;;  %3595 = vtanh.f32 %v1194_v54  ;;  %v1474_v45 = vsel %vm657_vm2, %v4466_v41, 0.0  ;;  %v1486_v7 = vsel %vm657_vm2, %v4477_v31, 0.0 }
 0x187   : > { %v3578_v62 = vpop.eup %3577  ;;  %3597 = vtanh.f32 %v1197_v44  ;;  %v4565_v51 = vmul.f32 %v3576_v53, %v4320_v20  ;;  %v1465_v15 = vsel %vm657_vm2, %v1313_v12, 0.0  ;;  %v1390_v44 = vsel %vm657_vm2, %v4494_v33, 0.0 }
 0x188   : > { %v3580_v37 = vpop.eup %3579  ;;  %3599 = vtanh.f32 %v1195_v47  ;;  %v4568_v46 = vmul.f32 %v3578_v62, %v4320_v20  ;;  %1373 = vadd.xlane.f32.xlu1 %v1372_v63  ;;  %v1387_v53 = vsel %vm657_vm2, %v4470_v1, 0.0  ;;  %v1384_v11 = vsel %vm657_vm2, %v4501_v19, 0.0 }
 0x189   : > { %v3582_v59 = vpop.eup %3581  ;;  %v4574_v0 = vmul.f32 %v3580_v37, %v4320_v20  ;;  %1376 = vadd.xlane.f32.xlu0 %v1375_v3  ;;  %v1381_v33 = vsel %vm657_vm2, %v4488_v25, 0.0  ;;  %v1477_v41 = vsel %vm657_vm2, %v4473_v6, 0.0  ;;  %v1495_v1 = vsel %vm657_vm2, %v4512_v56, 0.0 }
 0x18a   : > { %v3584_v4 = vpop.eup %3583  ;;  %v4580_v8 = vmul.f32 %v3582_v59, %v4320_v20  ;;  %v1399_v31 = vsel %vm657_vm2, %v4508_v52, 0.0  ;;  %v1402_v25 = vsel %vm657_vm2, %v4522_v2, 0.0  ;;  %v1393_v19 = vsel %vm657_vm2, %v4518_v43, 0.0 }
 0x18b   : > { %v3586_v9 = vpop.eup %3585  ;;  %v4585_v27 = vmul.f32 %v3584_v4, %v4320_v20  ;;  %v1498_v6 = vsel %vm657_vm2, %v4537_v28, 0.0  ;;  %v1396_v52 = vsel %vm657_vm2, %v4532_v50, 0.0  ;;  %v1492_v56 = vsel %vm657_vm2, %v4543_v60, 0.0 }
 0x18c   : > { %v3588_v13 = vpop.eup %3587  ;;  %v4588_v61 = vmul.f32 %v3586_v9, %v4320_v20  ;;  %1469 = vadd.xlane.f32.xlu1 %v1468_v17  ;;  %v1414_v43 = vsel %vm657_vm2, %v4562_v58, 0.0  ;;  %v1411_v2 = vsel %vm657_vm2, %v4548_v36, 0.0  ;;  %v1507_v28 = vsel %vm657_vm2, %v4568_v46, 0.0 }
 0x18d   : > { %v3590_v16 = vpop.eup %3589  ;;  %v4592_v34 = vmul.f32 %v3588_v13, %v4320_v20  ;;  %1370 = vadd.xlane.f32.xlu0 %v1369_v48  ;;  %v1408_v50 = vsel %vm657_vm2, %v4565_v51, 0.0  ;;  %v1405_v60 = vsel %vm657_vm2, %v4556_v26, 0.0  ;;  %v1504_v36 = vsel %vm657_vm2, %v4585_v27, 0.0 }
 0x18e   : > { %v3592_v21 = vpop.eup %3591  ;;  %v4598_v22 = vmul.f32 %v3590_v16, %v4320_v20  ;;  %v1501_v57 = vsel %vm657_vm2, %v4574_v0, 0.0  ;;  %v1423_v62 = vsel %vm657_vm2, %v4588_v61, 0.0 }
 0x18f   : > { %v3594_v24 = vpop.eup %3593  ;;  %v4602_v29 = vmul.f32 %v3592_v21, %v4320_v20  ;;  %v1417_v58 = vsel %vm657_vm2, %v4592_v34, 0.0 }
 0x190   : > { %v3596_v30 = vpop.eup %3595  ;;  %v4605_v32 = vmul.f32 %v3594_v24, %v4320_v20  ;;  %1484 = vadd.xlane.f32.xlu1 %v1483_v39  ;;  %v1426_v37 = vsel %vm657_vm2, %v4598_v22, 0.0 }
 0x191   : > { %v3598_v35 = vpop.eup %3597  ;;  %v1329_v23 = vmul.f32 %v3596_v30, %v4320_v20  ;;  %1466 = vadd.xlane.f32.xlu0 %v1465_v15  ;;  %v1420_v51 = vsel %vm657_vm2, %v4602_v29, 0.0 }
 0x192   : > { %v3600_v54 = vpop.eup %3599  ;;  %v4610_v38 = vmul.f32 %v3598_v35, %v4320_v20  ;;  %v1519_v63 = vsel %vm657_vm2, %v4605_v32, 0.0 }
 0x193   : > { %v1330_v47 = vmul.f32 %v3600_v54, %v4320_v20  ;;  %v1480_v20 = vsel %vm657_vm2, %v4484_v18, 0.0  ;;  %v1489_v18 = vsel %vm657_vm2, %v4528_v10, 0.0  ;;  %v1510_v10 = vsel %vm657_vm2, %v4580_v8, 0.0 }
 0x194   : > { %1391 = vadd.xlane.f32.xlu1 %v1390_v44  ;;  %v1513_v26 = vsel %vm657_vm2, %v1329_v23, 0.0  ;;  %v1522_v59 = vsel %vm657_vm2, %v4610_v38, 0.0 }
 0x195   : > { %1475 = vadd.xlane.f32.xlu0 %v1474_v45  ;;  %v1516_v46 = vsel %vm657_vm2, %v1330_v47, 0.0 }
 0x198   : > { %1487 = vadd.xlane.f32.xlu1 %v1486_v7 }
 0x199   : > { %1388 = vadd.xlane.f32.xlu0 %v1387_v53 }
 0x19c   : > { %1385 = vadd.xlane.f32.xlu1 %v1384_v11 }
 0x19d   : > { %1382 = vadd.xlane.f32.xlu0 %v1381_v33 }
 0x1a0   : > { %1481 = vadd.xlane.f32.xlu1 %v1480_v20 }
 0x1a1   : > { %1478 = vadd.xlane.f32.xlu0 %v1477_v41 }
 0x1a4   : > { %1496 = vadd.xlane.f32.xlu1 %v1495_v1 }
 0x1a5   : > { %1400 = vadd.xlane.f32.xlu0 %v1399_v31 }
 0x1a8   : > { %1403 = vadd.xlane.f32.xlu1 %v1402_v25 }
 0x1a9   : > { %1394 = vadd.xlane.f32.xlu0 %v1393_v19  ;;  %v1591_v19 = vand.u32 127, %v1049_v40 }
 0x1ab   : > { %v1617_v40 = vadd.s32 4294967264, %v1591_v19 }
 0x1ac   : > { %1499 = vadd.xlane.f32.xlu1 %v1498_v6 }
 0x1ad   : > { %1490 = vadd.xlane.f32.xlu0 %v1489_v18 }
 0x1b0   : > { %1397 = vadd.xlane.f32.xlu1 %v1396_v52  ;;  %v1596_v52 = vadd.s32 4294967288, %v1591_v19 }
 0x1b1   : > { %1493 = vadd.xlane.f32.xlu0 %v1492_v56 }
 0x1b4   : > { %1415 = vadd.xlane.f32.xlu1 %v1414_v43 }
 0x1b5   : > { %1412 = vadd.xlane.f32.xlu0 %v1411_v2  ;;  %v4765_v2 = vsub.s32 %v1596_v52, %v4300_v42 }
 0x1b7   : > { %5769 = vst [vmem:[#allocation36_spill] sm:$0xff] %v4765_v2 }
 0x1b8   : > { %1511 = vadd.xlane.f32.xlu1 %v1510_v10  ;;  %v1603_v10 = vadd.s32 4294967280, %v1591_v19 }
 0x1b9   : > { %1508 = vadd.xlane.f32.xlu0 %v1507_v28  ;;  %v4768_v28 = vsub.s32 %v1591_v19, %v4300_v42 }
 0x1bb   : > { %5770 = vst [vmem:[#allocation37_spill] sm:$0xff] %v4768_v28 }
 0x1bc   : > { %1409 = vadd.xlane.f32.xlu1 %v1408_v50 }
 0x1bd   : > { %1406 = vadd.xlane.f32.xlu0 %v1405_v60  ;;  %v1610_v60 = vadd.s32 4294967272, %v1591_v19 }
 0x1c0   : > { %1505 = vadd.xlane.f32.xlu1 %v1504_v36 }
 0x1c1   : > { %1502 = vadd.xlane.f32.xlu0 %v1501_v57 }
 0x1c4   : > { %1418 = vadd.xlane.f32.xlu1 %v1417_v58 }
 0x1c5   : > { %1424 = vadd.xlane.f32.xlu0 %v1423_v62  ;;  %v4779_v62 = vsub.s32 %v1603_v10, %v4300_v42 }
 0x1c8   : > { %1514 = vadd.xlane.f32.xlu1 %v1513_v26 }
 0x1c9   : > { %1421 = vadd.xlane.f32.xlu0 %v1420_v51 }
 0x1cc   : > { %1427 = vadd.xlane.f32.xlu1 %v1426_v37 }
 0x1cd   : > { %1517 = vadd.xlane.f32.xlu0 %v1516_v46  ;;  %v4788_v46 = vsub.s32 %v1610_v60, %v4300_v42 }
 0x1d0   : > { %1523 = vadd.xlane.f32.xlu1 %v1522_v59  ;;  %v4791_v59 = vsub.s32 %v1617_v40, %v4300_v42 }
 0x1d1   : > { %1520 = vadd.xlane.f32.xlu0 %v1519_v63  ;;  %v1624_v63 = vadd.s32 4294967256, %v1591_v19 }
 0x1e1   : > { %v4675_v14 = vpop.xlane.xlu1 %1340 }
 0x1e2   : > { %v4677_v0 = vpop.xlane.xlu0 %1436  ;;  %v1607_v60 = vrot.slane %v4675_v14, %v4779_v62 }
 0x1e3   : > { %5743 = vst [vmem:[#allocation10_spill] sm:$0xff] %v4677_v0 }
 0x1e5   : > { %v4679_v4 = vpop.xlane.xlu1 %1430 }
 0x1e6   : > { %5744 = vst [vmem:[#allocation11_spill] sm:$0xff] %v4679_v4  ;;  %v4681_v3 = vpop.xlane.xlu0 %1334  ;;  %v1765_v26 = vrot.slane %v4679_v4, %v4768_v28  ;;  %v1638_v4 = vadd.s32 4294967240, %v1591_v19 }
 0x1e7   : > { %5745 = vst [vmem:[#allocation12_spill] sm:$0xff] %v4681_v3  ;;  %v1595_v51 = vrot.slane %v4681_v3, %v4768_v28  ;;  %v1774_v3 = vrot.slane %v4677_v0, %v4779_v62 }
 0x1e9   : > { %v4683_v5 = vpop.xlane.xlu1 %1343 }
 0x1ea   : > { %v4685_v8 = vpop.xlane.xlu0 %1439 }
 0x1eb   : > { %5746 = vst [vmem:[#allocation13_spill] sm:$0xff] %v4685_v8  ;;  %v1779_v0 = vrot.slane %v4685_v8, %v4788_v46 }
 0x1ed   : > { %v4687_v9 = vpop.xlane.xlu1 %1442 }
 0x1ee   : > { %5747 = vst [vmem:[#allocation14_spill] sm:$0xff] %v4687_v9  ;;  %v4689_v55 = vpop.xlane.xlu0 %1337 }
 0x1ef   : > { %5748 = vst [vmem:[#allocation15_spill] sm:$0xff] %v4689_v55  ;;  %v1600_v57 = vrot.slane %v4689_v55, %v4765_v2  ;;  %v1631_v55 = vadd.s32 4294967248, %v1591_v19  ;;  %v4810_v19 = vsub.s32 %v1624_v63, %v4300_v42 }
 0x1f1   : > { %v4691_v27 = vpop.xlane.xlu1 %1355  ;;  %v1602_v10 = vsel %vm1601_vm3, %v1600_v57, %v1595_v51 }
 0x1f2   : > { %5749 = vst [vmem:[#allocation16_spill] sm:$0xff] %v4691_v27  ;;  %v4693_v13 = vpop.xlane.xlu0 %1433  ;;  %v1609_v57 = vsel %vm1608_vm4, %v1607_v60, %v1602_v10  ;;  %v4824_v10 = vsub.s32 %v1631_v55, %v4300_v42 }
 0x1f3   : > { %5750 = vst [vmem:[#allocation17_spill] sm:$0xff] %v4693_v13  ;;  %v1769_v58 = vrot.slane %v4693_v13, %v4765_v2 }
 0x1f5   : > { %v4695_v61 = vpop.xlane.xlu1 %1349  ;;  %v1770_v13 = vsel %vm1601_vm3, %v1769_v58, %v1765_v26 }
 0x1f6   : > { %v4697_v16 = vpop.xlane.xlu0 %1352  ;;  %v1775_v58 = vsel %vm1608_vm4, %v1774_v3, %v1770_v13  ;;  %v1628_v55 = vrot.slane %v4695_v61, %v4810_v19 }
 0x1f7   : > { %v1780_v13 = vsel %vm1615_vm5, %v1779_v0, %v1775_v58 }
 0x1f9   : > { %v4699_v17 = vpop.xlane.xlu1 %1445 }
 0x1fa   : > { %5751 = vst [vmem:[#allocation18_spill] sm:$0xff] %v4699_v17  ;;  %v4701_v34 = vpop.xlane.xlu0 %1448  ;;  %v1789_v63 = vrot.slane %v4699_v17, %v4810_v19 }
 0x1fb   : > { %5752 = vst [vmem:[#allocation19_spill] sm:$0xff] %v4701_v34 }
 0x1fd   : > { %v4703_v21 = vpop.xlane.xlu1 %1460 }
 0x1fe   : > { %5753 = vst [vmem:[#allocation20_spill] sm:$0xff] %v4703_v21  ;;  %v4705_v48 = vpop.xlane.xlu0 %1346 }
 0x1ff   : > { %5754 = vst [vmem:[#allocation21_spill] sm:$0xff] %v4705_v48  ;;  %v1621_v26 = vrot.slane %v4705_v48, %v4791_v59 }
 0x201   : > { %v4707_v12 = vpop.xlane.xlu1 %1454 }
 0x202   : > { %5755 = vst [vmem:[#allocation22_spill] sm:$0xff] %v4707_v12  ;;  %v4709_v22 = vpop.xlane.xlu0 %1451 }
 0x203   : > { %5756 = vst [vmem:[#allocation23_spill] sm:$0xff] %v4709_v22 }
 0x205   : > { %v4711_v24 = vpop.xlane.xlu1 %1367 }
 0x206   : > { %v4713_v39 = vpop.xlane.xlu0 %1364 }
 0x207   : > { %5757 = vst [vmem:[#allocation24_spill] sm:$0xff] %v4713_v39  ;;  %v1657_v8 = vrot.slane %v4713_v39, %v4779_v62 }
 0x209   : > { %v4715_v29 = vpop.xlane.xlu1 %1361 }
 0x20a   : > { %5758 = vst [vmem:[#allocation25_spill] sm:$0xff] %v4715_v29  ;;  %v4717_v30 = vpop.xlane.xlu0 %1358  ;;  %v1652_v49 = vrot.slane %v4715_v29, %v4765_v2  ;;  %v4821_v29 = vsub.s32 %v1638_v4, %v4300_v42  ;;  %v1784_v4 = vrot.slane %v4687_v9, %v4791_v59  ;;  %v1794_v9 = vrot.slane %v4701_v34, %v4824_v10 }
 0x20b   : > { %5759 = vst [vmem:[#allocation26_spill] sm:$0xff] %v4717_v30  ;;  %v1648_v40 = vrot.slane %v4717_v30, %v4768_v28  ;;  %v1614_v30 = vrot.slane %v4683_v5, %v4788_v46  ;;  %v1635_v34 = vrot.slane %v4697_v16, %v4824_v10 }
 0x20d   : > { %v4719_v32 = vpop.xlane.xlu1 %1472  ;;  %v1653_v3 = vsel %vm1601_vm3, %v1652_v49, %v1648_v40  ;;  %v1616_v60 = vsel %vm1615_vm5, %v1614_v30, %v1609_v57 }
 0x20e   : > { %v4721_v35 = vpop.xlane.xlu0 %1463  ;;  %v1623_v49 = vsel %vm1622_vm6, %v1621_v26, %v1616_v60  ;;  %v1658_v30 = vsel %vm1608_vm4, %v1657_v8, %v1653_v3  ;;  %v1785_v26 = vsel %vm1622_vm6, %v1784_v4, %v1780_v13  ;;  %v1804_v60 = vrot.slane %v4707_v12, %v4768_v28 }
 0x20f   : > { %5760 = vst [vmem:[#allocation27_spill] sm:$0xff] %v4721_v35  ;;  %v1662_v8 = vrot.slane %v4711_v24, %v4788_v46  ;;  %v1642_v3 = vrot.slane %v4691_v27, %v4821_v29  ;;  %v1813_v13 = vrot.slane %v4703_v21, %v4779_v62 }
 0x211   : > { %v4723_v23 = vpop.xlane.xlu1 %1379  ;;  %v1663_v12 = vsel %vm1615_vm5, %v1662_v8, %v1658_v30 }
 0x212   : > { %v4725_v54 = vpop.xlane.xlu0 %1457 }
 0x213   : > { %5761 = vst [vmem:[#allocation28_spill] sm:$0xff] %v4725_v54  ;;  %v1808_v0 = vrot.slane %v4725_v54, %v4765_v2  ;;  %v1790_v54 = vsel %vm1629_vm7, %v1789_v63, %v1785_v26 }
 0x214   : > { %v4880_v21 = vsel %vm1636_vm8, %v1794_v9, %v1790_v54  ;;  %v1818_v9 = vrot.slane %v4721_v35, %v4788_v46 }
 0x215   : > { %v4727_v15 = vpop.xlane.xlu1 %1373  ;;  %v1809_v4 = vsel %vm1601_vm3, %v1808_v0, %v1804_v60 }
 0x216   : > { %v4729_v38 = vpop.xlane.xlu0 %1376  ;;  %v1672_v0 = vrot.slane %v4727_v15, %v4810_v19 }
 0x219   : > { %v4731_v44 = vpop.xlane.xlu1 %1469 }
 0x21a   : > { %5762 = vst [vmem:[#allocation29_spill] sm:$0xff] %v4731_v44  ;;  %v4733_v47 = vpop.xlane.xlu0 %1370 }
 0x21b   : > { %5763 = vst [vmem:[#allocation30_spill] sm:$0xff] %v4733_v47  ;;  %v1667_v57 = vrot.slane %v4733_v47, %v4791_v59 }
 0x21d   : > { %v4735_v45 = vpop.xlane.xlu1 %1484  ;;  %v1668_v63 = vsel %vm1622_vm6, %v1667_v57, %v1663_v12  ;;  %v1814_v12 = vsel %vm1608_vm4, %v1813_v13, %v1809_v4  ;;  %v1677_v13 = vrot.slane %v4729_v38, %v4824_v10 }
 0x21e   : > { %v4737_v7 = vpop.xlane.xlu0 %1466  ;;  %v1673_v54 = vsel %vm1629_vm7, %v1672_v0, %v1668_v63  ;;  %v1682_v63 = vrot.slane %v4723_v23, %v4821_v29  ;;  %v1819_v0 = vsel %vm1615_vm5, %v1818_v9, %v1814_v12 }
 0x21f   : > { %5764 = vst [vmem:[#allocation31_spill] sm:$0xff] %v4737_v7 }
 0x221   : > { %v4739_v53 = vpop.xlane.xlu1 %1391 }
 0x222   : > { %v4741_v11 = vpop.xlane.xlu0 %1475  ;;  %v1701_v4 = vrot.slane %v4739_v53, %v4788_v46 }
 0x225   : > { %v4743_v33 = vpop.xlane.xlu1 %1487 }
 0x226   : > { %v4745_v20 = vpop.xlane.xlu0 %1388 }
 0x227   : > { %v1696_v30 = vrot.slane %v4745_v20, %v4779_v62 }
 0x229   : > { %v4747_v41 = vpop.xlane.xlu1 %1385 }
 0x22a   : > { %v4749_v1 = vpop.xlane.xlu0 %1382  ;;  %v1691_v17 = vrot.slane %v4747_v41, %v4765_v2 }
 0x22b   : > { %5765 = vst [vmem:[#allocation32_spill] sm:$0xff] %v4749_v1  ;;  %v1687_v58 = vrot.slane %v4749_v1, %v4768_v28  ;;  %v1630_v1 = vsel %vm1629_vm7, %v1628_v55, %v1623_v49 }
 0x22c   : > { %v1637_v27 = vsel %vm1636_vm8, %v1635_v34, %v1630_v1 }
 0x22d   : > { %v4751_v31 = vpop.xlane.xlu1 %1481  ;;  %v1692_v26 = vsel %vm1601_vm3, %v1691_v17, %v1687_v58  ;;  %v1823_v17 = vrot.slane %v4737_v7, %v4791_v59  ;;  %v1678_v7 = vsel %vm1636_vm8, %v1677_v13, %v1673_v54 }
 0x22e   : > { %5766 = vst [vmem:[#allocation33_spill] sm:$0xff] %v4751_v31  ;;  %v4753_v25 = vpop.xlane.xlu0 %1478  ;;  %v1847_v49 = vrot.slane %v4751_v31, %v4765_v2  ;;  %v1697_v58 = vsel %vm1608_vm4, %v1696_v30, %v1692_v26  ;;  %v1828_v26 = vrot.slane %v4731_v44, %v4810_v19  ;;  %v1852_v30 = vrot.slane %v4735_v45, %v4779_v62 }
 0x22f   : > { %5767 = vst [vmem:[#allocation34_spill] sm:$0xff] %v4753_v25  ;;  %v1843_v55 = vrot.slane %v4753_v25, %v4768_v28  ;;  %v1824_v25 = vsel %vm1622_vm6, %v1823_v17, %v1819_v0  ;;  %v1644_v0 = vsel %vm1643_vm9, %v1642_v3, %v1637_v27 }
 0x231   : > { %v4756_v6 = vpop.xlane.xlu1 %1496  ;;  %v1848_v31 = vsel %vm1601_vm3, %v1847_v49, %v1843_v55  ;;  %v1702_v55 = vsel %vm1615_vm5, %v1701_v4, %v1697_v58 }
 0x232   : > { %v4758_v18 = vpop.xlane.xlu0 %1400  ;;  %v1853_v44 = vsel %vm1608_vm4, %v1852_v30, %v1848_v31  ;;  %v1799_v30 = vrot.slane %v4709_v22, %v4821_v29 }
 0x233   : > { %v1716_v17 = vrot.slane %v4758_v18, %v4824_v10 }
 0x235   : > { %v4760_v56 = vpop.xlane.xlu1 %1403 }
 0x236   : > { %v4762_v43 = vpop.xlane.xlu0 %1394  ;;  %v1721_v3 = vrot.slane %v4760_v56, %v4821_v29 }
 0x237   : > { %5768 = vst [vmem:[#allocation35_spill] sm:$0xff] %v4762_v43  ;;  %v1706_v60 = vrot.slane %v4762_v43, %v4791_v59  ;;  %v1857_v43 = vrot.slane %v4743_v33, %v4788_v46 }
 0x239   : > { %v4770_v50 = vpop.xlane.xlu1 %1499  ;;  %v1707_v12 = vsel %vm1622_vm6, %v1706_v60, %v1702_v55 }
 0x23a   : > { %5771 = vst [vmem:[#allocation38_spill] sm:$0xff] %v4770_v50  ;;  %v4772_v36 = vpop.xlane.xlu0 %1490 }
 0x23b   : > { %5772 = vst [vmem:[#allocation39_spill] sm:$0xff] %v4772_v36 }
 0x23d   : > { %v4785_v37 = vpop.xlane.xlu1 %1397 }
 0x23e   : > { %v4793_v52 = vpop.xlane.xlu0 %1493  ;;  %v1711_v35 = vrot.slane %v4785_v37, %v4810_v19 }
 0x23f   : > { %5773 = vst [vmem:[#allocation40_spill] sm:$0xff] %v4793_v52 }
 0x240   : > { %v1712_v58 = vsel %vm1629_vm7, %v1711_v35, %v1707_v12  ;;  %v1833_v35 = vrot.slane %v4719_v32, %v4824_v10  ;;  %v1683_v12 = vsel %vm1643_vm9, %v1682_v63, %v1678_v7  ;;  %v1872_v7 = vrot.slane %v4756_v6, %v4824_v10 }
 0x241   : > { %v4805_v50 = vpop.xlane.xlu1 %1415 }
 0x242   : > { %v4814_v51 = vpop.xlane.xlu0 %1412  ;;  %v1740_v55 = vrot.slane %v4805_v50, %v4788_v46 }
 0x243   : > { %v1735_v9 = vrot.slane %v4814_v51, %v4779_v62 }
 0x245   : > { %v4833_v48 = vpop.xlane.xlu1 %1511 }
 0x246   : > { %v4842_v40 = vpop.xlane.xlu0 %1508 }
 0x249   : > { %v4862_v47 = vpop.xlane.xlu1 %1409 }
 0x24a   : > { %v4870_v39 = vpop.xlane.xlu0 %1406  ;;  %v1730_v34 = vrot.slane %v4862_v47, %v4765_v2 }
 0x24b   : > { %5774 = vst [vmem:[#allocation41_spill] sm:$0xff] %v4870_v39  ;;  %v1726_v57 = vrot.slane %v4870_v39, %v4768_v28 }
 0x24d   : > { %v4893_v1 = vpop.xlane.xlu1 %1505  ;;  %v1731_v49 = vsel %vm1601_vm3, %v1730_v34, %v1726_v57  ;;  %v1862_v57 = vrot.slane %v4772_v36, %v4791_v59  ;;  %v1867_v34 = vrot.slane %v4793_v52, %v4810_v19 }
 0x24e   : > { %v4901_v8 = vpop.xlane.xlu0 %1502  ;;  %v1736_v31 = vsel %vm1608_vm4, %v1735_v9, %v1731_v49  ;;  %v1886_v13 = vrot.slane %v4893_v1, %v4765_v2  ;;  %v1829_v9 = vsel %vm1629_vm7, %v1828_v26, %v1824_v25  ;;  %v1717_v2 = vsel %vm1636_vm8, %v1716_v17, %v1712_v58 }
 0x24f   : > { %v1882_v60 = vrot.slane %v4901_v8, %v4768_v28  ;;  %v1858_v28 = vsel %vm1615_vm5, %v1857_v43, %v1853_v44  ;;  %v1741_v22 = vsel %vm1615_vm5, %v1740_v55, %v1736_v31  ;;  %v1722_v63 = vsel %vm1643_vm9, %v1721_v3, %v1717_v2 }
 0x250   : > { %v1863_v52 = vsel %vm1622_vm6, %v1862_v57, %v1858_v28  ;;  %v1891_v26 = vrot.slane %v4842_v40, %v4779_v62  ;;  %v1834_v58 = vsel %vm1636_vm8, %v1833_v35, %v1829_v9  ;;  %v5775_v9 = vld [vmem:[#allocation38_spill] sm:$0xff] }
 0x251   : > { %v4921_v39 = vpop.xlane.xlu1 %1418  ;;  %v1868_v25 = vsel %vm1629_vm7, %v1867_v34, %v1863_v52  ;;  %v1887_v44 = vsel %vm1601_vm3, %v1886_v13, %v1882_v60  ;;  %v1838_v52 = vrot.slane %v4741_v11, %v4821_v29  ;;  %v1919_v34 = vsel %vm1918_vm10, %v1683_v12, %v1644_v0 }
 0x252   : > { %v4929_v54 = vpop.xlane.xlu0 %1424  ;;  %v1745_v4 = vrot.slane %v4921_v39, %v4791_v59  ;;  %v1892_v31 = vsel %vm1608_vm4, %v1891_v26, %v1887_v44  ;;  %v1873_v13 = vsel %vm1636_vm8, %v1872_v7, %v1868_v25  ;;  %v1921_v35 = vsel %vm1920_vm11, %v1722_v63, %v1919_v34 }
 0x253   : > { %v1755_v28 = vrot.slane %v4929_v54, %v4824_v10  ;;  %v1800_v12 = vsel %vm1643_vm9, %v1799_v30, %v4880_v21  ;;  %v1877_v3 = vrot.slane %v5775_v9, %v4821_v29  ;;  %v1839_v7 = vsel %vm1643_vm9, %v1838_v52, %v1834_v58 }
 0x254   : > { %v1746_v43 = vsel %vm1622_vm6, %v1745_v4, %v1741_v22  ;;  %v1896_v4 = vrot.slane %v4833_v48, %v4788_v46 }
 0x255   : > { %v4952_v49 = vpop.xlane.xlu1 %1514 }
 0x256   : > { %v4958_v27 = vpop.xlane.xlu0 %1421  ;;  %v1901_v60 = vrot.slane %v4952_v49, %v4791_v59  ;;  %v1897_v25 = vsel %vm1615_vm5, %v1896_v4, %v1892_v31  ;;  %v3913_v4 = vmov 0  }
 0x257   : > { %v1750_v36 = vrot.slane %v4958_v27, %v4810_v19  ;;  %3466 = vset.pattern.permute.xlu1 %v3913_v4  ;;  %3467 = vset.pattern.permute.xlu0 %v3913_v4 }
 0x258   : > { %v1902_v21 = vsel %vm1622_vm6, %v1901_v60, %v1897_v25 }
 0x259   : > { %v1751_v17 = vsel %vm1629_vm7, %v1750_v36, %v1746_v43  ;;  %v4977_v57 = vpop.xlane.xlu1 %1427 }
 0x25a   : > { %v1760_v22 = vrot.slane %v4977_v57, %v4821_v29  ;;  %v4985_v2 = vpop.xlane.xlu0 %1517  ;;  %v1756_v36 = vsel %vm1636_vm8, %v1755_v28, %v1751_v17  ;;  %v1878_v17 = vsel %vm1643_vm9, %v1877_v3, %v1873_v13  ;;  %v5023_v13 = vld [vmem:[#allocation2] sm:$0xff] }
 0x25b   : > { %v1906_v55 = vrot.slane %v4985_v2, %v4810_v19 }
 0x25c   : > { %v1761_v0 = vsel %vm1643_vm9, %v1760_v22, %v1756_v36 }
 0x25d   : > { %v1923_v44 = vsel %vm1922_vm12, %v1761_v0, %v1921_v35  ;;  %v5003_v43 = vpop.xlane.xlu1 %1523  ;;  %v1907_v58 = vsel %vm1629_vm7, %v1906_v55, %v1902_v21  ;;  %v5778_v21 = vld [vmem:[#allocation12_spill] sm:$0xff] }
 0x25e   : > { %v1916_v63 = vrot.slane %v5003_v43, %v4821_v29  ;;  %v5009_v26 = vpop.xlane.xlu0 %1520  ;;  %v1925_v28 = vsel %vm1924_vm13, %v1800_v12, %v1923_v44  ;;  %v1950_v12 = vsub.s32 1, %v4300_v42  ;;  %v5776_v44 = vld [vmem:[#allocation9_spill] sm:$0xff] }
 0x25f   : > { %v1911_v30 = vrot.slane %v5009_v26, %v4824_v10  ;;  %v1927_v34 = vsel %vm1926_vm14, %v1839_v7, %v1925_v28 }
 0x260   : > { %v1929_v52 = vsel %vm1928_vm15, %v1878_v17, %v1927_v34  ;;  %v5779_v34 = vld [vmem:[#allocation25_spill] sm:$0xff] }
 0x261   : > { %v1912_v22 = vsel %vm1636_vm8, %v1911_v30, %v1907_v58 }
 0x262   : > { %v1917_v31 = vsel %vm1643_vm9, %v1916_v63, %v1912_v22  ;;  %v5777_v63 = vld [vmem:[#allocation15_spill] sm:$0xff] }
 0x263   : > { %v1931_v36 = vsel %vm1930_vm0, %v1917_v31, %v1929_v52 }
 0x264   : > { %v1933_v60 = vsel %vm657_vm2, %v1931_v36, -inf }
 0x265   : > { %1934 = vmax.xlane.f32.xlu0 %v1933_v60 }
 0x2f2   : > { %v1935_v35 = vpop.xlane.xlu0 %1934 }
 0x2f3   : > { %v5026_v0 = vmax.f32 %v5023_v13, %v1935_v35 }
 0x2f5   : > { %v1937_v55 = vsub.f32 %v5023_v13, %v5026_v0  ;;  %2760 = vst.msk [vmem:[#allocation2] sm:$0xff] %vm2758_vm1, %v5026_v0  ;;  %1942 = vperm.xlu1 %3466, %v5026_v0  }
 0x374   : > { %v5034_v3 = vpop.permute.xlu1 %1942 }
 0x375   : > { %v1947_v7 = vrot.slane %v5034_v3, %v5776_v44  ;;  %v5039_v25 = vrot.slane %v5034_v3, %v1950_v12  ;;  %v5780_v12 = vld [vmem:[#allocation21_spill] sm:$0xff] }
 0x377   : > { %v1985_v28 = vsub.f32 %v5777_v63, %v1947_v7  ;;  %v1984_v30 = vsub.f32 %v5778_v21, %v1947_v7  ;;  %v1986_v17 = vsub.f32 %v4675_v14, %v1947_v7  ;;  %v1993_v58 = vsub.f32 %v5779_v34, %v5039_v25 }
 0x378   : > { %v1987_v36 = vsub.f32 %v4683_v5, %v1947_v7  ;;  %v1995_v4 = vsub.f32 %v4711_v24, %v5039_v25  ;;  %v1988_v44 = vsub.f32 %v5780_v12, %v1947_v7  ;;  %v1954_v14 = vsub.s32 2, %v4300_v42 }
 0x379   : > { %v2050_v52 = vmul.f32 1.442695, %v1985_v28  ;;  %v2048_v22 = vmul.f32 1.442695, %v1984_v30  ;;  %v2052_v31 = vmul.f32 1.442695, %v1986_v17  ;;  %v1997_v28 = vsub.f32 %v4727_v15, %v5039_v25 }
 0x37a   : > { %v2066_v60 = vmul.f32 1.442695, %v1993_v58  ;;  %v2054_v35 = vmul.f32 1.442695, %v1987_v36  ;;  %v2070_v63 = vmul.f32 1.442695, %v1995_v4  ;;  %v1989_v5 = vsub.f32 %v4695_v61, %v1947_v7 }
 0x37b   : > { %3601 = vpow2.f32 %v2050_v52  ;;  %v2056_v21 = vmul.f32 1.442695, %v1988_v44  ;;  %v5055_v30 = vrot.slane %v5034_v3, %v1954_v14  ;;  %v2074_v24 = vmul.f32 1.442695, %v1997_v28 }
 0x37c   : > { %3603 = vpow2.f32 %v2048_v22  ;;  %v1999_v17 = vsub.f32 %v4723_v23, %v5039_v25  ;;  %v2058_v52 = vmul.f32 1.442695, %v1989_v5  ;;  %v1990_v15 = vsub.f32 %v4697_v16, %v1947_v7  ;;  %v5781_v23 = vld [vmem:[#allocation16_spill] sm:$0xff] }
 0x37d   : > { %3605 = vpow2.f32 %v2052_v31  ;;  %v2001_v61 = vsub.f32 %v4747_v41, %v5055_v30  ;;  %v1991_v4 = vsub.f32 %v5781_v23, %v1947_v7  ;;  %v2003_v12 = vsub.f32 %v4739_v53, %v5055_v30  ;;  %v5782_v41 = vld [vmem:[#allocation26_spill] sm:$0xff] }
 0x37e   : > { %3607 = vpow2.f32 %v2066_v60  ;;  %v2078_v22 = vmul.f32 1.442695, %v1999_v17  ;;  %v2060_v60 = vmul.f32 1.442695, %v1990_v15  ;;  %v1958_v28 = vsub.s32 3, %v4300_v42  ;;  %v5783_v17 = vld [vmem:[#allocation24_spill] sm:$0xff] }
 0x37f   : > { %3609 = vpow2.f32 %v2054_v35  ;;  %v2082_v35 = vmul.f32 1.442695, %v2001_v61  ;;  %v2062_v14 = vmul.f32 1.442695, %v1991_v4  ;;  %v2005_v7 = vsub.f32 %v4785_v37, %v5055_v30 }
 0x380   : > { %3611 = vpow2.f32 %v2070_v63  ;;  %v1992_v63 = vsub.f32 %v5782_v41, %v5039_v25  ;;  %v2007_v15 = vsub.f32 %v4760_v56, %v5055_v30 }
 0x381   : > { %3613 = vpow2.f32 %v2056_v21  ;;  %v2086_v21 = vmul.f32 1.442695, %v2003_v12  ;;  %v1998_v12 = vsub.f32 %v4729_v38, %v5039_v25 }
 0x382   : > { %3615 = vpow2.f32 %v2074_v24  ;;  %v2064_v53 = vmul.f32 1.442695, %v1992_v63  ;;  %v5785_v63 = vld [vmem:[#allocation32_spill] sm:$0xff] }
 0x383   : > { %3617 = vpow2.f32 %v2058_v52  ;;  %v2090_v52 = vmul.f32 1.442695, %v2005_v7 }
 0x384   : > { %3619 = vpow2.f32 %v2078_v22 }
 0x385   : > { %v3602_v34 = vpop.eup %3601  ;;  %3621 = vpow2.f32 %v2060_v60  ;;  %v2094_v60 = vmul.f32 1.442695, %v2007_v15 }
 0x386   : > { %v3604_v58 = vpop.eup %3603  ;;  %2246 = vperm.xlu1 %3466, %v3602_v34   ;;  %3623 = vpow2.f32 %v2082_v35  ;;  %v1994_v34 = vsub.f32 %v5783_v17, %v5039_v25 }
 0x387   : > { %2243 = vperm.xlu0 %3467, %v3604_v58   ;;  %v3606_v31 = vpop.eup %3605  ;;  %3625 = vpow2.f32 %v2062_v14  ;;  %v5073_v58 = vrot.slane %v5034_v3, %v1958_v28  ;;  %v2000_v28 = vsub.f32 %v5785_v63, %v5055_v30  ;;  %v5789_v63 = vld [vmem:[#allocation41_spill] sm:$0xff] }
 0x388   : > { %v3608_v36 = vpop.eup %3607  ;;  %3627 = vpow2.f32 %v2086_v21  ;;  %v2068_v37 = vmul.f32 1.442695, %v1994_v34  ;;  %v1962_v21 = vsub.s32 4, %v4300_v42 }
 0x389   : > { %v3610_v44 = vpop.eup %3609  ;;  %3629 = vpow2.f32 %v2064_v53  ;;  %v2009_v23 = vsub.f32 %v4862_v47, %v5073_v58  ;;  %v2076_v47 = vmul.f32 1.442695, %v1998_v12  ;;  %v2013_v38 = vsub.f32 %v4958_v27, %v5073_v58 }
 0x38a   : > { %2249 = vperm.xlu1 %3466, %v3606_v31   ;;  %v3612_v16 = vpop.eup %3611  ;;  %v5784_v31 = vld [vmem:[#allocation30_spill] sm:$0xff]  ;;  %3631 = vpow2.f32 %v2090_v52  ;;  %v5093_v53 = vrot.slane %v5034_v3, %v1962_v21  ;;  %v2015_v34 = vsub.f32 %v4977_v57, %v5073_v58  ;;  %v1970_v57 = vsub.s32 6, %v4300_v42 }
 0x38b   : > { %2270 = vperm.xlu0 %3467, %v3608_v36   ;;  %v3614_v5 = vpop.eup %3613  ;;  %v1996_v36 = vsub.f32 %v5784_v31, %v5039_v25  ;;  %3633 = vpow2.f32 %v2068_v37  ;;  %v2106_v17 = vmul.f32 1.442695, %v2013_v38  ;;  %v1966_v37 = vsub.s32 5, %v4300_v42  ;;  %v5787_v31 = vld [vmem:[#allocation17_spill] sm:$0xff] }
 0x38c   : > { %v3616_v24 = vpop.eup %3615  ;;  %3635 = vpow2.f32 %v2094_v60  ;;  %v5113_v21 = vrot.slane %v5034_v3, %v1970_v57 }
 0x38d   : > { %v3618_v22 = vpop.eup %3617  ;;  %v2072_v56 = vmul.f32 1.442695, %v1996_v36  ;;  %v2017_v36 = vsub.f32 %v5787_v31, %v5093_v53 }
 0x38e   : > { %2252 = vperm.xlu1 %3466, %v3610_v44   ;;  %v3620_v61 = vpop.eup %3619  ;;  %v2098_v44 = vmul.f32 1.442695, %v2009_v23 }
 0x38f   : > { %2276 = vperm.xlu0 %3467, %v3612_v16   ;;  %v3622_v4 = vpop.eup %3621  ;;  %v2011_v16 = vsub.f32 %v4805_v50, %v5073_v58  ;;  %3637 = vpow2.f32 %v2072_v56  ;;  %v2080_v50 = vmul.f32 1.442695, %v2000_v28  ;;  %v5106_v56 = vrot.slane %v5034_v3, %v1966_v37 }
 0x390   : > { %v3624_v35 = vpop.eup %3623  ;;  %3639 = vpow2.f32 %v2098_v44  ;;  %v2114_v12 = vmul.f32 1.442695, %v2017_v36  ;;  %v5788_v44 = vld [vmem:[#allocation13_spill] sm:$0xff]  ;;  %v2008_v28 = vsub.f32 %v5789_v63, %v5073_v58 }
 0x391   : > { %v3626_v14 = vpop.eup %3625  ;;  %v2102_v7 = vmul.f32 1.442695, %v2011_v16  ;;  %3641 = vpow2.f32 %v2076_v47  ;;  %v2019_v16 = vsub.f32 %v5788_v44, %v5093_v53  ;;  %v5793_v44 = vld [vmem:[#allocation11_spill] sm:$0xff]  ;;  %v2031_v13 = vsub.f32 %v4741_v11, %v5106_v56 }
 0x392   : > { %2255 = vperm.xlu1 %3466, %v3614_v5   ;;  %v3628_v41 = vpop.eup %3627 }
 0x393   : > { %2282 = vperm.xlu0 %3467, %v3616_v24   ;;  %v3630_v25 = vpop.eup %3629  ;;  %v2002_v24 = vsub.f32 %v4745_v20, %v5055_v30  ;;  %3643 = vpow2.f32 %v2102_v7  ;;  %v2110_v20 = vmul.f32 1.442695, %v2015_v34 }
 0x394   : > { %v3632_v5 = vpop.eup %3631  ;;  %3645 = vpow2.f32 %v2080_v50  ;;  %v2010_v50 = vsub.f32 %v4814_v51, %v5073_v58  ;;  %v5792_v51 = vld [vmem:[#allocation14_spill] sm:$0xff] }
 0x395   : > { %v3634_v52 = vpop.eup %3633  ;;  %v2084_v27 = vmul.f32 1.442695, %v2002_v24  ;;  %3647 = vpow2.f32 %v2106_v17  ;;  %v5791_v17 = vld [vmem:[#allocation34_spill] sm:$0xff] }
 0x396   : > { %2258 = vperm.xlu1 %3466, %v3618_v22   ;;  %v3636_v15 = vpop.eup %3635  ;;  %v5786_v22 = vld [vmem:[#allocation35_spill] sm:$0xff]  ;;  %v2032_v34 = vsub.f32 %v5791_v17, %v5113_v21 }
 0x397   : > { %2288 = vperm.xlu0 %3467, %v3620_v61   ;;  %v2004_v61 = vsub.f32 %v5786_v22, %v5055_v30  ;;  %3649 = vpow2.f32 %v2084_v27  ;;  %v2100_v27 = vmul.f32 1.442695, %v2010_v50  ;;  %v2012_v22 = vsub.f32 %v4921_v39, %v5073_v58 }
 0x398   : > { %3651 = vpow2.f32 %v2110_v20  ;;  %v2144_v37 = vmul.f32 1.442695, %v2032_v34  ;;  %v2020_v20 = vsub.f32 %v5792_v51, %v5093_v53 }
 0x399   : > { %v3638_v60 = vpop.eup %3637 }
 0x39a   : > { %2261 = vperm.xlu1 %3466, %v3622_v4   ;;  %v3640_v23 = vpop.eup %3639  ;;  %v2088_v4 = vmul.f32 1.442695, %v2004_v61  ;;  %v1974_v61 = vsub.s32 7, %v4300_v42  ;;  %v2120_v39 = vmul.f32 1.442695, %v2020_v20  ;;  %v2034_v42 = vsub.f32 %v4735_v45, %v5113_v21  ;;  %v5799_v20 = vld [vmem:[#allocation33_spill] sm:$0xff] }
 0x39b   : > { %2294 = vperm.xlu0 %3467, %v3624_v35   ;;  %v2006_v35 = vsub.f32 %v4758_v18, %v5055_v30  ;;  %v2118_v18 = vmul.f32 1.442695, %v2019_v16  ;;  %v5790_v30 = vld [vmem:[#allocation28_spill] sm:$0xff]  ;;  %v2016_v16 = vsub.f32 %v5793_v44, %v5093_v53  ;;  %v2030_v44 = vsub.f32 %v4719_v32, %v5106_v56 }
 0x39c   : > { %3653 = vpow2.f32 %v2088_v4  ;;  %v2025_v7 = vsub.f32 %v5790_v30, %v5106_v56  ;;  %v5129_v57 = vrot.slane %v5034_v3, %v1974_v61 }
 0x39d   : > { %v2092_v47 = vmul.f32 1.442695, %v2006_v35  ;;  %3655 = vpow2.f32 %v2114_v12  ;;  %v2112_v45 = vmul.f32 1.442695, %v2016_v16 }
 0x39e   : > { %2264 = vperm.xlu1 %3466, %v3626_v14   ;;  %v3642_v14 = vpop.eup %3641  ;;  %v2130_v24 = vmul.f32 1.442695, %v2025_v7  ;;  %v2042_v50 = vsub.f32 %v4842_v40, %v5129_v57  ;;  %v2046_v11 = vsub.f32 %v5009_v26, %v5129_v57  ;;  %v3732_v26 = vld [vmem:[%s4187_s5] sm:$0xff] }
 0x39f   : > { %2300 = vperm.xlu0 %3467, %v3628_v41   ;;  %v3644_v41 = vpop.eup %3643  ;;  %3657 = vpow2.f32 %v2092_v47 }
 0x3a0   : > { %v3646_v38 = vpop.eup %3645  ;;  %3659 = vpow2.f32 %v2118_v18 }
 0x3a2   : > { %2267 = vperm.xlu1 %3466, %v3630_v25   ;;  %v3648_v25 = vpop.eup %3647 }
 0x3a3   : > { %2306 = vperm.xlu0 %3467, %v3632_v5   ;;  %v2096_v5 = vmul.f32 1.442695, %v2008_v28  ;;  %v5795_v28 = vld [vmem:[#allocation31_spill] sm:$0xff] }
 0x3a4   : > { %v2028_v18 = vsub.f32 %v5795_v28, %v5106_v56 }
 0x3a5   : > { %3661 = vpow2.f32 %v2096_v5 }
 0x3a6   : > { %2273 = vperm.xlu1 %3466, %v3634_v52   ;;  %v3650_v52 = vpop.eup %3649  ;;  %3663 = vpow2.f32 %v2130_v24  ;;  %v2136_v5 = vmul.f32 1.442695, %v2028_v18  ;;  %v2038_v18 = vsub.f32 %v4756_v6, %v5113_v21 }
 0x3a7   : > { %2312 = vperm.xlu0 %3467, %v3636_v15   ;;  %v3652_v15 = vpop.eup %3651  ;;  %3665 = vpow2.f32 %v2100_v27  ;;  %v2164_v27 = vmul.f32 1.442695, %v2042_v50  ;;  %v5802_v50 = vld [vmem:[#allocation19_spill] sm:$0xff] }
 0x3a8   : > { %v3654_v31 = vpop.eup %3653  ;;  %3667 = vpow2.f32 %v2144_v37 }
 0x3a9   : > { %v3656_v36 = vpop.eup %3655 }
 0x3aa   : > { %2279 = vperm.xlu1 %3466, %v3638_v60   ;;  %v2104_v60 = vmul.f32 1.442695, %v2012_v22  ;;  %v3658_v4 = vpop.eup %3657  ;;  %v5798_v22 = vld [vmem:[#allocation29_spill] sm:$0xff] }
 0x3ab   : > { %2318 = vperm.xlu0 %3467, %v3640_v23   ;;  %v2014_v23 = vsub.f32 %v4929_v54, %v5073_v58  ;;  %v3660_v35 = vpop.eup %3659  ;;  %v2041_v54 = vsub.f32 %v4893_v1, %v5129_v57  ;;  %v2029_v61 = vsub.f32 %v5798_v22, %v5106_v56 }
 0x3ac   : > { %3669 = vpow2.f32 %v2104_v60  ;;  %v2043_v60 = vsub.f32 %v4833_v48, %v5129_v57 }
 0x3ad   : > { %v2108_v12 = vmul.f32 1.442695, %v2014_v23  ;;  %3671 = vpow2.f32 %v2120_v39  ;;  %v2162_v63 = vmul.f32 1.442695, %v2041_v54  ;;  %v2040_v54 = vsub.f32 %v4901_v8, %v5129_v57 }
 0x3ae   : > { %2285 = vperm.xlu1 %3466, %v3642_v14   ;;  %v2148_v14 = vmul.f32 1.442695, %v2034_v42 }
 0x3af   : > { %2324 = vperm.xlu0 %3467, %v3644_v41   ;;  %v3662_v3 = vpop.eup %3661  ;;  %3673 = vpow2.f32 %v2108_v12  ;;  %v5794_v41 = vld [vmem:[#allocation10_spill] sm:$0xff]  ;;  %v2166_v12 = vmul.f32 1.442695, %v2043_v60  ;;  %v2160_v32 = vmul.f32 1.442695, %v2040_v54 }
 0x3b0   : > { %v3664_v58 = vpop.eup %3663  ;;  %v2018_v47 = vsub.f32 %v5794_v41, %v5093_v53  ;;  %3675 = vpow2.f32 %v2148_v14 }
 0x3b1   : > { %v3666_v30 = vpop.eup %3665  ;;  %3677 = vpow2.f32 %v2112_v45 }
 0x3b2   : > { %2291 = vperm.xlu1 %3466, %v3646_v38   ;;  %v3668_v7 = vpop.eup %3667  ;;  %v2116_v1 = vmul.f32 1.442695, %v2018_v47  ;;  %v5796_v38 = vld [vmem:[#allocation22_spill] sm:$0xff]  ;;  %3679 = vpow2.f32 %v2162_v63 }
 0x3b3   : > { %2330 = vperm.xlu0 %3467, %v3648_v25   ;;  %v2024_v25 = vsub.f32 %v5796_v38, %v5106_v56  ;;  %v5801_v47 = vld [vmem:[#allocation18_spill] sm:$0xff]  ;;  %v2039_v38 = vsub.f32 %v5775_v9, %v5113_v21 }
 0x3b4   : > { %3681 = vpow2.f32 %v2116_v1  ;;  %v2021_v63 = vsub.f32 %v5801_v47, %v5093_v53  ;;  %v2156_v1 = vmul.f32 1.442695, %v2038_v18  ;;  %v5807_v47 = vld [vmem:[#allocation37_spill] sm:$0xff] }
 0x3b5   : > { %v2128_v34 = vmul.f32 1.442695, %v2024_v25  ;;  %3683 = vpow2.f32 %v2136_v5 }
 0x3b6   : > { %2297 = vperm.xlu1 %3466, %v3650_v52   ;;  %v3670_v24 = vpop.eup %3669  ;;  %v5797_v52 = vld [vmem:[#allocation20_spill] sm:$0xff] }
 0x3b7   : > { %2336 = vperm.xlu0 %3467, %v3652_v15   ;;  %v3672_v17 = vpop.eup %3671  ;;  %v2026_v15 = vsub.f32 %v5797_v52, %v5106_v56  ;;  %3685 = vpow2.f32 %v2128_v34  ;;  %v2047_v34 = vsub.f32 %v5003_v43, %v5129_v57 }
 0x3b8   : > { %3687 = vpow2.f32 %v2164_v27 }
 0x3b9   : > { %v3674_v37 = vpop.eup %3673  ;;  %v2132_v40 = vmul.f32 1.442695, %v2026_v15  ;;  %v5803_v15 = vld [vmem:[#allocation39_spill] sm:$0xff]  ;;  %v2174_v22 = vmul.f32 1.442695, %v2047_v34 }
 0x3ba   : > { %2303 = vperm.xlu1 %3466, %v3654_v31   ;;  %v3676_v51 = vpop.eup %3675  ;;  %v2033_v31 = vsub.f32 %v5799_v20, %v5113_v21  ;;  %v2036_v27 = vsub.f32 %v5803_v15, %v5113_v21  ;;  %v1938_v20 = vmul.f32 1.442695, %v1937_v55 }
 0x3bb   : > { %2342 = vperm.xlu0 %3467, %v3656_v36   ;;  %v2138_v36 = vmul.f32 1.442695, %v2029_v61  ;;  %v3678_v23 = vpop.eup %3677  ;;  %3689 = vpow2.f32 %v2132_v40  ;;  %v5804_v40 = vld [vmem:[#allocation23_spill] sm:$0xff] }
 0x3bc   : > { %v3680_v39 = vpop.eup %3679  ;;  %v2146_v42 = vmul.f32 1.442695, %v2033_v31  ;;  %v2023_v43 = vsub.f32 %v5804_v40, %v5093_v53  ;;  %v3735_v40 = vld [vmem:[%s4187_s5 + $0x20] sm:$0xff] }
 0x3bd   : > { %3691 = vpow2.f32 %v2138_v36 }
 0x3be   : > { %2309 = vperm.xlu1 %3466, %v3658_v4   ;;  %v5800_v4 = vld [vmem:[#allocation27_spill] sm:$0xff]  ;;  %v3682_v16 = vpop.eup %3681  ;;  %3693 = vpow2.f32 %v2146_v42  ;;  %v2126_v60 = vmul.f32 1.442695, %v2023_v43 }
 0x3bf   : > { %2348 = vperm.xlu0 %3467, %v3660_v35   ;;  %v2027_v35 = vsub.f32 %v5800_v4, %v5106_v56  ;;  %v3684_v14 = vpop.eup %3683  ;;  %3695 = vpow2.f32 %v2166_v12  ;;  %v2045_v12 = vsub.f32 %v4985_v2, %v5129_v57 }
 0x3c1   : > { %v2134_v48 = vmul.f32 1.442695, %v2027_v35  ;;  %v3686_v45 = vpop.eup %3685  ;;  %v2142_v35 = vmul.f32 1.442695, %v2031_v13 }
 0x3c2   : > { %2315 = vperm.xlu1 %3466, %v3662_v3   ;;  %v2140_v3 = vmul.f32 1.442695, %v2030_v44  ;;  %v3688_v41 = vpop.eup %3687 }
 0x3c3   : > { %2366 = vperm.xlu0 %3467, %v3664_v58   ;;  %v2044_v58 = vsub.f32 %v4952_v49, %v5129_v57  ;;  %3697 = vpow2.f32 %v2134_v48  ;;  %v2122_v49 = vmul.f32 1.442695, %v2021_v63 }
 0x3c4   : > { %3699 = vpow2.f32 %v2140_v3  ;;  %v5806_v3 = vld [vmem:[#allocation36_spill] sm:$0xff] }
 0x3c5   : > { %v2168_v28 = vmul.f32 1.442695, %v2044_v58  ;;  %v3690_v8 = vpop.eup %3689  ;;  %3701 = vpow2.f32 %v2160_v32 }
 0x3c6   : > { %2321 = vperm.xlu1 %3466, %v3666_v30  }
 0x3c7   : > { %2387 = vperm.xlu0 %3467, %v3668_v7   ;;  %v3692_v30 = vpop.eup %3691  ;;  %v2035_v7 = vsub.f32 %v4743_v33, %v5113_v21  ;;  %3703 = vpow2.f32 %v2168_v28 }
 0x3c8   : > { %v3694_v25 = vpop.eup %3693  ;;  %3705 = vpow2.f32 %v2122_v49 }
 0x3c9   : > { %v3696_v5 = vpop.eup %3695  ;;  %v2150_v6 = vmul.f32 1.442695, %v2035_v7  ;;  %3707 = vpow2.f32 %v2156_v1 }
 0x3ca   : > { %2327 = vperm.xlu1 %3466, %v3670_v24   ;;  %v2022_v24 = vsub.f32 %v5802_v50, %v5093_v53 }
 0x3cb   : > { %2351 = vperm.xlu0 %3467, %v3672_v17   ;;  %v2158_v17 = vmul.f32 1.442695, %v2039_v38  ;;  %3709 = vpow2.f32 %v2150_v6  ;;  %v3733_v38 = vld [vmem:[%s4187_s5 + $0x10] sm:$0xff] }
 0x3cc   : > { %v2124_v9 = vmul.f32 1.442695, %v2022_v24 }
 0x3cd   : > { %v3698_v33 = vpop.eup %3697  ;;  %3711 = vpow2.f32 %v2158_v17 }
 0x3ce   : > { %2333 = vperm.xlu1 %3466, %v3674_v37   ;;  %v3700_v52 = vpop.eup %3699  ;;  %3713 = vpow2.f32 %v2124_v9 }
 0x3cf   : > { %2393 = vperm.xlu0 %3467, %v3676_v51   ;;  %v3702_v61 = vpop.eup %3701  ;;  %v2152_v51 = vmul.f32 1.442695, %v2036_v27  ;;  %3715 = vpow2.f32 %v2174_v22 }
 0x3d1   : > { %v3704_v37 = vpop.eup %3703  ;;  %3717 = vpow2.f32 %v2152_v51 }
 0x3d2   : > { %2339 = vperm.xlu1 %3466, %v3678_v23   ;;  %v3706_v31 = vpop.eup %3705  ;;  %v5805_v23 = vld [vmem:[#allocation40_spill] sm:$0xff]  ;;  %3719 = vpow2.f32 %v1938_v20 }
 0x3d3   : > { %2414 = vperm.xlu0 %3467, %v3680_v39   ;;  %v3708_v36 = vpop.eup %3707  ;;  %v2037_v39 = vsub.f32 %v5805_v23, %v5113_v21  ;;  %3721 = vpow2.f32 %v2126_v60 }
 0x3d5   : > { %v3710_v42 = vpop.eup %3709  ;;  %v2154_v53 = vmul.f32 1.442695, %v2037_v39 }
 0x3d6   : > { %2345 = vperm.xlu1 %3466, %v3682_v16   ;;  %v2170_v16 = vmul.f32 1.442695, %v2045_v12 }
 0x3d7   : > { %2375 = vperm.xlu0 %3467, %v3684_v14   ;;  %v3712_v4 = vpop.eup %3711  ;;  %3723 = vpow2.f32 %v2154_v53  ;;  %v2172_v14 = vmul.f32 1.442695, %v2046_v11 }
 0x3d8   : > { %v3714_v0 = vpop.eup %3713  ;;  %3725 = vpow2.f32 %v2142_v35 }
 0x3d9   : > { %v3716_v55 = vpop.eup %3715  ;;  %3727 = vpow2.f32 %v2170_v16 }
 0x3da   : > { %2363 = vperm.xlu1 %3466, %v3686_v45   ;;  %3729 = vpow2.f32 %v2172_v14  ;;  %v3731_v45 = vld [vmem:[%s4187_s5 + $0x8] sm:$0xff] }
 0x3db   : > { %2417 = vperm.xlu0 %3467, %v3688_v41   ;;  %v3718_v21 = vpop.eup %3717 }
 0x3dc   : > { %v5186_v44 = vpop.eup %3719 }
 0x3dd   : > { %v3722_v56 = vpop.eup %3721 }
 0x3de   : > { %2369 = vperm.xlu1 %3466, %v3690_v8  }
 0x3df   : > { %2378 = vperm.xlu0 %3467, %v3692_v30  }
 0x3e1   : > { %v3724_v48 = vpop.eup %3723 }
 0x3e2   : > { %2390 = vperm.xlu1 %3466, %v3694_v25   ;;  %v3726_v2 = vpop.eup %3725 }
 0x3e3   : > { %2420 = vperm.xlu0 %3467, %v3696_v5   ;;  %v3728_v18 = vpop.eup %3727 }
 0x3e4   : > { %v3730_v24 = vpop.eup %3729 }
 0x3e6   : > { %2372 = vperm.xlu1 %3466, %v3698_v33  }
 0x3e7   : > { %2381 = vperm.xlu0 %3467, %v3700_v52   ;;  %v3734_v52 = vld [vmem:[%s4187_s5 + $0x18] sm:$0xff] }
 0x3ea   : > { %2411 = vperm.xlu1 %3466, %v3702_v61  }
 0x3eb   : > { %2423 = vperm.xlu0 %3467, %v3704_v37  }
 0x3ee   : > { %2354 = vperm.xlu1 %3466, %v3706_v31  }
 0x3ef   : > { %2405 = vperm.xlu0 %3467, %v3708_v36  }
 0x3f2   : > { %2396 = vperm.xlu1 %3466, %v3710_v42   ;;  %v3736_v42 = vld [vmem:[%s4187_s5 + $0x28] sm:$0xff] }
 0x3f3   : > { %2408 = vperm.xlu0 %3467, %v3712_v4  }
 0x3f6   : > { %2357 = vperm.xlu1 %3466, %v3714_v0  }
 0x3f7   : > { %2432 = vperm.xlu0 %3467, %v3716_v55  }
 0x3fa   : > { %2399 = vperm.xlu1 %3466, %v3718_v21   ;;  %v3737_v21 = vld [vmem:[%s4187_s5 + $0x30] sm:$0xff] }
 0x3fb   : > { %2892 = vperm.xlu0 %3467, %v5186_v44  }
 0x3fe   : > { %2360 = vperm.xlu1 %3466, %v3722_v56  }
 0x402   : > { %2402 = vperm.xlu1 %3466, %v3724_v48  }
 0x405   : > { %v2247_v54 = vpop.permute.xlu1 %2246 }
 0x406   : > { %v2441_v58 = vrot.slane %v2247_v54, %v5806_v3  ;;  %v2826_v41 = vmul.f32 %v3731_v45, %v2247_v54  ;;  %v2244_v32 = vpop.permute.xlu0 %2243  ;;  %2384 = vperm.xlu1 %3466, %v3726_v2  }
 0x407   : > { %v2437_v63 = vrot.slane %v2244_v32, %v5807_v47  ;;  %v2825_v57 = vmul.f32 %v3732_v26, %v2244_v32  ;;  %v3739_v32 = vld [vmem:[%s4187_s5 + $0x48] sm:$0xff] }
 0x408   : > { %v2897_v28 = vsel %vm657_vm2, %v2826_v41, 0.0 }
 0x409   : > { %v2442_v8 = vsel %vm1601_vm3, %v2441_v58, %v2437_v63  ;;  %v2896_v30 = vsel %vm657_vm2, %v2825_v57, 0.0  ;;  %v2250_v49 = vpop.permute.xlu1 %2249  ;;  %v3738_v58 = vld [vmem:[%s4187_s5 + $0x38] sm:$0xff] }
 0x40a   : > { %v2898_v7 = vadd.f32 %v2897_v28, %v2896_v30  ;;  %v2446_v1 = vrot.slane %v2250_v49, %v4779_v62  ;;  %v2827_v25 = vmul.f32 %v3733_v38, %v2250_v49  ;;  %v2271_v5 = vpop.permute.xlu0 %2270  ;;  %2426 = vperm.xlu1 %3466, %v3728_v18   ;;  %v3740_v49 = vld [vmem:[%s4187_s5 + $0x40] sm:$0xff] }
 0x40b   : > { %v2834_v63 = vmul.f32 %v3739_v32, %v2271_v5 }
 0x40c   : > { %v2447_v6 = vsel %vm1608_vm4, %v2446_v1, %v2442_v8  ;;  %v2899_v50 = vsel %vm657_vm2, %v2827_v25, 0.0  ;;  %v2480_v8 = vrot.slane %v2271_v5, %v5806_v3 }
 0x40d   : > { %v2900_v17 = vadd.f32 %v2899_v50, %v2898_v7  ;;  %v2253_v34 = vpop.permute.xlu1 %2252  ;;  %v2918_v38 = vsel %vm657_vm2, %v2834_v63, 0.0  ;;  %v3747_v63 = vld [vmem:[%s4187_s5 + $0x88] sm:$0xff] }
 0x40e   : > { %v2451_v33 = vrot.slane %v2253_v34, %v4788_v46  ;;  %v2828_v9 = vmul.f32 %v3734_v52, %v2253_v34  ;;  %v5204_v15 = vpop.permute.xlu0 %2276  ;;  %2429 = vperm.xlu1 %3466, %v3730_v24  }
 0x410   : > { %v2452_v27 = vsel %vm1615_vm5, %v2451_v33, %v2447_v6  ;;  %v2901_v22 = vsel %vm657_vm2, %v2828_v9, 0.0  ;;  %v3742_v33 = vld [vmem:[%s4187_s5 + $0x50] sm:$0xff] }
 0x411   : > { %v2902_v61 = vadd.f32 %v2901_v22, %v2900_v17  ;;  %v2256_v37 = vpop.permute.xlu1 %2255  ;;  %v3741_v17 = vld [vmem:[%s4187_s5 + $0x58] sm:$0xff] }
 0x412   : > { %v2456_v51 = vrot.slane %v2256_v37, %v4791_v59  ;;  %v2829_v43 = vmul.f32 %v3735_v40, %v2256_v37  ;;  %v5210_v20 = vpop.permute.xlu0 %2282  ;;  %v2836_v34 = vmul.f32 %v3741_v17, %v5204_v15 }
 0x414   : > { %v2457_v31 = vsel %vm1622_vm6, %v2456_v51, %v2452_v27  ;;  %v2903_v36 = vsel %vm657_vm2, %v2829_v43, 0.0  ;;  %v2490_v27 = vrot.slane %v5204_v15, %v4788_v46  ;;  %v2922_v43 = vsel %vm657_vm2, %v2836_v34, 0.0 }
 0x415   : > { %v2904_v60 = vadd.f32 %v2903_v36, %v2902_v61  ;;  %v2259_v23 = vpop.permute.xlu1 %2258 }
 0x416   : > { %v2461_v39 = vrot.slane %v2259_v23, %v4810_v19  ;;  %v2830_v4 = vmul.f32 %v3736_v42, %v2259_v23  ;;  %v5216_v53 = vpop.permute.xlu0 %2288  ;;  %v3744_v23 = vld [vmem:[%s4187_s5 + $0x60] sm:$0xff]  ;;  %v2500_v42 = vrot.slane %v5210_v20, %v4810_v19 }
 0x418   : > { %v2462_v13 = vsel %vm1629_vm7, %v2461_v39, %v2457_v31  ;;  %v2905_v0 = vsel %vm657_vm2, %v2830_v4, 0.0  ;;  %v3743_v31 = vld [vmem:[%s4187_s5 + $0x68] sm:$0xff] }
 0x419   : > { %v2906_v55 = vadd.f32 %v2905_v0, %v2904_v60  ;;  %v2262_v35 = vpop.permute.xlu1 %2261  ;;  %v2838_v36 = vmul.f32 %v3743_v31, %v5210_v20 }
 0x41a   : > { %v2466_v12 = vrot.slane %v2262_v35, %v4824_v10  ;;  %v2831_v16 = vmul.f32 %v3737_v21, %v2262_v35  ;;  %v5222_v11 = vpop.permute.xlu0 %2294  ;;  %v3745_v35 = vld [vmem:[%s4187_s5 + $0x78] sm:$0xff] }
 0x41c   : > { %v2467_v56 = vsel %vm1636_vm8, %v2466_v12, %v2462_v13  ;;  %v2907_v14 = vsel %vm657_vm2, %v2831_v16, 0.0  ;;  %v2840_v12 = vmul.f32 %v3745_v35, %v5216_v53  ;;  %v3751_v35 = vld [vmem:[%s4187_s5 + $0xa8] sm:$0xff] }
 0x41d   : > { %v2908_v48 = vadd.f32 %v2907_v14, %v2906_v55  ;;  %v2265_v2 = vpop.permute.xlu1 %2264  ;;  %v2926_v14 = vsel %vm657_vm2, %v2838_v36, 0.0 }
 0x41e   : > { %v2471_v54 = vrot.slane %v2265_v2, %v4821_v29  ;;  %v2832_v45 = vmul.f32 %v3738_v58, %v2265_v2  ;;  %v5228_v41 = vpop.permute.xlu0 %2300  ;;  %v3746_v2 = vld [vmem:[%s4187_s5 + $0x70] sm:$0xff]  ;;  %v2510_v58 = vrot.slane %v5216_v53, %v4821_v29 }
 0x41f   : > { %v2529_v36 = vrot.slane %v5228_v41, %v4788_v46 }
 0x420   : > { %v2472_v26 = vsel %vm1643_vm9, %v2471_v54, %v2467_v56  ;;  %v2909_v57 = vsel %vm657_vm2, %v2832_v45, 0.0 }
 0x421   : > { %v2910_v28 = vadd.f32 %v2909_v57, %v2908_v48  ;;  %v2268_v18 = vpop.permute.xlu1 %2267  ;;  %v2842_v57 = vmul.f32 %v3747_v63, %v5222_v11 }
 0x422   : > { %v2476_v30 = vrot.slane %v2268_v18, %v5807_v47  ;;  %v2833_v7 = vmul.f32 %v3740_v49, %v2268_v18  ;;  %v5236_v1 = vpop.permute.xlu0 %2306 }
 0x423   : > { %v2911_v4 = vrot.slane %v2910_v28, 4 }
 0x424   : > { %v2481_v25 = vsel %vm1601_vm3, %v2480_v8, %v2476_v30  ;;  %v2917_v6 = vsel %vm657_vm2, %v2833_v7, 0.0  ;;  %v2930_v30 = vsel %vm657_vm2, %v2840_v12, 0.0  ;;  %v2846_v12 = vmul.f32 %v3751_v35, %v5236_v1 }
 0x425   : > { %v2919_v50 = vadd.f32 %v2918_v38, %v2917_v6  ;;  %v2274_v24 = vpop.permute.xlu1 %2273  ;;  %v2912_v45 = vadd.f32 %v2911_v4, %v2910_v28  ;;  %v3748_v6 = vld [vmem:[%s4187_s5 + $0x80] sm:$0xff] }
 0x426   : > { %v2485_v5 = vrot.slane %v2274_v24, %v4779_v62  ;;  %v2835_v52 = vmul.f32 %v3742_v33, %v2274_v24  ;;  %v5245_v9 = vpop.permute.xlu0 %2312 }
 0x427   : > { %v2913_v17 = vrot.slane %v2912_v45, 2 }
 0x428   : > { %v2486_v22 = vsel %vm1608_vm4, %v2485_v5, %v2481_v25  ;;  %v2920_v61 = vsel %vm657_vm2, %v2835_v52, 0.0  ;;  %v2519_v25 = vrot.slane %v5222_v11, %v5806_v3  ;;  %v2939_v5 = vsel %vm657_vm2, %v2842_v57, 0.0 }
 0x429   : > { %v2921_v37 = vadd.f32 %v2920_v61, %v2919_v50  ;;  %v2280_v51 = vpop.permute.xlu1 %2279  ;;  %v2491_v40 = vsel %vm1615_vm5, %v2490_v27, %v2486_v22  ;;  %v2914_v31 = vadd.f32 %v2913_v17, %v2912_v45 }
 0x42a   : > { %v2495_v60 = vrot.slane %v2280_v51, %v4791_v59  ;;  %v2837_v39 = vmul.f32 %v3744_v23, %v2280_v51  ;;  %v5257_v15 = vpop.permute.xlu0 %2318  ;;  %v3750_v51 = vld [vmem:[%s4187_s5 + $0x90] sm:$0xff] }
 0x42b   : > { %v2923_v13 = vadd.f32 %v2922_v43, %v2921_v37 }
 0x42c   : > { %v2496_v0 = vsel %vm1622_vm6, %v2495_v60, %v2491_v40  ;;  %v2924_v55 = vsel %vm657_vm2, %v2837_v39, 0.0 }
 0x42d   : > { %v2925_v21 = vadd.f32 %v2924_v55, %v2923_v13  ;;  %v2286_v16 = vpop.permute.xlu1 %2285  ;;  %v2501_v56 = vsel %vm1629_vm7, %v2500_v42, %v2496_v0 }
 0x42e   : > { %v2505_v48 = vrot.slane %v2286_v16, %v4824_v10  ;;  %v2839_v20 = vmul.f32 %v3746_v2, %v2286_v16  ;;  %v5269_v54 = vpop.permute.xlu0 %2324  ;;  %v3752_v16 = vld [vmem:[%s4187_s5 + $0xa0] sm:$0xff] }
 0x42f   : > { %v2927_v32 = vadd.f32 %v2926_v14, %v2925_v21  ;;  %v2915_v14 = vrot.slane %v2914_v31, 1 }
 0x430   : > { %v2506_v18 = vsel %vm1636_vm8, %v2505_v48, %v2501_v56  ;;  %v2928_v8 = vsel %vm657_vm2, %v2839_v20, 0.0  ;;  %v2539_v48 = vrot.slane %v5236_v1, %v4810_v19 }
 0x431   : > { %v2511_v49 = vsel %vm1643_vm9, %v2510_v58, %v2506_v18  ;;  %v2929_v7 = vadd.f32 %v2928_v8, %v2927_v32  ;;  %v2292_v38 = vpop.permute.xlu1 %2291  ;;  %v2947_v8 = vsel %vm657_vm2, %v2846_v12, 0.0  ;;  %v3757_v12 = vld [vmem:[%s4187_s5 + $0xd0] sm:$0xff] }
 0x432   : > { %v5282_v53 = vsel %vm1918_vm10, %v2511_v49, %v2472_v26  ;;  %v2515_v28 = vrot.slane %v2292_v38, %v5807_v47  ;;  %v2841_v50 = vmul.f32 %v3748_v6, %v2292_v38  ;;  %v5286_v24 = vpop.permute.xlu0 %2330  ;;  %v3749_v26 = vld [vmem:[%s4187_s5 + $0x98] sm:$0xff]  ;;  %v3754_v38 = vld [vmem:[%s4187_s5 + $0xb0] sm:$0xff]  ;;  %v2549_v6 = vrot.slane %v5245_v9, %v4821_v29 }
 0x433   : > { %v2931_v34 = vadd.f32 %v2930_v30, %v2929_v7  ;;  %v2844_v61 = vmul.f32 %v3749_v26, %v5228_v41  ;;  %v3753_v30 = vld [vmem:[%s4187_s5 + $0xb8] sm:$0xff]  ;;  %v2558_v26 = vrot.slane %v5257_v15, %v5806_v3 }
 0x434   : > { %v2520_v33 = vsel %vm1601_vm3, %v2519_v25, %v2515_v28  ;;  %v2938_v52 = vsel %vm657_vm2, %v2841_v50, 0.0  ;;  %v2848_v49 = vmul.f32 %v3753_v30, %v5245_v9  ;;  %v2916_v28 = vadd.f32 %v2915_v14, %v2914_v31 }
 0x435   : > { %v2932_v27 = vrot.slane %v2931_v34, 4  ;;  %v2940_v11 = vadd.f32 %v2939_v5, %v2938_v52  ;;  %v2298_v22 = vpop.permute.xlu1 %2297  ;;  %v2943_v55 = vsel %vm657_vm2, %v2844_v61, 0.0 }
 0x436   : > { %v2524_v37 = vrot.slane %v2298_v22, %v4779_v62  ;;  %v2843_v40 = vmul.f32 %v3750_v51, %v2298_v22  ;;  %v5295_v43 = vpop.permute.xlu0 %2336  ;;  %v2951_v22 = vsel %vm657_vm2, %v2848_v49, 0.0  ;;  %v3758_v49 = vld [vmem:[%s4187_s5 + $0xd8] sm:$0xff] }
 0x437   : > { %v2933_v60 = vadd.f32 %v2932_v27, %v2931_v34 }
 0x438   : > { %v2525_v23 = vsel %vm1608_vm4, %v2524_v37, %v2520_v33  ;;  %v2941_v39 = vsel %vm657_vm2, %v2843_v40, 0.0 }
 0x439   : > { %v2934_v42 = vrot.slane %v2933_v60, 2  ;;  %v2942_v4 = vadd.f32 %v2941_v39, %v2940_v11  ;;  %v2304_v13 = vpop.permute.xlu1 %2303  ;;  %v2530_v0 = vsel %vm1615_vm5, %v2529_v36, %v2525_v23  ;;  %v2568_v39 = vrot.slane %v5269_v54, %v4788_v46 }
 0x43a   : > { %v2534_v21 = vrot.slane %v2304_v13, %v4791_v59  ;;  %v2845_v41 = vmul.f32 %v3752_v16, %v2304_v13  ;;  %v5307_v56 = vpop.permute.xlu0 %2342 }
 0x43b   : > { %v2935_v2 = vadd.f32 %v2934_v42, %v2933_v60  ;;  %v2944_v20 = vadd.f32 %v2943_v55, %v2942_v4  ;;  %v3755_v4 = vld [vmem:[%s4187_s5 + $0xc0] sm:$0xff] }
 0x43c   : > { %v2535_v58 = vsel %vm1622_vm6, %v2534_v21, %v2530_v0  ;;  %v2945_v45 = vsel %vm657_vm2, %v2845_v41, 0.0  ;;  %v3756_v0 = vld [vmem:[%s4187_s5 + $0xc8] sm:$0xff] }
 0x43d   : > { %v2936_v32 = vrot.slane %v2935_v2, 1  ;;  %v2946_v63 = vadd.f32 %v2945_v45, %v2944_v20  ;;  %v2310_v57 = vpop.permute.xlu1 %2309  ;;  %v2540_v18 = vsel %vm1629_vm7, %v2539_v48, %v2535_v58  ;;  %v2850_v55 = vmul.f32 %v3756_v0, %v5257_v15 }
 0x43e   : > { %v2544_v7 = vrot.slane %v2310_v57, %v4824_v10  ;;  %v2847_v1 = vmul.f32 %v3754_v38, %v2310_v57  ;;  %v5319_v25 = vpop.permute.xlu0 %2348  ;;  %v2578_v15 = vrot.slane %v5286_v24, %v4810_v19  ;;  %v2588_v38 = vrot.slane %v5295_v43, %v4821_v29 }
 0x43f   : > { %v2937_v50 = vadd.f32 %v2936_v32, %v2935_v2  ;;  %v2948_v17 = vadd.f32 %v2947_v8, %v2946_v63  ;;  %v2960_v45 = vsel %vm657_vm2, %v2850_v55, 0.0 }
 0x440   : > { %v2545_v34 = vsel %vm1636_vm8, %v2544_v7, %v2540_v18  ;;  %v2949_v5 = vsel %vm657_vm2, %v2847_v1, 0.0  ;;  %v2852_v7 = vmul.f32 %v3758_v49, %v5269_v54 }
 0x441   : > { %v3072_v33 = vsel %vm1918_vm10, %v2937_v50, %v2916_v28  ;;  %v2550_v52 = vsel %vm1643_vm9, %v2549_v6, %v2545_v34  ;;  %v2950_v27 = vadd.f32 %v2949_v5, %v2948_v17  ;;  %v2316_v11 = vpop.permute.xlu1 %2315  ;;  %v3759_v34 = vld [vmem:[%s4187_s5 + $0xe0] sm:$0xff] }
 0x442   : > { %v2747_v9 = vsel %vm1920_vm11, %v2550_v52, %v5282_v53  ;;  %v2554_v61 = vrot.slane %v2316_v11, %v5807_v47  ;;  %v5333_v37 = vpop.permute.xlu0 %2366  ;;  %v2849_v53 = vmul.f32 %v3755_v4, %v2316_v11 }
 0x443   : > { %v2952_v51 = vadd.f32 %v2951_v22, %v2950_v27  ;;  %v2964_v22 = vsel %vm657_vm2, %v2852_v7, 0.0 }
 0x444   : > { %v2559_v40 = vsel %vm1601_vm3, %v2558_v26, %v2554_v61  ;;  %v2959_v20 = vsel %vm657_vm2, %v2849_v53, 0.0 }
 0x445   : > { %v2953_v31 = vrot.slane %v2952_v51, 4  ;;  %v2322_v36 = vpop.permute.xlu1 %2321  ;;  %v2961_v18 = vadd.f32 %v2960_v45, %v2959_v20 }
 0x446   : > { %v2563_v60 = vrot.slane %v2322_v36, %v4779_v62  ;;  %v5337_v23 = vpop.permute.xlu0 %2387  ;;  %v2851_v21 = vmul.f32 %v3757_v12, %v2322_v36 }
 0x447   : > { %v2954_v42 = vadd.f32 %v2953_v31, %v2952_v51 }
 0x448   : > { %v2564_v13 = vsel %vm1608_vm4, %v2563_v60, %v2559_v40  ;;  %v2962_v63 = vsel %vm657_vm2, %v2851_v21, 0.0  ;;  %v3760_v40 = vld [vmem:[%s4187_s5 + $0xe8] sm:$0xff]  ;;  %v3761_v60 = vld [vmem:[%s4187_s5 + $0xf0] sm:$0xff] }
 0x449   : > { %v2955_v35 = vrot.slane %v2954_v42, 2  ;;  %v2328_v16 = vpop.permute.xlu1 %2327  ;;  %v2569_v41 = vsel %vm1615_vm5, %v2568_v39, %v2564_v13  ;;  %v2963_v6 = vadd.f32 %v2962_v63, %v2961_v18 }
 0x44a   : > { %v2573_v14 = vrot.slane %v2328_v16, %v4791_v59  ;;  %v5348_v48 = vpop.permute.xlu0 %2351  ;;  %v2853_v5 = vmul.f32 %v3759_v34, %v2328_v16  ;;  %v3768_v34 = vld [vmem:[%s4187_s5 + $0x110] sm:$0xff] }
 0x44b   : > { %v2956_v2 = vadd.f32 %v2955_v35, %v2954_v42  ;;  %v2965_v26 = vadd.f32 %v2964_v22, %v2963_v6 }
 0x44c   : > { %v2574_v58 = vsel %vm1622_vm6, %v2573_v14, %v2569_v41  ;;  %v2966_v61 = vsel %vm657_vm2, %v2853_v5, 0.0 }
 0x44d   : > { %v2957_v32 = vrot.slane %v2956_v2, 1  ;;  %v2334_v57 = vpop.permute.xlu1 %2333  ;;  %v2579_v28 = vsel %vm1629_vm7, %v2578_v15, %v2574_v58  ;;  %v2967_v36 = vadd.f32 %v2966_v61, %v2965_v26  ;;  %v3764_v58 = vld [vmem:[%s4187_s5 + $0x118] sm:$0xff]  ;;  %v3765_v15 = vld [vmem:[%s4187_s5 + $0x148] sm:$0xff]  ;;  %v3769_v26 = vld [vmem:[%s4187_s5 + $0x120] sm:$0xff] }
 0x44e   : > { %v2583_v8 = vrot.slane %v2334_v57, %v4824_v10  ;;  %v5357_v30 = vpop.permute.xlu0 %2393  ;;  %v2855_v39 = vmul.f32 %v3761_v60, %v2334_v57  ;;  %v2860_v45 = vmul.f32 %v3764_v58, %v5319_v25  ;;  %v3766_v57 = vld [vmem:[%s4187_s5 + $0x100] sm:$0xff]  ;;  %v2861_v61 = vmul.f32 %v3769_v26, %v5348_v48  ;;  %v3771_v60 = vld [vmem:[%s4187_s5 + $0x190] sm:$0xff] }
 0x44f   : > { %v2958_v1 = vadd.f32 %v2957_v32, %v2956_v2  ;;  %v3763_v2 = vld [vmem:[%s4187_s5 + $0x108] sm:$0xff] }
 0x450   : > { %v2584_v50 = vsel %vm1636_vm8, %v2583_v8, %v2579_v28  ;;  %v2970_v53 = vsel %vm657_vm2, %v2855_v39, 0.0  ;;  %v2858_v20 = vmul.f32 %v3763_v2, %v5307_v56  ;;  %v3767_v8 = vld [vmem:[%s4187_s5 + $0x180] sm:$0xff]  ;;  %v2597_v28 = vrot.slane %v5307_v56, %v5806_v3 }
 0x451   : > { %v5366_v17 = vsel %vm1920_vm11, %v2958_v1, %v3072_v33  ;;  %v2589_v52 = vsel %vm1643_vm9, %v2588_v38, %v2584_v50  ;;  %v2340_v27 = vpop.permute.xlu1 %2339  ;;  %v2854_v33 = vmul.f32 %v3760_v40, %v5286_v24  ;;  %v3762_v24 = vld [vmem:[%s4187_s5 + $0xf8] sm:$0xff]  ;;  %v2873_v49 = vmul.f32 %v3767_v8, %v5337_v23 }
 0x452   : > { %v5370_v54 = vpop.permute.xlu0 %2414  ;;  %v5373_v11 = vsel %vm1922_vm12, %v2589_v52, %v2747_v9  ;;  %v2856_v55 = vmul.f32 %v3762_v24, %v5295_v43  ;;  %v2866_v43 = vmul.f32 %v3765_v15, %v5333_v37  ;;  %v2593_v63 = vrot.slane %v2340_v27, %v5807_v47  ;;  %v3772_v24 = vld [vmem:[%s4187_s5 + $0x1c8] sm:$0xff] }
 0x453   : > { %v2968_v9 = vsel %vm657_vm2, %v2854_v33, 0.0  ;;  %v2857_v18 = vmul.f32 %v3766_v57, %v2340_v27  ;;  %v2981_v6 = vsel %vm657_vm2, %v2858_v20, 0.0  ;;  %v2607_v50 = vrot.slane %v5319_v25, %v4788_v46  ;;  %v3770_v25 = vld [vmem:[%s4187_s5 + $0x140] sm:$0xff]  ;;  %v3775_v57 = vld [vmem:[%s4187_s5 + $0x158] sm:$0xff] }
 0x454   : > { %v2969_v4 = vadd.f32 %v2968_v9, %v2967_v36  ;;  %v2972_v21 = vsel %vm657_vm2, %v2856_v55, 0.0  ;;  %v2985_v52 = vsel %vm657_vm2, %v2860_v45, 0.0  ;;  %v2636_v27 = vrot.slane %v5333_v37, %v5806_v3  ;;  %v3774_v45 = vld [vmem:[%s4187_s5 + $0x160] sm:$0xff] }
 0x455   : > { %v2346_v51 = vpop.permute.xlu1 %2345  ;;  %v3002_v22 = vsel %vm657_vm2, %v2866_v43, 0.0  ;;  %v2598_v40 = vsel %vm1601_vm3, %v2597_v28, %v2593_v63  ;;  %v2980_v33 = vsel %vm657_vm2, %v2857_v18, 0.0  ;;  %v2671_v36 = vrot.slane %v5337_v23, %v5807_v47 }
 0x456   : > { %v5379_v31 = vpop.permute.xlu0 %2375  ;;  %v2971_v35 = vadd.f32 %v2970_v53, %v2969_v4  ;;  %v2602_v7 = vrot.slane %v2346_v51, %v4779_v62  ;;  %v2859_v5 = vmul.f32 %v3768_v34, %v2346_v51  ;;  %v5433_v37 = vsel %vm657_vm2, %v2873_v49, 0.0 }
 0x457   : > { %v2875_v39 = vmul.f32 %v3771_v60, %v5357_v30  ;;  %v2612_v53 = vrot.slane %v5348_v48, %v4791_v59  ;;  %v2882_v55 = vmul.f32 %v3772_v24, %v5370_v54  ;;  %v2987_v2 = vsel %vm657_vm2, %v2861_v61, 0.0 }
 0x458   : > { %v2973_v41 = vadd.f32 %v2972_v21, %v2971_v35  ;;  %v2603_v9 = vsel %vm1608_vm4, %v2602_v7, %v2598_v40  ;;  %v2983_v35 = vsel %vm657_vm2, %v2859_v5, 0.0  ;;  %v3773_v21 = vld [vmem:[%s4187_s5 + $0x150] sm:$0xff]  ;;  %v2680_v20 = vrot.slane %v5357_v30, %v4779_v62 }
 0x459   : > { %v5382_v42 = vpop.permute.xlu1 %2363  ;;  %v2982_v58 = vadd.f32 %v2981_v6, %v2980_v33  ;;  %v2869_v15 = vmul.f32 %v3774_v45, %v5379_v31  ;;  %v5459_v8 = vsel %vm657_vm2, %v2875_v39, 0.0  ;;  %v2714_v49 = vrot.slane %v5370_v54, %v5806_v3 }
 0x45a   : > { %v5386_v13 = vpop.permute.xlu0 %2417  ;;  %v2974_v32 = vrot.slane %v2973_v41, 4  ;;  %v2865_v51 = vmul.f32 %v3770_v25, %v5382_v42  ;;  %v2632_v28 = vrot.slane %v5382_v42, %v5807_v47  ;;  %v2651_v34 = vrot.slane %v5379_v31, %v4791_v59  ;;  %v3776_v25 = vld [vmem:[%s4187_s5 + $0x1d0] sm:$0xff] }
 0x45b   : > { %v2984_v7 = vadd.f32 %v2983_v35, %v2982_v58  ;;  %v3008_v54 = vsel %vm657_vm2, %v2869_v15, 0.0  ;;  %v2883_v31 = vmul.f32 %v3776_v25, %v5386_v13 }
 0x45c   : > { %v2975_v56 = vadd.f32 %v2974_v32, %v2973_v41  ;;  %v2608_v32 = vsel %vm1615_vm5, %v2607_v50, %v2603_v9  ;;  %v3001_v63 = vsel %vm657_vm2, %v2865_v51, 0.0  ;;  %v5468_v50 = vsel %vm657_vm2, %v2882_v55, 0.0  ;;  %v3777_v51 = vld [vmem:[%s4187_s5 + $0x188] sm:$0xff] }
 0x45d   : > { %v5388_v0 = vpop.permute.xlu1 %2369  ;;  %v3003_v61 = vadd.f32 %v3002_v22, %v3001_v63  ;;  %v5479_v40 = vsel %vm1622_vm6, %v2612_v53, %v2608_v32  ;;  %v2986_v39 = vadd.f32 %v2985_v52, %v2984_v7  ;;  %v2637_v22 = vsel %vm1601_vm3, %v2636_v27, %v2632_v28  ;;  %v3778_v9 = vld [vmem:[%s4187_s5 + $0x168] sm:$0xff] }
 0x45e   : > { %v5395_v16 = vpop.permute.xlu0 %2378  ;;  %v2867_v41 = vmul.f32 %v3773_v21, %v5388_v0  ;;  %v2976_v48 = vrot.slane %v2975_v56, 2  ;;  %v2641_v5 = vrot.slane %v5388_v0, %v4779_v62  ;;  %v2719_v55 = vrot.slane %v5386_v13, %v4779_v62  ;;  %v3779_v21 = vld [vmem:[%s4187_s5 + $0x128] sm:$0xff] }
 0x45f   : > { %v2870_v53 = vmul.f32 %v3778_v9, %v5395_v16  ;;  %v3046_v13 = vsel %vm657_vm2, %v2883_v31, 0.0 }
 0x460   : > { %v3004_v26 = vsel %vm657_vm2, %v2867_v41, 0.0  ;;  %v5481_v33 = vadd.f32 %v2976_v48, %v2975_v56  ;;  %v2642_v35 = vsel %vm1608_vm4, %v2641_v5, %v2637_v22  ;;  %v3780_v41 = vld [vmem:[%s4187_s5 + $0x1d8] sm:$0xff]  ;;  %v3781_v48 = vld [vmem:[%s4187_s5 + $0x1c0] sm:$0xff]  ;;  %v2988_v5 = vadd.f32 %v2987_v2, %v2986_v39 }
 0x461   : > { %v5392_v12 = vpop.permute.xlu1 %2390  ;;  %v3010_v7 = vsel %vm657_vm2, %v2870_v53, 0.0  ;;  %v3786_v22 = vld [vmem:[%s4187_s5 + $0x1e0] sm:$0xff] }
 0x462   : > { %v5410_v38 = vpop.permute.xlu0 %2420  ;;  %v2874_v0 = vmul.f32 %v3777_v51, %v5392_v12  ;;  %v2675_v52 = vrot.slane %v5392_v12, %v5806_v3  ;;  %v3782_v12 = vld [vmem:[%s4187_s5 + $0x130] sm:$0xff] }
 0x463   : > { %v2884_v58 = vmul.f32 %v3780_v41, %v5410_v38  ;;  %v2724_v28 = vrot.slane %v5410_v38, %v4788_v46 }
 0x464   : > { %v3023_v63 = vsel %vm657_vm2, %v2874_v0, 0.0 }
 0x465   : > { %v5397_v14 = vpop.permute.xlu1 %2372  ;;  %v3024_v31 = vadd.f32 %v3023_v63, %v5433_v37  ;;  %v3048_v38 = vsel %vm657_vm2, %v2884_v58, 0.0 }
 0x466   : > { %v5452_v43 = vpop.permute.xlu0 %2381  ;;  %v2868_v18 = vmul.f32 %v3775_v57, %v5397_v14  ;;  %v2646_v42 = vrot.slane %v5397_v14, %v4788_v46  ;;  %v3005_v14 = vadd.f32 %v3004_v26, %v3003_v61 }
 0x467   : > { %v3026_v62 = vadd.f32 %v5459_v8, %v3024_v31 }
 0x468   : > { %v3006_v60 = vsel %vm657_vm2, %v2868_v18, 0.0  ;;  %v2647_v45 = vsel %vm1615_vm5, %v2646_v42, %v2642_v35  ;;  %v2656_v18 = vrot.slane %v5395_v16, %v4810_v19  ;;  %v3783_v16 = vld [vmem:[%s4187_s5 + $0x198] sm:$0xff] }
 0x469   : > { %v5412_v1 = vpop.permute.xlu1 %2411  ;;  %v3007_v15 = vadd.f32 %v3006_v60, %v3005_v14  ;;  %v2652_v61 = vsel %vm1622_vm6, %v2651_v34, %v2647_v45  ;;  %v3785_v60 = vld [vmem:[%s4187_s5 + $0x1a0] sm:$0xff] }
 0x46a   : > { %v5491_v56 = vpop.permute.xlu0 %2423  ;;  %v2881_v32 = vmul.f32 %v3781_v48, %v5412_v1  ;;  %v2710_v3 = vrot.slane %v5412_v1, %v5807_v47  ;;  %v2676_v1 = vsel %vm1601_vm3, %v2675_v52, %v2671_v36  ;;  %v3784_v47 = vld [vmem:[%s4187_s5 + $0x170] sm:$0xff]  ;;  %v2657_v37 = vsel %vm1629_vm7, %v2656_v18, %v2652_v61 }
 0x46b   : > { %v3009_v2 = vadd.f32 %v3008_v54, %v3007_v15  ;;  %v2871_v23 = vmul.f32 %v3784_v47, %v5452_v43  ;;  %v2885_v54 = vmul.f32 %v3786_v22, %v5491_v56  ;;  %v2681_v9 = vsel %vm1608_vm4, %v2680_v20, %v2676_v1 }
 0x46c   : > { %v3043_v51 = vsel %vm657_vm2, %v2881_v32, 0.0  ;;  %v2715_v36 = vsel %vm1601_vm3, %v2714_v49, %v2710_v3  ;;  %v2661_v49 = vrot.slane %v5452_v43, %v4824_v10  ;;  %v2729_v15 = vrot.slane %v5491_v56, %v4791_v59 }
 0x46d   : > { %v5438_v4 = vpop.permute.xlu1 %2354  ;;  %v3045_v35 = vadd.f32 %v5468_v50, %v3043_v51  ;;  %v3011_v41 = vadd.f32 %v3010_v7, %v3009_v2  ;;  %v2720_v58 = vsel %vm1608_vm4, %v2719_v55, %v2715_v36  ;;  %v3012_v45 = vsel %vm657_vm2, %v2871_v23, 0.0  ;;  %v3789_v7 = vld [vmem:[%s4187_s5 + $0x1a8] sm:$0xff] }
 0x46e   : > { %v2862_v27 = vmul.f32 %v3779_v21, %v5438_v4  ;;  %v5531_v0 = vpop.permute.xlu0 %2405  ;;  %v3787_v21 = vld [vmem:[%s4187_s5 + $0x138] sm:$0xff]  ;;  %v2662_v20 = vsel %vm1636_vm8, %v2661_v49, %v2657_v37  ;;  %v3050_v48 = vsel %vm657_vm2, %v2885_v54, 0.0  ;;  %v2617_v56 = vrot.slane %v5438_v4, %v4810_v19 }
 0x46f   : > { %v3047_v3 = vadd.f32 %v3046_v13, %v3045_v35  ;;  %v3013_v1 = vadd.f32 %v3012_v45, %v3011_v41  ;;  %v3792_v41 = vld [vmem:[%s4187_s5 + $0x1e8] sm:$0xff] }
 0x470   : > { %v2989_v42 = vsel %vm657_vm2, %v2862_v27, 0.0 }
 0x471   : > { %v5465_v6 = vpop.permute.xlu1 %2396  ;;  %v2990_v14 = vadd.f32 %v2989_v42, %v2988_v5 }
 0x472   : > { %v2876_v25 = vmul.f32 %v3783_v16, %v5465_v6  ;;  %v5563_v55 = vpop.permute.xlu0 %2408  ;;  %v2685_v61 = vrot.slane %v5465_v6, %v4788_v46  ;;  %v3790_v16 = vld [vmem:[%s4187_s5 + $0x1b8] sm:$0xff]  ;;  %v3049_v46 = vadd.f32 %v3048_v38, %v3047_v3 }
 0x474   : > { %v3027_v52 = vsel %vm657_vm2, %v2876_v25, 0.0  ;;  %v2880_v25 = vmul.f32 %v3790_v16, %v5563_v55 }
 0x475   : > { %v5493_v24 = vpop.permute.xlu1 %2357  ;;  %v3028_v32 = vadd.f32 %v3027_v52, %v3026_v62  ;;  %v3051_v52 = vadd.f32 %v3050_v48, %v3049_v46 }
 0x476   : > { %v2863_v57 = vmul.f32 %v3782_v12, %v5493_v24  ;;  %v2725_v12 = vsel %vm1615_vm5, %v2724_v28, %v2720_v58  ;;  %v2622_v51 = vrot.slane %v5493_v24, %v4824_v10  ;;  %v3035_v37 = vsel %vm657_vm2, %v2880_v25, 0.0 }
 0x477   : > { %v2730_v2 = vsel %vm1622_vm6, %v2729_v15, %v2725_v12 }
 0x478   : > { %v2991_v34 = vsel %vm657_vm2, %v2863_v57, 0.0  ;;  %v3788_v57 = vld [vmem:[%s4187_s5 + $0x1b0] sm:$0xff] }
 0x479   : > { %v5518_v26 = vpop.permute.xlu1 %2399  ;;  %v2992_v30 = vadd.f32 %v2991_v34, %v2990_v14  ;;  %v2879_v18 = vmul.f32 %v3788_v57, %v5531_v0  ;;  %v3791_v34 = vld [vmem:[%s4187_s5 + $0x178] sm:$0xff] }
 0x47a   : > { %v2877_v39 = vmul.f32 %v3785_v60, %v5518_v26  ;;  %v2690_v13 = vrot.slane %v5518_v26, %v4791_v59  ;;  %v2618_v26 = vsel %vm1629_vm7, %v2617_v56, %v5479_v40  ;;  %v2686_v60 = vsel %vm1615_vm5, %v2685_v61, %v2681_v9 }
 0x47b   : > { %v3033_v6 = vsel %vm657_vm2, %v2879_v18, 0.0  ;;  %v2623_v14 = vsel %vm1636_vm8, %v2622_v51, %v2618_v26  ;;  %v2700_v9 = vrot.slane %v5531_v0, %v4824_v10  ;;  %v3794_v18 = vld [vmem:[%s4187_s5 + $0x1f0] sm:$0xff] }
 0x47c   : > { %v3029_v43 = vsel %vm657_vm2, %v2877_v39, 0.0  ;;  %v2691_v38 = vsel %vm1622_vm6, %v2690_v13, %v2686_v60 }
 0x47d   : > { %v5546_v53 = vpop.permute.xlu1 %2360  ;;  %v3030_v42 = vadd.f32 %v3029_v43, %v3028_v32 }
 0x47e   : > { %v2864_v27 = vmul.f32 %v3787_v21, %v5546_v53  ;;  %v2627_v36 = vrot.slane %v5546_v53, %v4821_v29  ;;  %v2433_v21 = vpop.permute.xlu0 %2432 }
 0x47f   : > { %v2744_v32 = vrot.slane %v2433_v21, %v4821_v29 }
 0x480   : > { %v2993_v50 = vsel %vm657_vm2, %v2864_v27, 0.0  ;;  %v2628_v27 = vsel %vm1643_vm9, %v2627_v36, %v2623_v14  ;;  %v2889_v14 = vld [vmem:[#allocation4] sm:$0xff] }
 0x481   : > { %v2994_v8 = vadd.f32 %v2993_v50, %v2992_v30  ;;  %v2403_v63 = vpop.permute.xlu1 %2402  ;;  %v2705_v50 = vrot.slane %v5563_v55, %v4821_v29 }
 0x482   : > { %v2878_v5 = vmul.f32 %v3789_v7, %v2403_v63  ;;  %v2695_v4 = vrot.slane %v2403_v63, %v4810_v19 }
 0x483   : > { %v2995_v28 = vrot.slane %v2994_v8, 4 }
 0x484   : > { %v3031_v31 = vsel %vm657_vm2, %v2878_v5, 0.0  ;;  %v2696_v53 = vsel %vm1629_vm7, %v2695_v4, %v2691_v38 }
 0x485   : > { %v3032_v47 = vadd.f32 %v3031_v31, %v3030_v42  ;;  %v2385_v23 = vpop.permute.xlu1 %2384  ;;  %v2996_v22 = vadd.f32 %v2995_v28, %v2994_v8  ;;  %v2701_v48 = vsel %vm1636_vm8, %v2700_v9, %v2696_v53  ;;  %v2749_v8 = vsel %vm1924_vm13, %v2628_v27, %v5373_v11  ;;  %v2893_v53 = vpop.permute.xlu0 %2892  ;;  %v2176_v27 = vld [vmem:[#allocation3] sm:$0xff] }
 0x486   : > { %v2872_v59 = vmul.f32 %v3791_v34, %v2385_v23  ;;  %v2666_v24 = vrot.slane %v2385_v23, %v4821_v29  ;;  %v2706_v29 = vsel %vm1643_vm9, %v2705_v50, %v2701_v48 }
 0x487   : > { %v3034_v39 = vadd.f32 %v3033_v6, %v3032_v47  ;;  %v2997_v15 = vrot.slane %v2996_v22, 2 }
 0x488   : > { %v3014_v54 = vsel %vm657_vm2, %v2872_v59, 0.0  ;;  %v2667_v30 = vsel %vm1643_vm9, %v2666_v24, %v2662_v20  ;;  %v3793_v20 = vld [vmem:[%s4187_s5 + $0x1f8] sm:$0xff] }
 0x489   : > { %v3036_v49 = vadd.f32 %v3035_v37, %v3034_v39  ;;  %v3015_v35 = vadd.f32 %v3014_v54, %v3013_v1  ;;  %v2427_v40 = vpop.permute.xlu1 %2426  ;;  %v2888_v57 = vmul.f32 %v3793_v20, %v2433_v21  ;;  %v2750_v55 = vsel %vm1926_vm14, %v2667_v30, %v2749_v8 }
 0x48a   : > { %v2886_v58 = vmul.f32 %v3792_v41, %v2427_v40  ;;  %v2734_v43 = vrot.slane %v2427_v40, %v4810_v19  ;;  %v2998_v61 = vadd.f32 %v2997_v15, %v2996_v22  ;;  %v2751_v28 = vsel %vm1928_vm15, %v2706_v29, %v2750_v55 }
 0x48b   : > { %v3037_v62 = vrot.slane %v3036_v49, 4  ;;  %v3016_v45 = vrot.slane %v3015_v35, 4  ;;  %v3056_v31 = vsel %vm657_vm2, %v2888_v57, 0.0  ;;  %v3914_v30 = vmov (!%p3252_p5), 0  }
 0x48c   : > { %v3052_v0 = vsel %vm657_vm2, %v2886_v58, 0.0  ;;  %v2735_v1 = vsel %vm1629_vm7, %v2734_v43, %v2730_v2  ;;  %v2978_v2 = vrot.slane %v5481_v33, 1  ;;  %v2999_v23 = vrot.slane %v2998_v61, 1  ;;  %3795 = vset.pattern.permute.xlu0 (!%p3252_p5), %v3914_v30 }
 0x48d   : > { %v3038_v63 = vadd.f32 %v3037_v62, %v3036_v49  ;;  %v3017_v3 = vadd.f32 %v3016_v45, %v3015_v35  ;;  %v2430_v12 = vpop.permute.xlu1 %2429  ;;  %v3053_v56 = vadd.f32 %v3052_v0, %v3051_v52  ;;  %v2895_v52 = vmul.f32 %v2893_v53, %v2889_v14 }
 0x48e   : > { %v2739_v19 = vrot.slane %v2430_v12, %v4824_v10  ;;  %v2887_v7 = vmul.f32 %v3794_v18, %v2430_v12  ;;  %v2979_v34 = vadd.f32 %v2978_v2, %v5481_v33  ;;  %v3000_v26 = vadd.f32 %v2999_v23, %v2998_v61 }
 0x48f   : > { %v3018_v5 = vrot.slane %v3017_v3, 2  ;;  %v3039_v42 = vrot.slane %v3038_v63, 2 }
 0x490   : > { %v2740_v11 = vsel %vm1636_vm8, %v2739_v19, %v2735_v1  ;;  %v3054_v16 = vsel %vm657_vm2, %v2887_v7, 0.0  ;;  %v3074_v37 = vsel %vm1922_vm12, %v2979_v34, %v5366_v17  ;;  %v2177_v17 = vmul.f32 %v5186_v44, %v2176_v27 }
 0x491   : > { %v3019_v25 = vadd.f32 %v3018_v5, %v3017_v3  ;;  %v3055_v13 = vadd.f32 %v3054_v16, %v3053_v56  ;;  %v2745_v10 = vsel %vm1643_vm9, %v2744_v32, %v2740_v11  ;;  %v3040_v46 = vadd.f32 %v3039_v42, %v3038_v63 }
 0x492   : > { %v2752_v51 = vsel %vm1930_vm0, %v2745_v10, %v2751_v28  ;;  %v3075_v22 = vsel %vm1924_vm13, %v3000_v26, %v3074_v37 }
 0x493   : > { %v3057_v4 = vadd.f32 %v3056_v31, %v3055_v13  ;;  %v2754_v47 = vsel %vm657_vm2, %v2752_v51, 0.0  ;;  %v3020_v6 = vrot.slane %v3019_v25, 1  ;;  %v3041_v60 = vrot.slane %v3040_v46, 1 }
 0x494   : > { %2755 = vadd.xlane.f32.xlu1 %v2754_v47 }
 0x495   : > { %v3058_v36 = vrot.slane %v3057_v4, 4  ;;  %v3021_v39 = vadd.f32 %v3020_v6, %v3019_v25  ;;  %v3042_v54 = vadd.f32 %v3041_v60, %v3040_v46 }
 0x497   : > { %v3059_v59 = vadd.f32 %v3058_v36, %v3057_v4  ;;  %v3076_v49 = vsel %vm1926_vm14, %v3021_v39, %v3075_v22 }
 0x498   : > { %v3077_v33 = vsel %vm1928_vm15, %v3042_v54, %v3076_v49 }
 0x499   : > { %v3060_v24 = vrot.slane %v3059_v59, 2 }
 0x49b   : > { %v3061_v38 = vadd.f32 %v3060_v24, %v3059_v59 }
 0x49d   : > { %v3062_v35 = vrot.slane %v3061_v38, 1 }
 0x49f   : > { %v3063_v40 = vadd.f32 %v3062_v35, %v3061_v38 }
 0x4a1   : > { %v3078_v9 = vsel %vm1930_vm0, %v3063_v40, %v3077_v33 }
 0x4a2   : > { %v3080_v21 = vadd.f32 %v3078_v9, %v2895_v52 }
 0x4a4   : > { %3081 = vst.msk [vmem:[#allocation4] sm:$0xff] %vm657_vm2, %v3080_v21 }
 0x4ab   : > { %v3088_v43 = vld [vmem:[#allocation4] sm:$0xff] (!%p3252_p5) }
 0x51e   : > { %3085 = sbr.rel (%p3252_p5) target bundleno = 1466 (0x5ba), region = 82 }
 0x521   : > { %v2756_v41 = vpop.xlane.xlu1 %2755 }
 0x522   : > { %v2757_v58 = vadd.f32 %v2756_v41, %v2177_v17 }
 0x524   : > { %2759 = vst.msk [vmem:[#allocation3] sm:$0xff] %vm2758_vm1, %v2757_v58 }
 0x52b   : > { %v3086_v62 = vld [vmem:[#allocation3] sm:$0xff] }
 0x52c   : > { %3796 = vrcp.f32 %v3086_v62 }
 0x536   : > { %v3797_v45 = vpop.eup %3796 }
 0x537   : > { %3091 = vperm.xlu0 %3795, %v3797_v45  }
 0x5b6   : > { %v3092_v50 = vpop.permute.xlu0 %3091 }
 0x5b7   : > { %v3094_v15 = vmul.f32 %v3092_v50, %v3088_v43 }
 0x5b9   : > { %3095 = vst.msk [vmem:[%s512_s1] sm:$0xff] %vm657_vm2, %v3094_v15 }
 0x5ba PF: > { %s3254_s20 = sshll.u32 %s3896_s21, 7  ;;  %s3110_s8 = sshll.u32 %s512_s1, 4  ;;  %s3111_s8 = int_to_ptr.vmem [resolvable:$true] %s3110_s8 }
 0x5bb   : > { %s5640_s30 = scalar_lea.hbm %s5701_s4, %s3254_s20  ;;  %s3097_s9 = scalar_lea.sflag [#allocation7], %s510_s14 }
 0x5bc   : > { %s3798_s6 = scalar_lea.vmem %s3111_s8, 128  ;;  %s3915_s18 = smov [#allocation6]  }
 0x5bd   : > { %p3799_p6 = scmp.ne.s32.totalorder %s3111_s8, %s3798_s6  ;;  %s3802_s29 = sshll.u32 %s3915_s18, 4  ;;  %s3803_s29 = int_to_ptr.vmem [resolvable:$false] %s3802_s29 }
 0x5be   : > { %s3804_s13 = scalar_lea.vmem %s3803_s29, 256  ;;  %p3805_p10 = scmp.lt.s32.totalorder %s3111_s8, %s3803_s29 }
 0x5bf   : > { %p3800_p8 = pnand %p3799_p6, %p4013_p7  ;;  %p3806_p11 = scmp.lt.s32.totalorder %s3804_s13, %s3798_s6 }
 0x5c1   : > { %p3801_p9 = pneg %p3800_p8  ;;  %p3807_p13 = por %p3806_p11, %p3805_p10 }
 0x5c3   : > { %p3808_p0 = pnand %p3807_p13, %p3801_p9 }
 0x5c5   : > { %3811 = shalt.err (!%p3808_p0)
}
 0x5c6   : > { %s3812_s1 = scalar_lea.hbm %s5640_s30, 128  ;;  %s3816_s26 = scalar_lea.hbm %s5701_s4, 256 }
 0x5c7   : > { %p3813_p1 = scmp.ne.s32.totalorder %s5640_s30, %s3812_s1  ;;  %p3817_p4 = scmp.lt.u32.totalorder %s5640_s30, %s5701_s4 }
 0x5c8   : > { %p3818_p5 = scmp.lt.u32.totalorder %s3816_s26, %s3812_s1  ;;  %p3820_p8 = scmp.lt.u32.totalorder %s3812_s1, %s5640_s30 }
 0x5c9   : > { %p3814_p2 = pnand %p3813_p1, %p4013_p7 }
 0x5ca   : > { %p3819_p6 = por %p3818_p5, %p3817_p4 }
 0x5cb   : > { %p3815_p3 = pneg %p3814_p2 }
 0x5cc   : > { %p3821_p9 = por %p3820_p8, %p3819_p6 }
 0x5ce   : > { %p3822_p10 = pnand %p3821_p9, %p3815_p3 }
 0x5d0   : > { %3825 = shalt.err (!%p3822_p10)
}
 0x5d1   : > { %3374 = dma.vmem_to_hbm [thread:$0]  (%p4013_p7), %s3111_s8, 128, %s5640_s30, %s3097_s9  }
 0x5d2 PF: > { %p3380_p11 = scmp.ge.s32.totalorder %s3908_s24, 2  ;;  %s3122_s25 = sand.u32 1, %s3872_s15  }
 0x5d3   : > { %s3123_s6 = scalar_lea.sflag [#allocation7], %s3122_s25 }
 0x5d4   : > { %p3377_p13 = pnand %p3380_p11, %p4021_p12 }
 0x5d6   : > { %3867 = dma.done.wait (!%p3377_p13), %s3123_s6, 128  }
 0x5d7   : > { %3869 = vsyncadd (!%p3377_p13), %s3123_s6, 4294967168  ;;  %s17_s24 = sadd.s32 1, %s3908_s24   ;;  %s5808_s15 = smov %s3876_s16 }
 0x5d8   : > { %p14_p0 = scmp.ge.s32.totalorder %s17_s24, 6   ;;  %s5809_s16 = smov %s3880_s17 }
 0x5d9   : > { %s5810_s17 = smov %s4026_s11  ;;  %s5811_s18 = smov %s3888_s19 }
 0x5da   : > { %s5812_s19 = smov %s4029_s12  ;;  %s5813_s20 = smov %s3900_s22 }
 0x5db   : > { %s5814_s21 = smov %s3904_s23  ;;  %s5815_s22 = smov %s5818_s27 }
 0x5dc   : > { %s5816_s23 = smov %s5822_s28  ;;  %16 = sbr.rel (!%p14_p0) target bundleno = 8 (0x8), region = 125 }
 0x5e3   :  { %3128 = vsyncpa [#allocation7], 1 }
 0x5e4   :  { %3130 = vsyncpa [#allocation7 + $0x1], 1 }

</bundles_post_ra>
